<compile_context>
chip_gen: v5e
topology: v5e:2x2
jax: 0.10.0
libtpu: 0.0.40
codegen_flags: <defaults>
</compile_context>

<pallas_src>
import functools

import jax
import jax.numpy as jnp
from jax.experimental import pallas as pl
from jax.experimental.pallas import tpu as pltpu

DEPTH = 3
HEIGHT = 32
WIDTH = 32
NUM_CLASSES = 10
IN_DIM = DEPTH * HEIGHT * WIDTH   # 3072
HIDDEN = 256
PADDED_CLASSES = 128              # lane-dense output head (>= NUM_CLASSES)


def _round_up(x, m):
    return (x + m - 1) // m * m


def mlp_kernel(x_ref, w1_ref, b1_ref, w2_ref, b2_ref, w3_ref, b3_ref, o_ref):
    """One batch tile: 3 matmuls (bf16 operands, f32 MXU acc) + ReLU + log_softmax."""
    # x arrives in its native dtype (f32 here); cast to bf16 in-kernel so the
    # wrapper never needs a separate HBM convert pass.
    x = x_ref[...].astype(jnp.bfloat16)                               # (TB, IN_DIM)

    # fc1 + relu
    h = jnp.dot(x, w1_ref[...], preferred_element_type=jnp.float32) + b1_ref[...]
    h = jnp.maximum(h, 0.0)

    # fc2 + relu
    h = jnp.dot(h.astype(jnp.bfloat16), w2_ref[...],
                preferred_element_type=jnp.float32) + b2_ref[...]
    h = jnp.maximum(h, 0.0)

    # fc3 + relu  (class dim pre-padded to 128; padded weight cols / bias are 0)
    h = jnp.dot(h.astype(jnp.bfloat16), w3_ref[...],
                preferred_element_type=jnp.float32) + b3_ref[...]
    h = jnp.maximum(h, 0.0)                                           # (TB, 128) f32

    # Mask the 118 padded class lanes to -inf so they don't affect max/logsumexp.
    # NOTE: this is safe only because the ReLU above guarantees a finite row max
    # (>= 0); if that ReLU were removed, an all--inf row could produce NaNs.
    col = jax.lax.broadcasted_iota(jnp.int32, h.shape, dimension=1)
    h = jnp.where(col < NUM_CLASSES, h, -jnp.inf)

    # Numerically stable log_softmax over the 10 valid lanes.
    m = jnp.max(h, axis=1, keepdims=True)
    shifted = h - m
    lse = jnp.log(jnp.sum(jnp.exp(shifted), axis=1, keepdims=True))
    # Padded lanes hold -inf; they are sliced off in the wrapper, so no final
    # re-mask is needed.  Store bf16 to halve writeback traffic.
    o_ref[...] = (shifted - lse).astype(o_ref.dtype)


def prepare_params(w1, b1, w2, b2, w3, b3):
    """One-time weight prep (call once, NOT per forward): bf16 matmul operands,
    class head padded 10 -> 128 lanes (zero columns are masked in-kernel)."""
    w1b = w1.astype(jnp.bfloat16)
    w2b = w2.astype(jnp.bfloat16)
    w3b = jnp.pad(w3.astype(jnp.bfloat16),
                  ((0, 0), (0, PADDED_CLASSES - NUM_CLASSES)))
    b3p = jnp.pad(b3, ((0, 0), (0, PADDED_CLASSES - NUM_CLASSES)))
    return w1b, b1, w2b, b2, w3b, b3p


@functools.partial(jax.jit, static_argnames=("block_b",))
def mlp_forward(x, w1, b1, w2, b2, w3, b3, *, block_b=512):
    """x: (B, 3072) f32 (or bf16).  Weights/biases must come from prepare_params()."""
    batch = x.shape[0]

    # Batch tile: multiple of 16 (bf16 packs two rows per sublane), capped at
    # block_b.  block_b=512 reaches ~85% of HBM roofline; 1024 is fine on
    # v6e/v7x if vmem_limit below is grown to match.
    tb = min(block_b, _round_up(batch, 16))
    # Prefer >= 2 grid steps so the "parallel" batch axis can shard across both
    # TensorCores on v7x (harmless on single-TC v5e/v6e).
    if _round_up(batch, tb) // tb < 2 and tb >= 32:
        tb = _round_up(tb // 2, 16)
    padded_b = _round_up(batch, tb)
    # Pad only when the batch doesn't tile evenly (no-op for typical batches).
    xp = x if padded_b == batch else jnp.pad(x, ((0, padded_b - batch), (0, 0)))

    grid = (padded_b // tb,)
    const2 = lambda i: (0, 0)
    x_bytes = x.dtype.itemsize

    # Scoped-VMEM budget: double-buffered x tiles + resident weights + out tiles.
    w_bytes = (IN_DIM * HIDDEN + HIDDEN * HIDDEN + HIDDEN * PADDED_CLASSES) * 2
    b_bytes = (2 * HIDDEN + PADDED_CLASSES) * 4
    vmem_bytes = (2 * tb * IN_DIM * x_bytes          # x tiles (double-buffered)
                  + 2 * (w_bytes + b_bytes)          # weights / biases
                  + 2 * tb * PADDED_CLASSES * 2      # bf16 output tiles
                  + 4 * 2**20)                       # compiler scratch headroom
    vmem_limit = int(min(max(vmem_bytes, 32 * 2**20), 48 * 2**20))

    flops = 2 * padded_b * (IN_DIM * HIDDEN + HIDDEN * HIDDEN + HIDDEN * PADDED_CLASSES)
    bytes_accessed = (padded_b * IN_DIM * x_bytes          # x (native dtype)
                      + w_bytes + b_bytes                  # weights (bf16) + biases (f32)
                      + padded_b * PADDED_CLASSES * 2)     # output (bf16)
    transcendentals = padded_b * (PADDED_CLASSES + 1)      # exp + log (advisory)

    out = pl.pallas_call(
        mlp_kernel,
        out_shape=jax.ShapeDtypeStruct((padded_b, PADDED_CLASSES), jnp.bfloat16),
        grid_spec=pltpu.PrefetchScalarGridSpec(
            num_scalar_prefetch=0,
            grid=grid,
            in_specs=[
                pl.BlockSpec((tb, IN_DIM), lambda i: (i, 0)),          # x tile
                pl.BlockSpec((IN_DIM, HIDDEN), const2),                # W1 (resident)
                pl.BlockSpec((1, HIDDEN), const2),                     # b1
                pl.BlockSpec((HIDDEN, HIDDEN), const2),                # W2
                pl.BlockSpec((1, HIDDEN), const2),                     # b2
                pl.BlockSpec((HIDDEN, PADDED_CLASSES), const2),        # W3 (padded)
                pl.BlockSpec((1, PADDED_CLASSES), const2),             # b3 (padded)
            ],
            out_specs=pl.BlockSpec((tb, PADDED_CLASSES), lambda i: (i, 0)),
        ),
        compiler_params=pltpu.CompilerParams(
            dimension_semantics=("parallel",),
            vmem_limit_bytes=vmem_limit),
        cost_estimate=pl.CostEstimate(
            flops=flops,
            transcendentals=transcendentals,
            bytes_accessed=bytes_accessed),
    )(xp, w1, b1, w2, b2, w3, b3)

    # Drop batch padding + the 118 padded class lanes; return f32 like the
    # PyTorch module (tiny (B, 10) cast — negligible).
    return out[:batch, :NUM_CLASSES].astype(jnp.float32)


def init_params(key):
    """Deterministic parameter init (nn.Linear default init, transposed shapes)."""
    ks = jax.random.split(key, 6)

    def linear(kw, kb, fan_in, fan_out):
        bound = 1.0 / jnp.sqrt(jnp.float32(fan_in))
        w = jax.random.uniform(kw, (fan_in, fan_out), jnp.float32, -bound, bound)
        b = jax.random.uniform(kb, (1, fan_out), jnp.float32, -bound, bound)
        return w, b

    w1, b1 = linear(ks[0], ks[1], IN_DIM, HIDDEN)
    w2, b2 = linear(ks[2], ks[3], HIDDEN, HIDDEN)
    w3, b3 = linear(ks[4], ks[5], HIDDEN, NUM_CLASSES)
    return w1, b1, w2, b2, w3, b3


def reference_forward_bf16(x, w1, b1, w2, b2, w3, b3):
    """Mirrors kernel numerics: bf16 operands, f32 accumulation."""
    xb = x.astype(jnp.bfloat16)
    w1b, w2b, w3b = (w.astype(jnp.bfloat16) for w in (w1, w2, w3))
    h = jnp.maximum(jnp.dot(xb, w1b, preferred_element_type=jnp.float32) + b1, 0.0)
    h = jnp.maximum(jnp.dot(h.astype(jnp.bfloat16), w2b,
                            preferred_element_type=jnp.float32) + b2, 0.0)
    h = jnp.maximum(jnp.dot(h.astype(jnp.bfloat16), w3b,
                            preferred_element_type=jnp.float32) + b3, 0.0)
    return jax.nn.log_softmax(h, axis=1)


def reference_forward_f32(x, w1, b1, w2, b2, w3, b3):
    h = jnp.maximum(x @ w1 + b1, 0.0)
    h = jnp.maximum(h @ w2 + b2, 0.0)
    h = jnp.maximum(h @ w3 + b3, 0.0)
    return jax.nn.log_softmax(h, axis=1)


if __name__ == "__main__":
    key = jax.random.PRNGKey(0)
    k_params, k_x = jax.random.split(key)

    raw_params = init_params(k_params)
    params = prepare_params(*raw_params)   # one-time bf16 convert + head pad

    batch = 32
    x = jax.random.normal(k_x, (batch, IN_DIM), jnp.float32)

    out = jax.block_until_ready(mlp_forward(x, *params))

    assert out.shape == (batch, NUM_CLASSES)
    assert bool(jnp.all(jnp.isfinite(out))), "non-finite outputs"
    ref_bf16 = reference_forward_bf16(x, *raw_params)
    assert jnp.allclose(out, ref_bf16, atol=3e-2, rtol=3e-2), "mismatch vs bf16 reference"
    ref_f32 = reference_forward_f32(x, *raw_params)
    assert jnp.allclose(out, ref_f32, atol=1e-1, rtol=1e-1), "mismatch vs f32 reference"

    print("KERNEL_OK")
</pallas_src>

<mosaic_0001>
module attributes {stable_mosaic.version = 11 : i64} {
  func.func @mlp_kernel(%arg0: i32, %arg1: memref<16x3072xf32, #tpu.memory_space<vmem>>, %arg2: memref<3072x256xbf16, #tpu.memory_space<vmem>>, %arg3: memref<1x256xf32, #tpu.memory_space<vmem>>, %arg4: memref<256x256xbf16, #tpu.memory_space<vmem>>, %arg5: memref<1x256xf32, #tpu.memory_space<vmem>>, %arg6: memref<256x128xbf16, #tpu.memory_space<vmem>>, %arg7: memref<1x128xf32, #tpu.memory_space<vmem>>, %arg8: memref<16x128xbf16, #tpu.memory_space<vmem>>) attributes {dimension_semantics = [#tpu.dimension_semantics<parallel>], iteration_bounds = array<i64: 2>, scalar_prefetch = 0 : i64, scratch_operands = 0 : i64, tpu.core_type = #tpu.core_type<tc>, window_params = [{transform_indices = @transform_0, window_bounds = array<i64: 16, 3072>}, {pipeline_mode = #tpu.pipeline_mode<synchronous>, transform_indices = @transform_1, window_bounds = array<i64: 3072, 256>}, {pipeline_mode = #tpu.pipeline_mode<synchronous>, transform_indices = @transform_2, window_bounds = array<i64: 1, 256>}, {pipeline_mode = #tpu.pipeline_mode<synchronous>, transform_indices = @transform_3, window_bounds = array<i64: 256, 256>}, {pipeline_mode = #tpu.pipeline_mode<synchronous>, transform_indices = @transform_4, window_bounds = array<i64: 1, 256>}, {pipeline_mode = #tpu.pipeline_mode<synchronous>, transform_indices = @transform_5, window_bounds = array<i64: 256, 128>}, {pipeline_mode = #tpu.pipeline_mode<synchronous>, transform_indices = @transform_6, window_bounds = array<i64: 1, 128>}, {transform_indices = @transform_7, window_bounds = array<i64: 16, 128>}]} {
    %c0 = arith.constant 0 : index
    %c0_0 = arith.constant 0 : index
    %0 = vector.load %arg1[%c0, %c0_0] : memref<16x3072xf32, #tpu.memory_space<vmem>>, vector<16x3072xf32>
    %1 = arith.truncf %0 : vector<16x3072xf32> to vector<16x3072xbf16>
    %c0_1 = arith.constant 0 : index
    %c0_2 = arith.constant 0 : index
    %2 = vector.load %arg2[%c0_1, %c0_2] : memref<3072x256xbf16, #tpu.memory_space<vmem>>, vector<3072x256xbf16>
    %cst = arith.constant dense<0.000000e+00> : vector<16x256xf32>
    %3 = tpu.matmul %1, %2, %cst {dimension_numbers = #tpu.dot_dimension_numbers<[1], [0], [0], [1], [0, 0, 1, 1], [], []>} : vector<16x3072xbf16>, vector<3072x256xbf16>, vector<16x256xf32> -> vector<16x256xf32>
    %c0_3 = arith.constant 0 : index
    %c0_4 = arith.constant 0 : index
    %4 = vector.load %arg3[%c0_3, %c0_4] : memref<1x256xf32, #tpu.memory_space<vmem>>, vector<1x256xf32>
    %5 = vector.broadcast %4 : vector<1x256xf32> to vector<16x256xf32>
    %6 = arith.addf %3, %5 : vector<16x256xf32>
    %cst_5 = arith.constant 0.000000e+00 : f32
    %7 = vector.broadcast %cst_5 : f32 to vector<16x256xf32>
    %8 = arith.maximumf %6, %7 : vector<16x256xf32>
    %9 = arith.truncf %8 : vector<16x256xf32> to vector<16x256xbf16>
    %c0_6 = arith.constant 0 : index
    %c0_7 = arith.constant 0 : index
    %10 = vector.load %arg4[%c0_6, %c0_7] : memref<256x256xbf16, #tpu.memory_space<vmem>>, vector<256x256xbf16>
    %cst_8 = arith.constant dense<0.000000e+00> : vector<16x256xf32>
    %11 = tpu.matmul %9, %10, %cst_8 {dimension_numbers = #tpu.dot_dimension_numbers<[1], [0], [0], [1], [0, 0, 1, 1], [], []>} : vector<16x256xbf16>, vector<256x256xbf16>, vector<16x256xf32> -> vector<16x256xf32>
    %c0_9 = arith.constant 0 : index
    %c0_10 = arith.constant 0 : index
    %12 = vector.load %arg5[%c0_9, %c0_10] : memref<1x256xf32, #tpu.memory_space<vmem>>, vector<1x256xf32>
    %13 = vector.broadcast %12 : vector<1x256xf32> to vector<16x256xf32>
    %14 = arith.addf %11, %13 : vector<16x256xf32>
    %cst_11 = arith.constant 0.000000e+00 : f32
    %15 = vector.broadcast %cst_11 : f32 to vector<16x256xf32>
    %16 = arith.maximumf %14, %15 : vector<16x256xf32>
    %17 = arith.truncf %16 : vector<16x256xf32> to vector<16x256xbf16>
    %c0_12 = arith.constant 0 : index
    %c0_13 = arith.constant 0 : index
    %18 = vector.load %arg6[%c0_12, %c0_13] : memref<256x128xbf16, #tpu.memory_space<vmem>>, vector<256x128xbf16>
    %cst_14 = arith.constant dense<0.000000e+00> : vector<16x128xf32>
    %19 = tpu.matmul %17, %18, %cst_14 {dimension_numbers = #tpu.dot_dimension_numbers<[1], [0], [0], [1], [0, 0, 1, 1], [], []>} : vector<16x256xbf16>, vector<256x128xbf16>, vector<16x128xf32> -> vector<16x128xf32>
    %c0_15 = arith.constant 0 : index
    %c0_16 = arith.constant 0 : index
    %20 = vector.load %arg7[%c0_15, %c0_16] : memref<1x128xf32, #tpu.memory_space<vmem>>, vector<1x128xf32>
    %21 = vector.broadcast %20 : vector<1x128xf32> to vector<16x128xf32>
    %22 = arith.addf %19, %21 : vector<16x128xf32>
    %cst_17 = arith.constant 0.000000e+00 : f32
    %23 = vector.broadcast %cst_17 : f32 to vector<16x128xf32>
    %24 = arith.maximumf %22, %23 : vector<16x128xf32>
    %25 = tpu.iota {dimensions = array<i32: 1>} : vector<16x128xi32>
    %c10_i32 = arith.constant 10 : i32
    %26 = vector.broadcast %c10_i32 : i32 to vector<16x128xi32>
    %27 = arith.cmpi slt, %25, %26 : vector<16x128xi32>
    %cst_18 = arith.constant 0xFF800000 : f32
    %28 = vector.broadcast %cst_18 : f32 to vector<16x128xf32>
    %29 = arith.select %27, %24, %28 : vector<16x128xi1>, vector<16x128xf32>
    %cst_19 = arith.constant dense<0xFF800000> : vector<16xf32>
    %30 = vector.multi_reduction <maximumf>, %29, %cst_19 [1] : vector<16x128xf32> to vector<16xf32>
    %31 = vector.shape_cast %30 : vector<16xf32> to vector<16x1xf32>
    %32 = vector.broadcast %31 : vector<16x1xf32> to vector<16x128xf32>
    %33 = arith.subf %29, %32 : vector<16x128xf32>
    %34 = math.exp %33 : vector<16x128xf32>
    %cst_20 = arith.constant dense<0.000000e+00> : vector<16xf32>
    %35 = vector.multi_reduction <add>, %34, %cst_20 [1] : vector<16x128xf32> to vector<16xf32>
    %36 = vector.shape_cast %35 : vector<16xf32> to vector<16x1xf32>
    %37 = math.log %36 : vector<16x1xf32>
    %38 = vector.broadcast %37 : vector<16x1xf32> to vector<16x128xf32>
    %39 = arith.subf %33, %38 : vector<16x128xf32>
    %40 = arith.truncf %39 : vector<16x128xf32> to vector<16x128xbf16>
    %c0_21 = arith.constant 0 : index
    %c0_22 = arith.constant 0 : index
    %41 = vector.load %arg8[%c0_21, %c0_22] : memref<16x128xbf16, #tpu.memory_space<vmem>>, vector<16x128xbf16>
    tpu.vector_store %arg8[%c0_21, %c0_22], %40 {strides = array<i32>} : memref<16x128xbf16, #tpu.memory_space<vmem>>, vector<16x128xbf16>,
    return
  }
  func.func @transform_0(%arg0: i32) -> (i32, i32) {
    %c0_i32 = arith.constant 0 : i32
    %c0_i32_0 = arith.constant 0 : i32
    return %arg0, %c0_i32 : i32, i32
  }
  func.func @transform_1(%arg0: i32) -> (i32, i32) {
    %c0_i32 = arith.constant 0 : i32
    %c0_i32_0 = arith.constant 0 : i32
    %c0_i32_1 = arith.constant 0 : i32
    return %c0_i32, %c0_i32_0 : i32, i32
  }
  func.func @transform_2(%arg0: i32) -> (i32, i32) {
    %c0_i32 = arith.constant 0 : i32
    %c0_i32_0 = arith.constant 0 : i32
    %c0_i32_1 = arith.constant 0 : i32
    return %c0_i32, %c0_i32_0 : i32, i32
  }
  func.func @transform_3(%arg0: i32) -> (i32, i32) {
    %c0_i32 = arith.constant 0 : i32
    %c0_i32_0 = arith.constant 0 : i32
    %c0_i32_1 = arith.constant 0 : i32
    return %c0_i32, %c0_i32_0 : i32, i32
  }
  func.func @transform_4(%arg0: i32) -> (i32, i32) {
    %c0_i32 = arith.constant 0 : i32
    %c0_i32_0 = arith.constant 0 : i32
    %c0_i32_1 = arith.constant 0 : i32
    return %c0_i32, %c0_i32_0 : i32, i32
  }
  func.func @transform_5(%arg0: i32) -> (i32, i32) {
    %c0_i32 = arith.constant 0 : i32
    %c0_i32_0 = arith.constant 0 : i32
    %c0_i32_1 = arith.constant 0 : i32
    return %c0_i32, %c0_i32_0 : i32, i32
  }
  func.func @transform_6(%arg0: i32) -> (i32, i32) {
    %c0_i32 = arith.constant 0 : i32
    %c0_i32_0 = arith.constant 0 : i32
    %c0_i32_1 = arith.constant 0 : i32
    return %c0_i32, %c0_i32_0 : i32, i32
  }
  func.func @transform_7(%arg0: i32) -> (i32, i32) {
    %c0_i32 = arith.constant 0 : i32
    %c0_i32_0 = arith.constant 0 : i32
    return %arg0, %c0_i32 : i32, i32
  }
}

</mosaic_0001>

<bundles_post_ra>
// kernel: mlp_forward.1
= control target key start
LH: loop header
LB: loop body
LE: loop exit
PB: predicated region body
PF: predicated region fallthrough
CT: control target
= control target key end

     0   :  { %12 = vsyncpa [#allocation3], 0  ;;  %s7058_s0 = inlined_call_operand.hbm [shape: f32[32,3072], index: 0, kind: input, shape index: {}]   ;;  %s7059_s1 = inlined_call_operand.hbm [shape: bf16[3072,256], index: 1, kind: input, shape index: {}]   ;;  %s7060_s2 = inlined_call_operand.hbm [shape: f32[1,256], index: 2, kind: input, shape index: {}]   ;;  %s7061_s3 = inlined_call_operand.hbm [shape: bf16[256,256], index: 3, kind: input, shape index: {}]   ;;  %s7062_s4 = inlined_call_operand.hbm [shape: f32[1,256], index: 4, kind: input, shape index: {}]   ;;  %s7063_s5 = inlined_call_operand.hbm [shape: bf16[256,128], index: 5, kind: input, shape index: {}]   ;;  %s7064_s6 = inlined_call_operand.hbm [shape: f32[1,128], index: 6, kind: input, shape index: {}]   ;;  %s7065_s7 = inlined_call_operand.vmem [shape: bf16[32,128], index: 7, kind: output, shape index: {}]  }
   0x1   :  { %14 = vsyncpa [#allocation3 + $0x1], 0 }
   0x2   :  { %15 = vsyncpa [#allocation5], 0 }
   0x3   :  { %16 = vsyncpa [#allocation8], 0 }
   0x4   :  { %17 = vsyncpa [#allocation11], 0  ;;  %s6649_s24 = smov 0   ;;  %s6651_s25 = smov 0  }
   0x5   :  { %s6653_s26 = smov 0   ;;  %s6655_s27 = smov 0  }
   0x6 LB: > { %s217_s30 = sshll.u32 %s7059_s1, 4  ;;  %s7066_s8 = sadd.s32 4294967295, %s6595_s27   ;;  %s6595_s27 = sphi %s6655_s27, %s7076_s27   ;;  %s6591_s26 = sphi %s6653_s26, %s7075_s26   ;;  %s6587_s25 = sphi %s6651_s25, %s7074_s25   ;;  %s6583_s24 = sphi %s6649_s24, %s7073_s24   ;;  %s218_s30 = int_to_ptr.hbm [resolvable:$true] %s217_s30 }
   0x7   : > { %p4034_p0 = scmp.ge.s32.totalorder %s6595_s27, 1  ;;  %p6676_p1 = scmp.eq.s32.totalorder %s7066_s8, 0 }
   0x8   : > { %p206_p2 = scmp.lt.s32.totalorder %s6595_s27, 3  ;;  %s6597_s11 = smov [#allocation4]  }
   0x9   : > { %s219_s12 = sshll.u32 %s6597_s11, 4  ;;  %s243_s15 = sshll.u32 %s7061_s3, 4  ;;  %s220_s12 = int_to_ptr.vmem [resolvable:$true] %s219_s12  ;;  %s244_s15 = int_to_ptr.hbm [resolvable:$true] %s243_s15 }
   0xa   : > { %p6681_p3 = pnand %p4034_p0, %p206_p2  ;;  %s269_s19 = sshll.u32 %s7063_s5, 4  ;;  %s270_s19 = int_to_ptr.hbm [resolvable:$true] %s269_s19 }
   0xb   : > { %s6598_s20 = smov [#allocation7]   ;;  %s6599_s22 = smov 128  }
   0xc   : > { %p6250_p4 = pneg %p6681_p3  ;;  %s245_s21 = sshll.u32 %s6598_s20, 4  ;;  %s246_s21 = int_to_ptr.vmem [resolvable:$true] %s245_s21 }
   0xd   : > { %s6600_s23 = smov 8   ;;  %s6601_s28 = smov [#allocation10]  }
   0xe   : > { %p6692_p5 = pnand %p6250_p4, %p6676_p1  ;;  %s271_s29 = sshll.u32 %s6601_s28, 4  ;;  %s272_s29 = int_to_ptr.vmem [resolvable:$true] %s271_s29 }
   0xf   : > { %s232_s14 = sshll.u32 %s7060_s2, 4  ;;  %s6602_s17 = smov 64   ;;  %s233_s14 = int_to_ptr.hbm [resolvable:$true] %s232_s14 }
  0x10   : > { %6253 = dma.hbm_to_vmem [thread:$0]  (!%p6692_p5), %s218_s30, 49152, %s220_s12, [#allocation5], %s6599_s22, %s6599_s22, %s6600_s23  }
  0x11   : > { %6259 = dma.hbm_to_vmem [thread:$0]  (!%p6692_p5), %s244_s15, 4096, %s246_s21, [#allocation8], %s6599_s22, %s6599_s22, %s6600_s23  }
  0x12   : > { %s6603_s18 = smov 4   ;;  %s6604_s30 = smov [#allocation6]  }
  0x13   : > { %6265 = dma.hbm_to_vmem [thread:$0]  (!%p6692_p5), %s270_s19, 2048, %s272_s29, [#allocation11], %s6602_s17, %s6602_s17, %s6603_s18  }
  0x14   : > { %s234_s12 = sshll.u32 %s6604_s30, 4  ;;  %s258_s15 = sshll.u32 %s7062_s4, 4  ;;  %s235_s12 = int_to_ptr.vmem [resolvable:$true] %s234_s12  ;;  %s259_s15 = int_to_ptr.hbm [resolvable:$true] %s258_s15 }
  0x15   : > { %6256 = dma.hbm_to_vmem [thread:$0]  (!%p6692_p5), %s233_s14, 32, %s235_s12, [#allocation5]  }
  0x16   : > { %s284_s19 = sshll.u32 %s7064_s6, 4  ;;  %s6605_s23 = smov [#allocation9]   ;;  %s285_s19 = int_to_ptr.hbm [resolvable:$true] %s284_s19 }
  0x17   : > { %s260_s28 = sshll.u32 %s6605_s23, 4  ;;  %s6606_s8 = smov [#allocation12]   ;;  %s261_s28 = int_to_ptr.vmem [resolvable:$true] %s260_s28 }
  0x18   : > { %6262 = dma.hbm_to_vmem [thread:$0]  (!%p6692_p5), %s259_s15, 32, %s261_s28, [#allocation8]  }
  0x19   : > { %s286_s29 = sshll.u32 %s6606_s8, 4  ;;  %s6721_s11 = sadd.s32 1, %s6595_s27   ;;  %s287_s29 = int_to_ptr.vmem [resolvable:$true] %s286_s29 }
  0x1a   : > { %6268 = dma.hbm_to_vmem [thread:$0]  (!%p6692_p5), %s285_s19, 16, %s287_s29, [#allocation11]  }
  0x1b   : > { %s30_s13 = sadd.s32 1, %s6591_s26  ;;  %s27_s14 = ssub.s32 %s6595_s27, %s6721_s11 }
  0x1c   : > { %p37_p6 = scmp.ne.s32.totalorder %s6591_s26, %s6587_s25  ;;  %p28_p7 = scmp.eq.s32.totalorder %s27_s14, 0 }
  0x1d   : > { %p38_p8 = scmp.eq.s32.totalorder %s6595_s27, 0  ;;  %p43_p9 = scmp.ne.s32.totalorder %s6587_s25, %s6583_s24 }
  0x1e   : > { %p6279_p10 = scmp.lt.s32.totalorder %s6595_s27, 2  ;;  %s297_s16 = sand.u32 1, %s6591_s26  }
  0x1f   : > { %s6733_s17 = scalar_select %p28_p7, %s6591_s26, %s30_s13  }
  0x20   : > { %p39_p11 = por %p38_p8, %p37_p6  ;;  %p6737_p12 = por %p6676_p1, %p43_p9 }
  0x21   : > { %s6222_s30 = smul.u32 384, %s6595_s27  ;;  %s298_s28 = scalar_lea.sflag [#allocation3], %s297_s16 }
  0x22   : > { %s6221_s12 = smul.u32 384, %s297_s16  ;;  %p6746_p13 = pnand %p6279_p10, %p39_p11 }
  0x23   : > { %s307_s21 = scalar_lea.hbm %s7058_s0, %s6222_s30  ;;  %s6526_s30 = scalar_lea.hbm %s7058_s0, 768 }
  0x24   : > { %s308_s24 = sshll.u32 %s307_s21, 4  ;;  %s301_s19 = scalar_lea.vmem [#allocation2], %s6221_s12  ;;  %s309_s24 = int_to_ptr.hbm [resolvable:$true] %s308_s24 }
  0x25   : > { %s310_s23 = sshll.u32 %s301_s19, 4  ;;  %s6519_s8 = sshra.s32 %s309_s24, 4  ;;  %s311_s23 = int_to_ptr.vmem [resolvable:$true] %s310_s23  ;;  %s6520_s8 = int_to_ptr.hbm [resolvable:$true] %s6519_s8 }
  0x26   : > { %s6521_s29 = scalar_lea.hbm %s6520_s8, 384  ;;  %p6523_p2 = pneg %p6746_p13 }
  0x27   : > { %p6522_p0 = scmp.ne.s32.totalorder %s6520_s8, %s6521_s29  ;;  %p6527_p6 = scmp.lt.s32.totalorder %s6520_s8, %s7058_s0 }
  0x28   : > { %p6528_p7 = scmp.lt.s32.totalorder %s6526_s30, %s6521_s29 }
  0x29   : > { %p6524_p4 = pnand %p6523_p2, %p6522_p0 }
  0x2a   : > { %p6529_p8 = por %p6528_p7, %p6527_p6 }
  0x2b   : > { %p6525_p5 = pneg %p6524_p4 }
  0x2d   : > { %p6530_p9 = pnand %p6529_p8, %p6525_p5 }
  0x2f   : > { %6533 = shalt.err (!%p6530_p9)
}
  0x30   : > { %s6607_s16 = smov 3072   ;;  %s6608_s12 = smov 192  }
  0x31   : > { %6272 = dma.hbm_to_vmem [thread:$0]  (!%p6746_p13), %s309_s24, 6144, %s311_s23, %s298_s28, %s6607_s16, %s6607_s16, %s6608_s12  }
  0x32   : > { %322 = sbr.rel (%p6681_p3) target bundleno = 1140 (0x474), region = 48  ;;  %s324_s21 = sand.u32 (!%p6681_p3), 1, %s6587_s25  }
  0x33   : > { %s6223_s19 = smul.u32 (!%p6681_p3), 384, %s324_s21  ;;  %s325_s13 = scalar_lea.sflag (!%p6681_p3), [#allocation3], %s324_s21 }
  0x35   : > { %s6763_s14 = scalar_lea.vmem (!%p6681_p3), [#allocation2], %s6223_s19 }
  0x37   : > { %6566 = dma.done.wait (%p6737_p12), %s325_s13, 6144  }
  0x38   : > { %6568 = vsyncadd (%p6737_p12), %s325_s13, 4294961152 }
  0x39   : > { %6570 = dma.done.wait (%p6676_p1), [#allocation5], 49184  }
  0x3a   : > { %6572 = vsyncadd (%p6676_p1), [#allocation5], 4294918112 }
  0x3b   : > { %6574 = dma.done.wait (%p6676_p1), [#allocation8], 4128  }
  0x3c   : > { %6576 = vsyncadd (%p6676_p1), [#allocation8], 4294963168 }
  0x3d   : > { %6578 = dma.done.wait (%p6676_p1), [#allocation11], 2064  }
  0x3e   : > { %6580 = vsyncadd (%p6676_p1), [#allocation11], 4294965232  ;;  %v4112_v0 = vld [vmem:[#allocation4 + $0x70] sm:$0xf]  ;;  %v5799_v1 = vld [vmem:[#allocation4 + $0x74] sm:$0xf0] }
  0x3f   : > { %v4176_v2 = vld [vmem:[#allocation4 + $0xf0] sm:$0xf]  ;;  %v4113_v3 = vor.u32 %v5799_v1, %v4112_v0  ;;  %v5815_v4 = vld [vmem:[#allocation4 + $0xf4] sm:$0xf0]  ;;  %v4104_v11 = vld [vmem:[#allocation4 + $0x60] sm:$0xf] }
  0x40   : > { %v4240_v5 = vld [vmem:[#allocation4 + $0x170] sm:$0xf]  ;;  %v5831_v6 = vld [vmem:[#allocation4 + $0x174] sm:$0xf0]  ;;  %v4177_v7 = vor.u32 %v5815_v4, %v4176_v2  ;;  %v5797_v13 = vld [vmem:[#allocation4 + $0x64] sm:$0xf0] }
  0x41   : > { %v4241_v8 = vor.u32 %v5831_v6, %v4240_v5  ;;  %v4304_v9 = vld [vmem:[#allocation4 + $0x1f0] sm:$0xf]  ;;  %v5847_v10 = vld [vmem:[#allocation4 + $0x1f4] sm:$0xf0]  ;;  %2779 = vmatpush.bf16.msra.mxu0 %v4113_v3  ;;  %v4168_v14 = vld [vmem:[#allocation4 + $0xe0] sm:$0xf]  ;;  %v4105_v16 = vor.u32 %v5797_v13, %v4104_v11 }
  0x42   : > { %v4305_v12 = vor.u32 %v5847_v10, %v4304_v9  ;;  %v5813_v15 = vld [vmem:[#allocation4 + $0xe4] sm:$0xf0]  ;;  %2793 = vmatpush.bf16.msra.mxu1 %v4177_v7  ;;  %v4232_v18 = vld [vmem:[#allocation4 + $0x160] sm:$0xf]  ;;  %v4096_v23 = vld [vmem:[#allocation4 + $0x50] sm:$0xf] }
  0x43   : > { %2807 = vmatpush.bf16.msra.mxu2 %v4241_v8  ;;  %v4169_v17 = vor.u32 %v5813_v15, %v4168_v14  ;;  %v5829_v19 = vld [vmem:[#allocation4 + $0x164] sm:$0xf0]  ;;  %v4296_v20 = vld [vmem:[#allocation4 + $0x1e0] sm:$0xf]  ;;  %v5795_v24 = vld [vmem:[#allocation4 + $0x54] sm:$0xf0] }
  0x44   : > { %2821 = vmatpush.bf16.msra.mxu3 %v4305_v12  ;;  %v4233_v21 = vor.u32 %v5829_v19, %v4232_v18  ;;  %v5845_v22 = vld [vmem:[#allocation4 + $0x1e4] sm:$0xf0]  ;;  %v4160_v26 = vld [vmem:[#allocation4 + $0xd0] sm:$0xf]  ;;  %v5811_v27 = vld [vmem:[#allocation4 + $0xd4] sm:$0xf0]  ;;  %v4097_v29 = vor.u32 %v5795_v24, %v4096_v23 }
  0x45   : > { %v4297_v25 = vor.u32 %v5845_v22, %v4296_v20  ;;  %v4224_v28 = vld [vmem:[#allocation4 + $0x150] sm:$0xf]  ;;  %2780 = vmatpush.bf16.msra.mxu0 %v4105_v16  ;;  %v5827_v30 = vld [vmem:[#allocation4 + $0x154] sm:$0xf0]  ;;  %v4161_v33 = vor.u32 %v5811_v27, %v4160_v26  ;;  %v4088_v35 = vld [vmem:[#allocation4 + $0x40] sm:$0xf] }
  0x46   : > { %v4288_v31 = vld [vmem:[#allocation4 + $0x1d0] sm:$0xf]  ;;  %v5843_v32 = vld [vmem:[#allocation4 + $0x1d4] sm:$0xf0]  ;;  %2794 = vmatpush.bf16.msra.mxu1 %v4169_v17  ;;  %v4225_v34 = vor.u32 %v5827_v30, %v4224_v28  ;;  %v5793_v36 = vld [vmem:[#allocation4 + $0x44] sm:$0xf0] }
  0x47   : > { %2808 = vmatpush.bf16.msra.mxu2 %v4233_v21  ;;  %v4152_v37 = vld [vmem:[#allocation4 + $0xc0] sm:$0xf]  ;;  %v4289_v38 = vor.u32 %v5843_v32, %v4288_v31  ;;  %v5809_v39 = vld [vmem:[#allocation4 + $0xc4] sm:$0xf0]  ;;  %v4089_v44 = vor.u32 %v5793_v36, %v4088_v35  ;;  %v4080_v47 = vld [vmem:[#allocation4 + $0x30] sm:$0xf] }
  0x48   : > { %2822 = vmatpush.bf16.msra.mxu3 %v4297_v25  ;;  %v4216_v40 = vld [vmem:[#allocation4 + $0x140] sm:$0xf]  ;;  %v5825_v41 = vld [vmem:[#allocation4 + $0x144] sm:$0xf0]  ;;  %v4153_v45 = vor.u32 %v5809_v39, %v4152_v37  ;;  %v5791_v48 = vld [vmem:[#allocation4 + $0x34] sm:$0xf0] }
  0x49   : > { %v4280_v42 = vld [vmem:[#allocation4 + $0x1c0] sm:$0xf]  ;;  %v5841_v43 = vld [vmem:[#allocation4 + $0x1c4] sm:$0xf0]  ;;  %2781 = vmatpush.bf16.msra.mxu0 %v4097_v29  ;;  %v4217_v46 = vor.u32 %v5825_v41, %v4216_v40  ;;  %v4144_v49 = vld [vmem:[#allocation4 + $0xb0] sm:$0xf]  ;;  %v4081_v56 = vor.u32 %v5791_v48, %v4080_v47 }
  0x4a   : > { %2795 = vmatpush.bf16.msra.mxu1 %v4161_v33  ;;  %v4281_v50 = vor.u32 %v5841_v43, %v4280_v42  ;;  %v5807_v51 = vld [vmem:[#allocation4 + $0xb4] sm:$0xf0]  ;;  %v4208_v52 = vld [vmem:[#allocation4 + $0x130] sm:$0xf]  ;;  %v4072_v59 = vld [vmem:[#allocation4 + $0x20] sm:$0xf] }
  0x4b   : > { %2809 = vmatpush.bf16.msra.mxu2 %v4225_v34  ;;  %v5823_v53 = vld [vmem:[#allocation4 + $0x134] sm:$0xf0]  ;;  %v4272_v54 = vld [vmem:[#allocation4 + $0x1b0] sm:$0xf]  ;;  %v4145_v57 = vor.u32 %v5807_v51, %v4144_v49  ;;  %v5789_v60 = vld [vmem:[#allocation4 + $0x24] sm:$0xf0] }
  0x4c   : > { %2823 = vmatpush.bf16.msra.mxu3 %v4289_v38  ;;  %v5839_v55 = vld [vmem:[#allocation4 + $0x1b4] sm:$0xf0]  ;;  %v4209_v58 = vor.u32 %v5823_v53, %v4208_v52  ;;  %v4136_v61 = vld [vmem:[#allocation4 + $0xa0] sm:$0xf]  ;;  %v5805_v63 = vld [vmem:[#allocation4 + $0xa4] sm:$0xf0]  ;;  %v4073_v4 = vor.u32 %v5789_v60, %v4072_v59 }
  0x4d   : > { %2782 = vmatpush.bf16.msra.mxu0 %v4089_v44  ;;  %v4273_v62 = vor.u32 %v5839_v55, %v4272_v54  ;;  %v4200_v0 = vld [vmem:[#allocation4 + $0x120] sm:$0xf]  ;;  %v5821_v1 = vld [vmem:[#allocation4 + $0x124] sm:$0xf0]  ;;  %v4137_v5 = vor.u32 %v5805_v63, %v4136_v61  ;;  %v4064_v7 = vld [vmem:[#allocation4 + $0x10] sm:$0xf] }
  0x4e   : > { %2796 = vmatpush.bf16.msra.mxu1 %v4153_v45  ;;  %v4264_v2 = vld [vmem:[#allocation4 + $0x1a0] sm:$0xf]  ;;  %v5837_v3 = vld [vmem:[#allocation4 + $0x1a4] sm:$0xf0]  ;;  %v4201_v6 = vor.u32 %v5821_v1, %v4200_v0  ;;  %v5787_v8 = vld [vmem:[#allocation4 + $0x14] sm:$0xf0] }
  0x4f   : > { %2810 = vmatpush.bf16.msra.mxu2 %v4217_v46  ;;  %v4128_v9 = vld [vmem:[#allocation4 + $0x90] sm:$0xf]  ;;  %v4265_v10 = vor.u32 %v5837_v3, %v4264_v2  ;;  %v5803_v11 = vld [vmem:[#allocation4 + $0x94] sm:$0xf0]  ;;  %v4065_v16 = vor.u32 %v5787_v8, %v4064_v7  ;;  %v4056_v17 = vld [vmem:[#allocation4] sm:$0xf] }
  0x50   : > { %2824 = vmatpush.bf16.msra.mxu3 %v4281_v50  ;;  %v4192_v12 = vld [vmem:[#allocation4 + $0x110] sm:$0xf]  ;;  %v5819_v13 = vld [vmem:[#allocation4 + $0x114] sm:$0xf0]  ;;  %v5785_v18 = vld [vmem:[#allocation4 + $0x4] sm:$0xf0]  ;;  %v4129_v19 = vor.u32 %v5803_v11, %v4128_v9 }
  0x51   : > { %2783 = vmatpush.bf16.msra.mxu0 %v4081_v56  ;;  %v4256_v14 = vld [vmem:[#allocation4 + $0x190] sm:$0xf]  ;;  %v5835_v15 = vld [vmem:[#allocation4 + $0x194] sm:$0xf0]  ;;  %v4193_v20 = vor.u32 %v5819_v13, %v4192_v12  ;;  %v4120_v21 = vld [vmem:[#allocation4 + $0x80] sm:$0xf]  ;;  %v4057_v31 = vor.u32 %v5785_v18, %v4056_v17 }
  0x52   : > { %2797 = vmatpush.bf16.msra.mxu1 %v4145_v57  ;;  %v5801_v22 = vld [vmem:[#allocation4 + $0x84] sm:$0xf0]  ;;  %v4184_v23 = vld [vmem:[#allocation4 + $0x100] sm:$0xf]  ;;  %v4257_v24 = vor.u32 %v5835_v15, %v4256_v14  ;;  %v4368_v28 = vld [vmem:[#allocation4 + $0x270] sm:$0xf] }
  0x53   : > { %2811 = vmatpush.bf16.msra.mxu2 %v4209_v58  ;;  %v5817_v25 = vld [vmem:[#allocation4 + $0x104] sm:$0xf0]  ;;  %v4248_v26 = vld [vmem:[#allocation4 + $0x180] sm:$0xf]  ;;  %v5863_v29 = vld [vmem:[#allocation4 + $0x274] sm:$0xf0]  ;;  %v4121_v35 = vor.u32 %v5801_v22, %v4120_v21 }
  0x54   : > { %2825 = vmatpush.bf16.msra.mxu3 %v4273_v62  ;;  %v5833_v27 = vld [vmem:[#allocation4 + $0x184] sm:$0xf0]  ;;  %v4432_v30 = vld [vmem:[#allocation4 + $0x2f0] sm:$0xf]  ;;  %v5879_v32 = vld [vmem:[#allocation4 + $0x2f4] sm:$0xf0]  ;;  %v4185_v36 = vor.u32 %v5817_v25, %v4184_v23  ;;  %v4369_v40 = vor.u32 %v5863_v29, %v4368_v28 }
  0x55   : > { %2784 = vmatpush.bf16.msra.mxu0 %v4073_v4  ;;  %v4496_v33 = vld [vmem:[#allocation4 + $0x370] sm:$0xf]  ;;  %v5895_v34 = vld [vmem:[#allocation4 + $0x374] sm:$0xf0]  ;;  %v4249_v39 = vor.u32 %v5833_v27, %v4248_v26  ;;  %v4360_v41 = vld [vmem:[#allocation4 + $0x260] sm:$0xf]  ;;  %v4433_v43 = vor.u32 %v5879_v32, %v4432_v30 }
  0x56   : > { %2798 = vmatpush.bf16.msra.mxu1 %v4137_v5  ;;  %v4560_v37 = vld [vmem:[#allocation4 + $0x3f0] sm:$0xf]  ;;  %v5911_v38 = vld [vmem:[#allocation4 + $0x3f4] sm:$0xf0]  ;;  %v5861_v42 = vld [vmem:[#allocation4 + $0x264] sm:$0xf0]  ;;  %v4497_v44 = vor.u32 %v5895_v34, %v4496_v33 }
  0x57   : > { %2812 = vmatpush.bf16.msra.mxu2 %v4201_v6  ;;  %v4424_v45 = vld [vmem:[#allocation4 + $0x2e0] sm:$0xf]  ;;  %v5877_v46 = vld [vmem:[#allocation4 + $0x2e4] sm:$0xf0]  ;;  %v4561_v48 = vor.u32 %v5911_v38, %v4560_v37  ;;  %v399_v54 = vld [vmem:[%s6763_s14 + $0x10] sm:$0xff]  ;;  %v4361_v55 = vor.u32 %v5861_v42, %v4360_v41  ;;  %s7072_s9 = sadd.s32 4294967295, %s6595_s27  }
  0x58   : > { %2826 = vmatpush.bf16.msra.mxu3 %v4265_v10  ;;  %v4488_v47 = vld [vmem:[#allocation4 + $0x360] sm:$0xf]  ;;  %v5893_v49 = vld [vmem:[#allocation4 + $0x364] sm:$0xf0]  ;;  %v4352_v56 = vld [vmem:[#allocation4 + $0x250] sm:$0xf]  ;;  %v4425_v60 = vor.u32 %v5877_v46, %v4424_v45 }
  0x59   : > { %2785 = vmatpush.bf16.msra.mxu0 %v4065_v16  ;;  %v4552_v50 = vld [vmem:[#allocation4 + $0x3e0] sm:$0xf]  ;;  %v5909_v51 = vld [vmem:[#allocation4 + $0x3e4] sm:$0xf0]  ;;  %v5859_v57 = vld [vmem:[#allocation4 + $0x254] sm:$0xf0]  ;;  %v4489_v61 = vor.u32 %v5893_v49, %v4488_v47 }
  0x5a   : > { %2799 = vmatpush.bf16.msra.mxu1 %v4129_v19  ;;  %v397_v52 = vld [vmem:[%s6763_s14] sm:$0xff]  ;;  %v423_v59 = vld [vmem:[%s6763_s14 + $0xd0] sm:$0xff]  ;;  %v5875_v63 = vld [vmem:[#allocation4 + $0x2d4] sm:$0xf0]  ;;  %v4553_v2 = vor.u32 %v5909_v51, %v4552_v50  ;;  %v4353_v9 = vor.u32 %v5859_v57, %v4352_v56  ;;  %s4052_s10 = sshll.u32 %s7072_s9, 1 }
  0x5b   : > { %2813 = vmatpush.bf16.msra.mxu2 %v4193_v20  ;;  %v421_v53 = vld [vmem:[%s6763_s14 + $0xc0] sm:$0xff]  ;;  %v4416_v62 = vld [vmem:[#allocation4 + $0x2d0] sm:$0xf]  ;;  %v6787_v1 = vpack.c.bf16 %v423_v59, %v399_v54  ;;  %v5891_v3 = vld [vmem:[#allocation4 + $0x354] sm:$0xf0]  ;;  %p392_p1 = scmp.lt.s32.totalorder %s4052_s10, 3 }
  0x5c   : > { %2827 = vmatpush.bf16.msra.mxu3 %v4257_v24  ;;  %v6784_v58 = vpack.c.bf16 %v421_v53, %v397_v52  ;;  %v4480_v0 = vld [vmem:[#allocation4 + $0x350] sm:$0xf]  ;;  %v5907_v5 = vld [vmem:[#allocation4 + $0x3d4] sm:$0xf0]  ;;  %v398_v6 = vld [vmem:[%s6763_s14 + $0x8] sm:$0xff]  ;;  %v4417_v12 = vor.u32 %v5875_v63, %v4416_v62 }
  0x5d   : > { %2786 = vmatpush.bf16.msra.mxu0 %v4057_v31  ;;  %v4544_v4 = vld [vmem:[#allocation4 + $0x3d0] sm:$0xf]  ;;  %v422_v7 = vld [vmem:[%s6763_s14 + $0xc8] sm:$0xff]  ;;  %v400_v8 = vld [vmem:[%s6763_s14 + $0x18] sm:$0xff]  ;;  %v4481_v13 = vor.u32 %v5891_v3, %v4480_v0  ;;  %s7078_s10 = smov (!%p392_p1, %s4052_s10), 3 }
  0x5e   : > { %2800 = vmatpush.bf16.msra.mxu1 %v4121_v35  ;;  %v6794_v10 = vpack.c.bf16 %v422_v7, %v398_v6  ;;  %v424_v11 = vld [vmem:[%s6763_s14 + $0xd8] sm:$0xff]  ;;  %v4344_v14 = vld [vmem:[#allocation4 + $0x240] sm:$0xf]  ;;  %v5857_v15 = vld [vmem:[#allocation4 + $0x244] sm:$0xf0]  ;;  %v4545_v18 = vor.u32 %v5907_v5, %v4544_v4  ;;  %s4053_s18 = sshll.u32 %s7078_s10, 2 }
  0x5f   : > { %2814 = vmatpush.bf16.msra.mxu2 %v4185_v36  ;;  %v4408_v16 = vld [vmem:[#allocation4 + $0x2c0] sm:$0xf]  ;;  %v6797_v17 = vpack.c.bf16 %v424_v11, %v400_v8  ;;  %v5873_v19 = vld [vmem:[#allocation4 + $0x2c4] sm:$0xf0]  ;;  %v4345_v24 = vor.u32 %v5857_v15, %v4344_v14  ;;  %v4336_v27 = vld [vmem:[#allocation4 + $0x230] sm:$0xf]  ;;  %s395_s23 = scalar_lea.vmem %s7065_s7, %s4053_s18 }
  0x60   : > { %2828 = vmatpush.bf16.msra.mxu3 %v4249_v39  ;;  %2787 = vmatmul.bf16.vlgmr.msra.gmra.mxu0 %v6784_v58  ;;  %v4472_v20 = vld [vmem:[#allocation4 + $0x340] sm:$0xf]  ;;  %v5889_v21 = vld [vmem:[#allocation4 + $0x344] sm:$0xf0]  ;;  %v4409_v25 = vor.u32 %v5873_v19, %v4408_v16  ;;  %v5855_v28 = vld [vmem:[#allocation4 + $0x234] sm:$0xf0] }
  0x61   : > { %2835 = vmatpush.bf16.msrb.mxu0 %v4369_v40  ;;  %2801 = vmatmul.bf16.vlgmr.msra.gmra.mxu1 %v6794_v10  ;;  %v4536_v22 = vld [vmem:[#allocation4 + $0x3c0] sm:$0xf]  ;;  %v5905_v23 = vld [vmem:[#allocation4 + $0x3c4] sm:$0xf0]  ;;  %v4473_v26 = vor.u32 %v5889_v21, %v4472_v20  ;;  %v4400_v29 = vld [vmem:[#allocation4 + $0x2b0] sm:$0xf]  ;;  %v4337_v36 = vor.u32 %v5855_v28, %v4336_v27 }
  0x62   : > { %2849 = vmatpush.bf16.msrb.mxu1 %v4433_v43  ;;  %2815 = vmatmul.bf16.vlgmr.msra.gmra.mxu2 %v6787_v1  ;;  %v4537_v30 = vor.u32 %v5905_v23, %v4536_v22  ;;  %v5871_v31 = vld [vmem:[#allocation4 + $0x2b4] sm:$0xf0]  ;;  %v4464_v32 = vld [vmem:[#allocation4 + $0x330] sm:$0xf]  ;;  %v4328_v39 = vld [vmem:[#allocation4 + $0x220] sm:$0xf] }
  0x63   : > { %2863 = vmatpush.bf16.msrb.mxu2 %v4497_v44  ;;  %2829 = vmatmul.bf16.vlgmr.msra.gmra.mxu3 %v6797_v17  ;;  %v5887_v33 = vld [vmem:[#allocation4 + $0x334] sm:$0xf0]  ;;  %v4528_v34 = vld [vmem:[#allocation4 + $0x3b0] sm:$0xf]  ;;  %v4401_v37 = vor.u32 %v5871_v31, %v4400_v29  ;;  %v5853_v40 = vld [vmem:[#allocation4 + $0x224] sm:$0xf0] }
  0x64   : > { %2877 = vmatpush.bf16.msrb.mxu3 %v4561_v48  ;;  %v5903_v35 = vld [vmem:[#allocation4 + $0x3b4] sm:$0xf0]  ;;  %v4465_v38 = vor.u32 %v5887_v33, %v4464_v32  ;;  %v4392_v41 = vld [vmem:[#allocation4 + $0x2a0] sm:$0xf]  ;;  %v5869_v43 = vld [vmem:[#allocation4 + $0x2a4] sm:$0xf0]  ;;  %v4329_v48 = vor.u32 %v5853_v40, %v4328_v39 }
  0x65   : > { %2836 = vmatpush.bf16.msrb.mxu0 %v4361_v55  ;;  %v4529_v42 = vor.u32 %v5903_v35, %v4528_v34  ;;  %v4456_v44 = vld [vmem:[#allocation4 + $0x320] sm:$0xf]  ;;  %v5885_v45 = vld [vmem:[#allocation4 + $0x324] sm:$0xf0]  ;;  %v4320_v49 = vld [vmem:[#allocation4 + $0x210] sm:$0xf]  ;;  %v4393_v50 = vor.u32 %v5869_v43, %v4392_v41 }
  0x66   : > { %2850 = vmatpush.bf16.msrb.mxu1 %v4425_v60  ;;  %v4520_v46 = vld [vmem:[#allocation4 + $0x3a0] sm:$0xf]  ;;  %v5901_v47 = vld [vmem:[#allocation4 + $0x3a4] sm:$0xf0]  ;;  %v4457_v51 = vor.u32 %v5885_v45, %v4456_v44  ;;  %v5851_v52 = vld [vmem:[#allocation4 + $0x214] sm:$0xf0] }
  0x67   : > { %2864 = vmatpush.bf16.msrb.mxu2 %v4489_v61  ;;  %v4384_v53 = vld [vmem:[#allocation4 + $0x290] sm:$0xf]  ;;  %v5867_v54 = vld [vmem:[#allocation4 + $0x294] sm:$0xf0]  ;;  %v4521_v55 = vor.u32 %v5901_v47, %v4520_v46  ;;  %v4312_v61 = vld [vmem:[#allocation4 + $0x200] sm:$0xf]  ;;  %v4321_v63 = vor.u32 %v5851_v52, %v4320_v49 }
  0x68   : > { %2878 = vmatpush.bf16.msrb.mxu3 %v4553_v2  ;;  %v4448_v56 = vld [vmem:[#allocation4 + $0x310] sm:$0xf]  ;;  %v5883_v57 = vld [vmem:[#allocation4 + $0x314] sm:$0xf0]  ;;  %v5849_v62 = vld [vmem:[#allocation4 + $0x204] sm:$0xf0]  ;;  %v4385_v5 = vor.u32 %v5867_v54, %v4384_v53 }
  0x69   : > { %2837 = vmatpush.bf16.msrb.mxu0 %v4353_v9  ;;  %v4512_v59 = vld [vmem:[#allocation4 + $0x390] sm:$0xf]  ;;  %v5899_v60 = vld [vmem:[#allocation4 + $0x394] sm:$0xf0]  ;;  %v4376_v0 = vld [vmem:[#allocation4 + $0x280] sm:$0xf]  ;;  %v4449_v6 = vor.u32 %v5883_v57, %v4448_v56  ;;  %v4313_v19 = vor.u32 %v5849_v62, %v4312_v61 }
  0x6a   : > { %2851 = vmatpush.bf16.msrb.mxu1 %v4417_v12  ;;  %v5865_v2 = vld [vmem:[#allocation4 + $0x284] sm:$0xf0]  ;;  %v4440_v3 = vld [vmem:[#allocation4 + $0x300] sm:$0xf]  ;;  %v4624_v9 = vld [vmem:[#allocation4 + $0x470] sm:$0xf]  ;;  %v4513_v11 = vor.u32 %v5899_v60, %v4512_v59 }
  0x6b   : > { %2865 = vmatpush.bf16.msrb.mxu2 %v4481_v13  ;;  %v5881_v4 = vld [vmem:[#allocation4 + $0x304] sm:$0xf0]  ;;  %v4504_v7 = vld [vmem:[#allocation4 + $0x380] sm:$0xf]  ;;  %v5927_v12 = vld [vmem:[#allocation4 + $0x474] sm:$0xf0]  ;;  %v4377_v23 = vor.u32 %v5865_v2, %v4376_v0 }
  0x6c   : > { %2879 = vmatpush.bf16.msrb.mxu3 %v4545_v18  ;;  %v5897_v8 = vld [vmem:[#allocation4 + $0x384] sm:$0xf0]  ;;  %v4688_v13 = vld [vmem:[#allocation4 + $0x4f0] sm:$0xf]  ;;  %v5943_v14 = vld [vmem:[#allocation4 + $0x4f4] sm:$0xf0]  ;;  %v4625_v29 = vor.u32 %v5927_v12, %v4624_v9 }
  0x6d   : > { %2838 = vmatpush.bf16.msrb.mxu0 %v4345_v24  ;;  %v4752_v15 = vld [vmem:[#allocation4 + $0x570] sm:$0xf]  ;;  %v5959_v16 = vld [vmem:[#allocation4 + $0x574] sm:$0xf0]  ;;  %v401_v21 = vld [vmem:[%s6763_s14 + $0x20] sm:$0xff]  ;;  %v4441_v24 = vor.u32 %v5881_v4, %v4440_v3  ;;  %v4505_v28 = vor.u32 %v5897_v8, %v4504_v7  ;;  %v4689_v33 = vor.u32 %v5943_v14, %v4688_v13 }
  0x6e   : > { %2852 = vmatpush.bf16.msrb.mxu1 %v4409_v25  ;;  %v4816_v18 = vld [vmem:[#allocation4 + $0x5f0] sm:$0xf]  ;;  %v5975_v20 = vld [vmem:[#allocation4 + $0x5f4] sm:$0xf0]  ;;  %v425_v22 = vld [vmem:[%s6763_s14 + $0xe0] sm:$0xff]  ;;  %v4753_v34 = vor.u32 %v5959_v16, %v4752_v15 }
  0x6f   : > { %2866 = vmatpush.bf16.msrb.mxu2 %v4473_v26  ;;  %v403_v25 = vld [vmem:[%s6763_s14 + $0x30] sm:$0xff]  ;;  %v402_v27 = vld [vmem:[%s6763_s14 + $0x28] sm:$0xff]  ;;  %v404_v31 = vld [vmem:[%s6763_s14 + $0x38] sm:$0xff]  ;;  %v6809_v39 = vpack.c.bf16 %v425_v22, %v401_v21 }
  0x70   : > { %2880 = vmatpush.bf16.msrb.mxu3 %v4537_v30  ;;  %v427_v26 = vld [vmem:[%s6763_s14 + $0xf0] sm:$0xff]  ;;  %v426_v30 = vld [vmem:[%s6763_s14 + $0xe8] sm:$0xff]  ;;  %v428_v32 = vld [vmem:[%s6763_s14 + $0xf8] sm:$0xff] }
  0x71   : > { %2839 = vmatpush.bf16.msrb.mxu0 %v4337_v36  ;;  %v4616_v35 = vld [vmem:[#allocation4 + $0x460] sm:$0xf]  ;;  %v5925_v36 = vld [vmem:[#allocation4 + $0x464] sm:$0xf0]  ;;  %v6811_v43 = vpack.c.bf16 %v427_v26, %v403_v25  ;;  %v6813_v44 = vpack.c.bf16 %v426_v30, %v402_v27  ;;  %v6815_v47 = vpack.c.bf16 %v428_v32, %v404_v31  ;;  %v5923_v52 = vld [vmem:[#allocation4 + $0x454] sm:$0xf0] }
  0x72   : > { %2853 = vmatpush.bf16.msrb.mxu1 %v4401_v37  ;;  %v4680_v37 = vld [vmem:[#allocation4 + $0x4e0] sm:$0xf]  ;;  %v5941_v40 = vld [vmem:[#allocation4 + $0x4e4] sm:$0xf0]  ;;  %v4672_v53 = vld [vmem:[#allocation4 + $0x4d0] sm:$0xf] }
  0x73   : > { %2867 = vmatpush.bf16.msrb.mxu2 %v4465_v38  ;;  %v4817_v38 = vor.u32 %v5975_v20, %v4816_v18  ;;  %v4744_v41 = vld [vmem:[#allocation4 + $0x560] sm:$0xf]  ;;  %v5973_v46 = vld [vmem:[#allocation4 + $0x5e4] sm:$0xf0]  ;;  %v4681_v49 = vor.u32 %v5941_v40, %v4680_v37  ;;  %v4736_v56 = vld [vmem:[#allocation4 + $0x550] sm:$0xf] }
  0x74   : > { %2881 = vmatpush.bf16.msrb.mxu3 %v4529_v42  ;;  %v5957_v42 = vld [vmem:[#allocation4 + $0x564] sm:$0xf0]  ;;  %v4808_v45 = vld [vmem:[#allocation4 + $0x5e0] sm:$0xf]  ;;  %v5955_v57 = vld [vmem:[#allocation4 + $0x554] sm:$0xf0] }
  0x75   : > { %2840 = vmatpush.bf16.msrb.mxu0 %v4329_v48  ;;  %v4617_v48 = vor.u32 %v5925_v36, %v4616_v35  ;;  %v4809_v54 = vor.u32 %v5973_v46, %v4808_v45  ;;  %v4800_v59 = vld [vmem:[#allocation4 + $0x5d0] sm:$0xf]  ;;  %v5971_v60 = vld [vmem:[#allocation4 + $0x5d4] sm:$0xf0]  ;;  %v4600_v0 = vld [vmem:[#allocation4 + $0x440] sm:$0xf] }
  0x76   : > { %2854 = vmatpush.bf16.msrb.mxu1 %v4393_v50  ;;  %v4745_v50 = vor.u32 %v5957_v42, %v4744_v41  ;;  %v5921_v2 = vld [vmem:[#allocation4 + $0x444] sm:$0xf0]  ;;  %v4664_v3 = vld [vmem:[#allocation4 + $0x4c0] sm:$0xf]  ;;  %v4801_v4 = vor.u32 %v5971_v60, %v4800_v59  ;;  %v4592_v14 = vld [vmem:[#allocation4 + $0x430] sm:$0xf] }
  0x77   : > { %2868 = vmatpush.bf16.msrb.mxu2 %v4457_v51  ;;  %v4608_v51 = vld [vmem:[#allocation4 + $0x450] sm:$0xf]  ;;  %v5953_v7 = vld [vmem:[#allocation4 + $0x544] sm:$0xf0]  ;;  %v4792_v8 = vld [vmem:[#allocation4 + $0x5c0] sm:$0xf] }
  0x78   : > { %2882 = vmatpush.bf16.msrb.mxu3 %v4521_v55  ;;  %v5939_v55 = vld [vmem:[#allocation4 + $0x4d4] sm:$0xf0]  ;;  %v4609_v61 = vor.u32 %v5923_v52, %v4608_v51  ;;  %v5969_v9 = vld [vmem:[#allocation4 + $0x5c4] sm:$0xf0]  ;;  %v4656_v16 = vld [vmem:[#allocation4 + $0x4b0] sm:$0xf] }
  0x79   : > { %2841 = vmatpush.bf16.msrb.mxu0 %v4321_v63  ;;  %v4673_v62 = vor.u32 %v5939_v55, %v4672_v53  ;;  %v4737_v63 = vor.u32 %v5955_v57, %v4736_v56  ;;  %v5919_v15 = vld [vmem:[#allocation4 + $0x434] sm:$0xf0]  ;;  %v4793_v18 = vor.u32 %v5969_v9, %v4792_v8  ;;  %v4720_v20 = vld [vmem:[#allocation4 + $0x530] sm:$0xf]  ;;  %v4584_v27 = vld [vmem:[#allocation4 + $0x420] sm:$0xf] }
  0x7a   : > { %2855 = vmatpush.bf16.msrb.mxu1 %v4385_v5  ;;  %v5937_v5 = vld [vmem:[#allocation4 + $0x4c4] sm:$0xf0]  ;;  %v5951_v21 = vld [vmem:[#allocation4 + $0x534] sm:$0xf0]  ;;  %v4784_v22 = vld [vmem:[#allocation4 + $0x5b0] sm:$0xf] }
  0x7b   : > { %2869 = vmatpush.bf16.msrb.mxu2 %v4449_v6  ;;  %v4728_v6 = vld [vmem:[#allocation4 + $0x540] sm:$0xf]  ;;  %v4665_v12 = vor.u32 %v5937_v5, %v4664_v3  ;;  %v4721_v26 = vor.u32 %v5951_v21, %v4720_v20  ;;  %v5933_v31 = vld [vmem:[#allocation4 + $0x4a4] sm:$0xf0]  ;;  %v4576_v37 = vld [vmem:[#allocation4 + $0x410] sm:$0xf] }
  0x7c   : > { %2883 = vmatpush.bf16.msrb.mxu3 %v4513_v11  ;;  %v4601_v11 = vor.u32 %v5921_v2, %v4600_v0  ;;  %v4729_v13 = vor.u32 %v5953_v7, %v4728_v6  ;;  %v4712_v32 = vld [vmem:[#allocation4 + $0x520] sm:$0xf]  ;;  %v5965_v35 = vld [vmem:[#allocation4 + $0x5a4] sm:$0xf0]  ;;  %v5915_v41 = vld [vmem:[#allocation4 + $0x414] sm:$0xf0] }
  0x7d   : > { %2842 = vmatpush.bf16.msrb.mxu0 %v4313_v19  ;;  %v5935_v19 = vld [vmem:[#allocation4 + $0x4b4] sm:$0xf0]  ;;  %v4640_v42 = vld [vmem:[#allocation4 + $0x490] sm:$0xf]  ;;  %v4568_v52 = vld [vmem:[#allocation4 + $0x400] sm:$0xf] }
  0x7e   : > { %2856 = vmatpush.bf16.msrb.mxu1 %v4377_v23  ;;  %v5967_v23 = vld [vmem:[#allocation4 + $0x5b4] sm:$0xf0]  ;;  %v4657_v25 = vor.u32 %v5935_v19, %v4656_v16  ;;  %v5913_v53 = vld [vmem:[#allocation4 + $0x404] sm:$0xf0]  ;;  %v4632_v55 = vld [vmem:[#allocation4 + $0x480] sm:$0xf] }
  0x7f   : > { %2870 = vmatpush.bf16.msrb.mxu2 %v4441_v24  ;;  %v4593_v24 = vor.u32 %v5919_v15, %v4592_v14  ;;  %v4785_v30 = vor.u32 %v5967_v23, %v4784_v22  ;;  %v5931_v45 = vld [vmem:[#allocation4 + $0x494] sm:$0xf0]  ;;  %v5929_v56 = vld [vmem:[#allocation4 + $0x484] sm:$0xf0]  ;;  %v4696_v57 = vld [vmem:[#allocation4 + $0x500] sm:$0xf]  ;;  %v4569_v9 = vor.u32 %v5913_v53, %v4568_v52 }
  0x80   : > { %2884 = vmatpush.bf16.msrb.mxu3 %v4505_v28  ;;  %2843 = vmatmul.bf16.vlgmr.msrb.gmra.mxu0 %v6809_v39  ;;  %v5917_v28 = vld [vmem:[#allocation4 + $0x424] sm:$0xf0]  ;;  %v5963_v51 = vld [vmem:[#allocation4 + $0x594] sm:$0xf0]  ;;  %v4641_v60 = vor.u32 %v5931_v45, %v4640_v42  ;;  %v4880_v0 = vld [vmem:[#allocation4 + $0x670] sm:$0xf]  ;;  %v4633_v14 = vor.u32 %v5929_v56, %v4632_v55 }
  0x81   : > { %2891 = vmatpush.bf16.msra.mxu0 %v4625_v29  ;;  %2857 = vmatmul.bf16.vlgmr.msrb.gmra.mxu1 %v6813_v44  ;;  %v4648_v29 = vld [vmem:[#allocation4 + $0x4a0] sm:$0xf]  ;;  %v4585_v36 = vor.u32 %v5917_v28, %v4584_v27  ;;  %v5945_v59 = vld [vmem:[#allocation4 + $0x504] sm:$0xf0]  ;;  %v5991_v3 = vld [vmem:[#allocation4 + $0x674] sm:$0xf0] }
  0x82   : > { %2905 = vmatpush.bf16.msra.mxu1 %v4689_v33  ;;  %2871 = vmatmul.bf16.vlgmr.msrb.gmra.mxu2 %v6811_v43  ;;  %v5949_v33 = vld [vmem:[#allocation4 + $0x524] sm:$0xf0]  ;;  %v6007_v5 = vld [vmem:[#allocation4 + $0x6f4] sm:$0xf0]  ;;  %v5008_v6 = vld [vmem:[#allocation4 + $0x770] sm:$0xf]  ;;  %v4697_v15 = vor.u32 %v5945_v59, %v4696_v57  ;;  %v4881_v21 = vor.u32 %v5991_v3, %v4880_v0 }
  0x83   : > { %2919 = vmatpush.bf16.msra.mxu2 %v4753_v34  ;;  %2885 = vmatmul.bf16.vlgmr.msrb.gmra.mxu3 %v6815_v47  ;;  %v4776_v34 = vld [vmem:[#allocation4 + $0x5a0] sm:$0xf]  ;;  %v4713_v40 = vor.u32 %v5949_v33, %v4712_v32  ;;  %v6023_v7 = vld [vmem:[#allocation4 + $0x774] sm:$0xf0]  ;;  %v5072_v8 = vld [vmem:[#allocation4 + $0x7f0] sm:$0xf] }
  0x84   : > { %2933 = vmatpush.bf16.msra.mxu3 %v4817_v38  ;;  %v4649_v38 = vor.u32 %v5933_v31, %v4648_v29  ;;  %v4777_v46 = vor.u32 %v5965_v35, %v4776_v34  ;;  %v407_v16 = vld [vmem:[%s6763_s14 + $0x50] sm:$0xff]  ;;  %v406_v19 = vld [vmem:[%s6763_s14 + $0x48] sm:$0xff]  ;;  %v408_v23 = vld [vmem:[%s6763_s14 + $0x58] sm:$0xff] }
  0x85   : > { %2892 = vmatpush.bf16.msra.mxu0 %v4617_v48  ;;  %v4704_v48 = vld [vmem:[#allocation4 + $0x510] sm:$0xf]  ;;  %v430_v22 = vld [vmem:[%s6763_s14 + $0x108] sm:$0xff]  ;;  %v4872_v27 = vld [vmem:[#allocation4 + $0x660] sm:$0xf] }
  0x86   : > { %2906 = vmatpush.bf16.msra.mxu1 %v4681_v49  ;;  %v5947_v49 = vld [vmem:[#allocation4 + $0x514] sm:$0xf0]  ;;  %v5989_v28 = vld [vmem:[#allocation4 + $0x664] sm:$0xf0]  ;;  %v4936_v29 = vld [vmem:[#allocation4 + $0x6e0] sm:$0xf] }
  0x87   : > { %2920 = vmatpush.bf16.msra.mxu2 %v4745_v50  ;;  %v4768_v50 = vld [vmem:[#allocation4 + $0x590] sm:$0xf]  ;;  %v6005_v32 = vld [vmem:[#allocation4 + $0x6e4] sm:$0xf0]  ;;  %v5000_v33 = vld [vmem:[#allocation4 + $0x760] sm:$0xf] }
  0x88   : > { %2934 = vmatpush.bf16.msra.mxu3 %v4809_v54  ;;  %v4577_v54 = vor.u32 %v5915_v41, %v4576_v37  ;;  %v4769_v2 = vor.u32 %v5963_v51, %v4768_v50  ;;  %v6021_v34 = vld [vmem:[#allocation4 + $0x764] sm:$0xf0]  ;;  %v5064_v37 = vld [vmem:[#allocation4 + $0x7e0] sm:$0xf]  ;;  %v4873_v41 = vor.u32 %v5989_v28, %v4872_v27  ;;  %v4937_v42 = vor.u32 %v6005_v32, %v4936_v29  ;;  %v6003_v51 = vld [vmem:[#allocation4 + $0x6d4] sm:$0xf0] }
  0x89   : > { %2893 = vmatpush.bf16.msra.mxu0 %v4609_v61  ;;  %v4705_v61 = vor.u32 %v5947_v49, %v4704_v48  ;;  %v5001_v45 = vor.u32 %v6021_v34, %v5000_v33  ;;  %v5987_v48 = vld [vmem:[#allocation4 + $0x654] sm:$0xf0]  ;;  %v4928_v49 = vld [vmem:[#allocation4 + $0x6d0] sm:$0xf]  ;;  %v6001_v0 = vld [vmem:[#allocation4 + $0x6c4] sm:$0xf0] }
  0x8a   : > { %2907 = vmatpush.bf16.msra.mxu1 %v4673_v62  ;;  %v4760_v62 = vld [vmem:[#allocation4 + $0x580] sm:$0xf]  ;;  %v4992_v52 = vld [vmem:[#allocation4 + $0x750] sm:$0xf]  ;;  %v6019_v53 = vld [vmem:[#allocation4 + $0x754] sm:$0xf0]  ;;  %v4929_v57 = vor.u32 %v6003_v51, %v4928_v49 }
  0x8b   : > { %2921 = vmatpush.bf16.msra.mxu2 %v4737_v63  ;;  %v5961_v63 = vld [vmem:[#allocation4 + $0x584] sm:$0xf0]  ;;  %v6035_v55 = vld [vmem:[#allocation4 + $0x7d4] sm:$0xf0]  ;;  %v4993_v59 = vor.u32 %v6019_v53, %v4992_v52  ;;  %v4968_v28 = vld [vmem:[#allocation4 + $0x720] sm:$0xf] }
  0x8c   : > { %2935 = vmatpush.bf16.msra.mxu3 %v4801_v4  ;;  %v4944_v4 = vld [vmem:[#allocation4 + $0x6f0] sm:$0xf]  ;;  %v4761_v20 = vor.u32 %v5961_v63, %v4760_v62  ;;  %v4920_v62 = vld [vmem:[#allocation4 + $0x6c0] sm:$0xf]  ;;  %v6017_v3 = vld [vmem:[#allocation4 + $0x744] sm:$0xf0] }
  0x8d   : > { %2894 = vmatpush.bf16.msra.mxu0 %v4601_v11  ;;  %v6039_v11 = vld [vmem:[#allocation4 + $0x7f4] sm:$0xf0]  ;;  %v5997_v27 = vld [vmem:[#allocation4 + $0x6a4] sm:$0xf0]  ;;  %v4832_v34 = vld [vmem:[#allocation4 + $0x610] sm:$0xf] }
  0x8e   : > { %2908 = vmatpush.bf16.msra.mxu1 %v4665_v12  ;;  %v405_v12 = vld [vmem:[%s6763_s14 + $0x40] sm:$0xff]  ;;  %v6013_v29 = vld [vmem:[#allocation4 + $0x724] sm:$0xf0]  ;;  %v6011_v49 = vld [vmem:[#allocation4 + $0x714] sm:$0xf0] }
  0x8f   : > { %2922 = vmatpush.bf16.msra.mxu2 %v4729_v13  ;;  %v429_v13 = vld [vmem:[%s6763_s14 + $0x100] sm:$0xff]  ;;  %v6029_v32 = vld [vmem:[#allocation4 + $0x7a4] sm:$0xf0]  ;;  %v6027_v51 = vld [vmem:[#allocation4 + $0x794] sm:$0xf0] }
  0x90   : > { %2936 = vmatpush.bf16.msra.mxu3 %v4793_v18  ;;  %v431_v18 = vld [vmem:[%s6763_s14 + $0x110] sm:$0xff]  ;;  %v6829_v31 = vpack.c.bf16 %v429_v13, %v405_v12  ;;  %v4824_v52 = vld [vmem:[#allocation4 + $0x600] sm:$0xf]  ;;  %v5977_v53 = vld [vmem:[#allocation4 + $0x604] sm:$0xf0] }
  0x91   : > { %2895 = vmatpush.bf16.msra.mxu0 %v4593_v24  ;;  %v432_v24 = vld [vmem:[%s6763_s14 + $0x118] sm:$0xff]  ;;  %v6831_v35 = vpack.c.bf16 %v431_v18, %v407_v16  ;;  %v4912_v12 = vld [vmem:[#allocation4 + $0x6b0] sm:$0xf] }
  0x92   : > { %2909 = vmatpush.bf16.msra.mxu1 %v4657_v25  ;;  %v4945_v25 = vor.u32 %v6007_v5, %v4944_v4  ;;  %v5048_v4 = vld [vmem:[#allocation4 + $0x7c0] sm:$0xf]  ;;  %v6033_v5 = vld [vmem:[#allocation4 + $0x7c4] sm:$0xf0]  ;;  %v6015_v16 = vld [vmem:[#allocation4 + $0x734] sm:$0xf0] }
  0x93   : > { %2923 = vmatpush.bf16.msra.mxu2 %v4721_v26  ;;  %v5009_v26 = vor.u32 %v6023_v7, %v5008_v6  ;;  %v4921_v7 = vor.u32 %v6001_v0, %v4920_v62  ;;  %v5049_v13 = vor.u32 %v6033_v5, %v5048_v4  ;;  %v5040_v18 = vld [vmem:[#allocation4 + $0x7b0] sm:$0xf]  ;;  %v5016_v62 = vld [vmem:[#allocation4 + $0x780] sm:$0xf]  ;;  %v6071_v5 = vld [vmem:[#allocation4 + $0x8f4] sm:$0xf0] }
  0x94   : > { %2937 = vmatpush.bf16.msra.mxu3 %v4785_v30  ;;  %v5073_v30 = vor.u32 %v6039_v11, %v5072_v8  ;;  %v5983_v11 = vld [vmem:[#allocation4 + $0x634] sm:$0xf0]  ;;  %v5136_v0 = vld [vmem:[#allocation4 + $0x870] sm:$0xf] }
  0x95   : > { %2896 = vmatpush.bf16.msra.mxu0 %v4585_v36  ;;  %v6833_v36 = vpack.c.bf16 %v430_v22, %v406_v19  ;;  %v6031_v19 = vld [vmem:[#allocation4 + $0x7b4] sm:$0xf0]  ;;  %v5200_v4 = vld [vmem:[#allocation4 + $0x8f0] sm:$0xf] }
  0x96   : > { %2910 = vmatpush.bf16.msra.mxu1 %v4649_v38  ;;  %v6037_v38 = vld [vmem:[#allocation4 + $0x7e4] sm:$0xf0] }
  0x97   : > { %2924 = vmatpush.bf16.msra.mxu2 %v4713_v40  ;;  %v6835_v40 = vpack.c.bf16 %v432_v24, %v408_v23  ;;  %v5065_v50 = vor.u32 %v6037_v38, %v5064_v37  ;;  %v4840_v23 = vld [vmem:[#allocation4 + $0x620] sm:$0xf]  ;;  %v5981_v24 = vld [vmem:[#allocation4 + $0x624] sm:$0xf0]  ;;  %v5979_v37 = vld [vmem:[#allocation4 + $0x614] sm:$0xf0] }
  0x98   : > { %2938 = vmatpush.bf16.msra.mxu3 %v4777_v46  ;;  %v4864_v46 = vld [vmem:[#allocation4 + $0x650] sm:$0xf]  ;;  %v4841_v33 = vor.u32 %v5981_v24, %v4840_v23  ;;  %v412_v23 = vld [vmem:[%s6763_s14 + $0x78] sm:$0xff] }
  0x99   : > { %2897 = vmatpush.bf16.msra.mxu0 %v4577_v54  ;;  %v5056_v54 = vld [vmem:[#allocation4 + $0x7d0] sm:$0xf]  ;;  %v4865_v56 = vor.u32 %v5987_v48, %v4864_v46  ;;  %v436_v24 = vld [vmem:[%s6763_s14 + $0x138] sm:$0xff] }
  0x9a   : > { %2911 = vmatpush.bf16.msra.mxu1 %v4641_v60  ;;  %v4856_v60 = vld [vmem:[#allocation4 + $0x640] sm:$0xf]  ;;  %v5057_v63 = vor.u32 %v6035_v55, %v5056_v54  ;;  %v4960_v46 = vld [vmem:[#allocation4 + $0x710] sm:$0xf]  ;;  %v4833_v54 = vor.u32 %v5979_v37, %v4832_v34  ;;  %v6085_v37 = vld [vmem:[#allocation4 + $0x964] sm:$0xf0] }
  0x9b   : > { %2925 = vmatpush.bf16.msra.mxu2 %v4705_v61  ;;  %v5985_v61 = vld [vmem:[#allocation4 + $0x644] sm:$0xf0]  ;;  %v4888_v55 = vld [vmem:[#allocation4 + $0x680] sm:$0xf] }
  0x9c   : > { %2939 = vmatpush.bf16.msra.mxu3 %v4769_v2  ;;  %v4984_v2 = vld [vmem:[#allocation4 + $0x740] sm:$0xf]  ;;  %v4857_v6 = vor.u32 %v5985_v61, %v4856_v60  ;;  %v4961_v61 = vor.u32 %v6011_v49, %v4960_v46  ;;  %v6855_v46 = vpack.c.bf16 %v436_v24, %v412_v23  ;;  %v6095_v23 = vld [vmem:[#allocation4 + $0x9b4] sm:$0xf0] }
  0x9d   : > { %2898 = vmatpush.bf16.msra.mxu0 %v4569_v9  ;;  %v4985_v8 = vor.u32 %v6017_v3, %v4984_v2  ;;  %v4848_v9 = vld [vmem:[#allocation4 + $0x630] sm:$0xf]  ;;  %v6055_v3 = vld [vmem:[#allocation4 + $0x874] sm:$0xf0]  ;;  %v5256_v34 = vld [vmem:[#allocation4 + $0x960] sm:$0xf] }
  0x9e   : > { %2912 = vmatpush.bf16.msra.mxu1 %v4633_v14  ;;  %v5999_v14 = vld [vmem:[#allocation4 + $0x6b4] sm:$0xf0] }
  0x9f   : > { %2926 = vmatpush.bf16.msra.mxu2 %v4697_v15  ;;  %v4976_v15 = vld [vmem:[#allocation4 + $0x730] sm:$0xf] }
  0xa0   : > { %2940 = vmatpush.bf16.msra.mxu3 %v4761_v20  ;;  %2899 = vmatmul.bf16.vlgmr.msra.gmra.mxu0 %v6829_v31  ;;  %v4849_v20 = vor.u32 %v5983_v11, %v4848_v9  ;;  %v4977_v22 = vor.u32 %v6015_v16, %v4976_v15  ;;  %v4825_v9 = vor.u32 %v5977_v53, %v4824_v52  ;;  %v6103_v11 = vld [vmem:[#allocation4 + $0x9f4] sm:$0xf0]  ;;  %v411_v16 = vld [vmem:[%s6763_s14 + $0x70] sm:$0xff] }
  0xa1   : > { %2947 = vmatpush.bf16.msrb.mxu0 %v4881_v21  ;;  %2913 = vmatmul.bf16.vlgmr.msra.gmra.mxu1 %v6833_v36  ;;  %v4913_v21 = vor.u32 %v5999_v14, %v4912_v12  ;;  %v409_v12 = vld [vmem:[%s6763_s14 + $0x60] sm:$0xff]  ;;  %v6051_v52 = vld [vmem:[#allocation4 + $0x854] sm:$0xf0]  ;;  %v5184_v53 = vld [vmem:[#allocation4 + $0x8d0] sm:$0xf] }
  0xa2   : > { %2961 = vmatpush.bf16.msrb.mxu1 %v4945_v25  ;;  %2927 = vmatmul.bf16.vlgmr.msra.gmra.mxu2 %v6831_v35  ;;  %v4904_v25 = vld [vmem:[#allocation4 + $0x6a0] sm:$0xf] }
  0xa3   : > { %2975 = vmatpush.bf16.msrb.mxu2 %v5009_v26  ;;  %2941 = vmatmul.bf16.vlgmr.msra.gmra.mxu3 %v6835_v40  ;;  %v5041_v26 = vor.u32 %v6031_v19, %v5040_v18  ;;  %v4905_v38 = vor.u32 %v5997_v27, %v4904_v25  ;;  %v435_v18 = vld [vmem:[%s6763_s14 + $0x130] sm:$0xff]  ;;  %v410_v19 = vld [vmem:[%s6763_s14 + $0x68] sm:$0xff]  ;;  %v5201_v25 = vor.u32 %v6071_v5, %v5200_v4  ;;  %v5128_v27 = vld [vmem:[#allocation4 + $0x860] sm:$0xf] }
  0xa4   : > { %2989 = vmatpush.bf16.msrb.mxu3 %v5073_v30  ;;  %v5032_v30 = vld [vmem:[#allocation4 + $0x7a0] sm:$0xf]  ;;  %v6065_v5 = vld [vmem:[#allocation4 + $0x8c4] sm:$0xf0] }
  0xa5   : > { %2948 = vmatpush.bf16.msrb.mxu0 %v4873_v41  ;;  %v4969_v41 = vor.u32 %v6013_v29, %v4968_v28  ;;  %v5033_v48 = vor.u32 %v6029_v32, %v5032_v30  ;;  %v6053_v28 = vld [vmem:[#allocation4 + $0x864] sm:$0xf0]  ;;  %v5192_v29 = vld [vmem:[#allocation4 + $0x8e0] sm:$0xf] }
  0xa6   : > { %2962 = vmatpush.bf16.msrb.mxu1 %v4937_v42  ;;  %v4896_v42 = vld [vmem:[#allocation4 + $0x690] sm:$0xf] }
  0xa7   : > { %2976 = vmatpush.bf16.msrb.mxu2 %v5001_v45  ;;  %v5995_v45 = vld [vmem:[#allocation4 + $0x694] sm:$0xf0] }
  0xa8   : > { %2990 = vmatpush.bf16.msrb.mxu3 %v5065_v50  ;;  %v5024_v50 = vld [vmem:[#allocation4 + $0x790] sm:$0xf]  ;;  %v4897_v60 = vor.u32 %v5995_v45, %v4896_v42  ;;  %v5320_v42 = vld [vmem:[#allocation4 + $0x9e0] sm:$0xf]  ;;  %v6101_v45 = vld [vmem:[#allocation4 + $0x9e4] sm:$0xf0] }
  0xa9   : > { %2949 = vmatpush.bf16.msrb.mxu0 %v4865_v56  ;;  %v5993_v56 = vld [vmem:[#allocation4 + $0x684] sm:$0xf0]  ;;  %v5025_v2 = vor.u32 %v6027_v51, %v5024_v50  ;;  %v5257_v50 = vor.u32 %v6085_v37, %v5256_v34  ;;  %v5120_v51 = vld [vmem:[#allocation4 + $0x850] sm:$0xf]  ;;  %v5224_v34 = vld [vmem:[#allocation4 + $0x920] sm:$0xf] }
  0xaa   : > { %2963 = vmatpush.bf16.msrb.mxu1 %v4929_v57  ;;  %v4952_v57 = vld [vmem:[#allocation4 + $0x700] sm:$0xf]  ;;  %v4889_v14 = vor.u32 %v5993_v56, %v4888_v55  ;;  %v6067_v55 = vld [vmem:[#allocation4 + $0x8d4] sm:$0xf0]  ;;  %v5248_v56 = vld [vmem:[#allocation4 + $0x950] sm:$0xf] }
  0xab   : > { %2977 = vmatpush.bf16.msrb.mxu2 %v4993_v59  ;;  %v6009_v59 = vld [vmem:[#allocation4 + $0x704] sm:$0xf0] }
  0xac   : > { %2991 = vmatpush.bf16.msrb.mxu3 %v5057_v63  ;;  %v6025_v63 = vld [vmem:[#allocation4 + $0x784] sm:$0xf0]  ;;  %v4953_v15 = vor.u32 %v6009_v59, %v4952_v57  ;;  %v6083_v57 = vld [vmem:[#allocation4 + $0x954] sm:$0xf0]  ;;  %v5312_v59 = vld [vmem:[#allocation4 + $0x9d0] sm:$0xf] }
  0xad   : > { %2950 = vmatpush.bf16.msrb.mxu0 %v4857_v6  ;;  %v5264_v6 = vld [vmem:[#allocation4 + $0x970] sm:$0xf]  ;;  %v6077_v37 = vld [vmem:[#allocation4 + $0x924] sm:$0xf0] }
  0xae   : > { %2964 = vmatpush.bf16.msrb.mxu1 %v4921_v7  ;;  %v6087_v7 = vld [vmem:[#allocation4 + $0x974] sm:$0xf0] }
  0xaf   : > { %2978 = vmatpush.bf16.msrb.mxu2 %v4985_v8  ;;  %v5328_v8 = vld [vmem:[#allocation4 + $0x9f0] sm:$0xf] }
  0xb0   : > { %2992 = vmatpush.bf16.msrb.mxu3 %v5049_v13  ;;  %v433_v13 = vld [vmem:[%s6763_s14 + $0x120] sm:$0xff]  ;;  %v5329_v30 = vor.u32 %v6103_v11, %v5328_v8 }
  0xb1   : > { %2951 = vmatpush.bf16.msrb.mxu0 %v4849_v20  ;;  %v5017_v20 = vor.u32 %v6025_v63, %v5016_v62  ;;  %v6849_v32 = vpack.c.bf16 %v433_v13, %v409_v12  ;;  %v5185_v62 = vor.u32 %v6067_v55, %v5184_v53  ;;  %v5249_v63 = vor.u32 %v6083_v57, %v5248_v56  ;;  %v5304_v8 = vld [vmem:[#allocation4 + $0x9c0] sm:$0xf]  ;;  %v5152_v53 = vld [vmem:[#allocation4 + $0x890] sm:$0xf]  ;;  %v6075_v57 = vld [vmem:[#allocation4 + $0x914] sm:$0xf0] }
  0xb2   : > { %2965 = vmatpush.bf16.msrb.mxu1 %v4913_v21  ;;  %v5137_v21 = vor.u32 %v6055_v3, %v5136_v0  ;;  %v5112_v0 = vld [vmem:[#allocation4 + $0x840] sm:$0xf]  ;;  %v5216_v56 = vld [vmem:[#allocation4 + $0x910] sm:$0xf] }
  0xb3   : > { %2979 = vmatpush.bf16.msrb.mxu2 %v4977_v22  ;;  %v434_v22 = vld [vmem:[%s6763_s14 + $0x128] sm:$0xff]  ;;  %v5176_v3 = vld [vmem:[#allocation4 + $0x8c0] sm:$0xf] }
  0xb4   : > { %2993 = vmatpush.bf16.msrb.mxu3 %v5041_v26  ;;  %v5265_v26 = vor.u32 %v6087_v7, %v5264_v6  ;;  %v5240_v6 = vld [vmem:[#allocation4 + $0x940] sm:$0xf]  ;;  %v6081_v7 = vld [vmem:[#allocation4 + $0x944] sm:$0xf0]  ;;  %v5177_v12 = vor.u32 %v6065_v5, %v5176_v3 }
  0xb5   : > { %2952 = vmatpush.bf16.msrb.mxu0 %v4841_v33  ;;  %v6069_v33 = vld [vmem:[#allocation4 + $0x8e4] sm:$0xf0]  ;;  %v5241_v13 = vor.u32 %v6081_v7, %v5240_v6  ;;  %v5208_v3 = vld [vmem:[#allocation4 + $0x900] sm:$0xf]  ;;  %v5217_v6 = vor.u32 %v6075_v57, %v5216_v56 }
  0xb6   : > { %2966 = vmatpush.bf16.msrb.mxu1 %v4905_v38  ;;  %v6851_v38 = vpack.c.bf16 %v435_v18, %v411_v16  ;;  %v5193_v49 = vor.u32 %v6069_v33, %v5192_v29  ;;  %v5168_v16 = vld [vmem:[#allocation4 + $0x8b0] sm:$0xf]  ;;  %v5160_v29 = vld [vmem:[#allocation4 + $0x8a0] sm:$0xf]  ;;  %v6061_v33 = vld [vmem:[#allocation4 + $0x8a4] sm:$0xf0] }
  0xb7   : > { %2980 = vmatpush.bf16.msrb.mxu2 %v4969_v41  ;;  %v6853_v41 = vpack.c.bf16 %v434_v22, %v410_v19  ;;  %v6063_v19 = vld [vmem:[#allocation4 + $0x8b4] sm:$0xf0]  ;;  %v5296_v22 = vld [vmem:[#allocation4 + $0x9b0] sm:$0xf]  ;;  %v5272_v7 = vld [vmem:[#allocation4 + $0x980] sm:$0xf] }
  0xb8   : > { %2994 = vmatpush.bf16.msrb.mxu3 %v5033_v48  ;;  %v5129_v48 = vor.u32 %v6053_v28, %v5128_v27  ;;  %v5096_v27 = vld [vmem:[#allocation4 + $0x820] sm:$0xf]  ;;  %v6045_v28 = vld [vmem:[#allocation4 + $0x824] sm:$0xf0] }
  0xb9   : > { %2953 = vmatpush.bf16.msrb.mxu0 %v4833_v54  ;;  %v5321_v54 = vor.u32 %v6101_v45, %v5320_v42  ;;  %v5288_v42 = vld [vmem:[#allocation4 + $0x9a0] sm:$0xf]  ;;  %v6093_v45 = vld [vmem:[#allocation4 + $0x9a4] sm:$0xf0] }
  0xba   : > { %2967 = vmatpush.bf16.msrb.mxu1 %v4897_v60  ;;  %v6099_v60 = vld [vmem:[#allocation4 + $0x9d4] sm:$0xf0]  ;;  %v5289_v55 = vor.u32 %v6093_v45, %v5288_v42  ;;  %v5384_v45 = vld [vmem:[#allocation4 + $0xa60] sm:$0xf] }
  0xbb   : > { %2981 = vmatpush.bf16.msrb.mxu2 %v4961_v61  ;;  %v5121_v61 = vor.u32 %v6051_v52, %v5120_v51  ;;  %v5313_v4 = vor.u32 %v6099_v60, %v5312_v59  ;;  %v5225_v51 = vor.u32 %v6077_v37, %v5224_v34  ;;  %v6043_v52 = vld [vmem:[#allocation4 + $0x814] sm:$0xf0]  ;;  %v5280_v59 = vld [vmem:[#allocation4 + $0x990] sm:$0xf]  ;;  %v5576_v57 = vld [vmem:[#allocation4 + $0xbe0] sm:$0xf] }
  0xbc   : > { %2995 = vmatpush.bf16.msrb.mxu3 %v5025_v2  ;;  %v6049_v2 = vld [vmem:[#allocation4 + $0x844] sm:$0xf0]  ;;  %v6091_v60 = vld [vmem:[#allocation4 + $0x994] sm:$0xf0] }
  0xbd   : > { %2954 = vmatpush.bf16.msrb.mxu0 %v4825_v9  ;;  %v6097_v9 = vld [vmem:[#allocation4 + $0x9c4] sm:$0xf0]  ;;  %v5113_v11 = vor.u32 %v6049_v2, %v5112_v0  ;;  %v5144_v0 = vld [vmem:[#allocation4 + $0x880] sm:$0xf]  ;;  %v440_v34 = vld [vmem:[%s6763_s14 + $0x158] sm:$0xff] }
  0xbe   : > { %2968 = vmatpush.bf16.msrb.mxu1 %v4889_v14  ;;  %v5104_v14 = vld [vmem:[#allocation4 + $0x830] sm:$0xf]  ;;  %v5305_v18 = vor.u32 %v6097_v9, %v5304_v8  ;;  %v6057_v2 = vld [vmem:[#allocation4 + $0x884] sm:$0xf0] }
  0xbf   : > { %2982 = vmatpush.bf16.msrb.mxu2 %v4953_v15  ;;  %v6047_v15 = vld [vmem:[#allocation4 + $0x834] sm:$0xf0]  ;;  %v6089_v8 = vld [vmem:[#allocation4 + $0x984] sm:$0xf0]  ;;  %v5392_v9 = vld [vmem:[#allocation4 + $0xa70] sm:$0xf] }
  0xc0   : > { %2996 = vmatpush.bf16.msrb.mxu3 %v5017_v20  ;;  %2955 = vmatmul.bf16.vlgmr.msrb.gmra.mxu0 %v6849_v32  ;;  %v5232_v20 = vld [vmem:[#allocation4 + $0x930] sm:$0xf]  ;;  %v5105_v24 = vor.u32 %v6047_v15, %v5104_v14  ;;  %v6135_v14 = vld [vmem:[#allocation4 + $0xaf4] sm:$0xf0] }
  0xc1   : > { %3003 = vmatpush.bf16.msra.mxu0 %v5137_v21  ;;  %2969 = vmatmul.bf16.vlgmr.msrb.gmra.mxu1 %v6853_v41  ;;  %v6079_v21 = vld [vmem:[#allocation4 + $0x934] sm:$0xf0]  ;;  %v5520_v15 = vld [vmem:[#allocation4 + $0xb70] sm:$0xf] }
  0xc2   : > { %3017 = vmatpush.bf16.msra.mxu1 %v5201_v25  ;;  %2983 = vmatmul.bf16.vlgmr.msrb.gmra.mxu2 %v6851_v38  ;;  %v5169_v25 = vor.u32 %v6063_v19, %v5168_v16  ;;  %v6151_v16 = vld [vmem:[#allocation4 + $0xb74] sm:$0xf0] }
  0xc3   : > { %3031 = vmatpush.bf16.msra.mxu2 %v5265_v26  ;;  %2997 = vmatmul.bf16.vlgmr.msrb.gmra.mxu3 %v6855_v46  ;;  %v5233_v26 = vor.u32 %v6079_v21, %v5232_v20  ;;  %v6167_v20 = vld [vmem:[#allocation4 + $0xbf4] sm:$0xf0]  ;;  %v413_v21 = vld [vmem:[%s6763_s14 + $0x80] sm:$0xff]  ;;  %v5521_v42 = vor.u32 %v6151_v16, %v5520_v15  ;;  %v6113_v15 = vld [vmem:[#allocation4 + $0xa44] sm:$0xf0] }
  0xc4   : > { %3045 = vmatpush.bf16.msra.mxu3 %v5329_v30  ;;  %v5297_v30 = vor.u32 %v6095_v23, %v5296_v22  ;;  %v437_v22 = vld [vmem:[%s6763_s14 + $0x140] sm:$0xff]  ;;  %v5145_v23 = vor.u32 %v6057_v2, %v5144_v0  ;;  %v5376_v0 = vld [vmem:[#allocation4 + $0xa50] sm:$0xf]  ;;  %v6115_v2 = vld [vmem:[#allocation4 + $0xa54] sm:$0xf0] }
  0xc5   : > { %3004 = vmatpush.bf16.msra.mxu0 %v5129_v48  ;;  %v5097_v48 = vor.u32 %v6045_v28, %v5096_v27  ;;  %v414_v27 = vld [vmem:[%s6763_s14 + $0x88] sm:$0xff]  ;;  %v5273_v28 = vor.u32 %v6089_v8, %v5272_v7  ;;  %v6147_v7 = vld [vmem:[#allocation4 + $0xb54] sm:$0xf0]  ;;  %v5568_v8 = vld [vmem:[#allocation4 + $0xbd0] sm:$0xf] }
  0xc6   : > { %3018 = vmatpush.bf16.msra.mxu1 %v5193_v49  ;;  %v5088_v49 = vld [vmem:[#allocation4 + $0x810] sm:$0xf]  ;;  %v5432_v16 = vld [vmem:[#allocation4 + $0xac0] sm:$0xf] }
  0xc7   : > { %3032 = vmatpush.bf16.msra.mxu2 %v5257_v50  ;;  %v5161_v50 = vor.u32 %v6061_v33, %v5160_v29  ;;  %v416_v33 = vld [vmem:[%s6763_s14 + $0x98] sm:$0xff] }
  0xc8   : > { %3046 = vmatpush.bf16.msra.mxu3 %v5321_v54  ;;  %v6059_v54 = vld [vmem:[#allocation4 + $0x894] sm:$0xf0] }
  0xc9   : > { %3005 = vmatpush.bf16.msra.mxu0 %v5121_v61  ;;  %v5080_v61 = vld [vmem:[#allocation4 + $0x800] sm:$0xf]  ;;  %v5153_v5 = vor.u32 %v6059_v54, %v5152_v53  ;;  %v6149_v54 = vld [vmem:[#allocation4 + $0xb64] sm:$0xf0] }
  0xca   : > { %3019 = vmatpush.bf16.msra.mxu1 %v5185_v62  ;;  %v6041_v62 = vld [vmem:[#allocation4 + $0x804] sm:$0xf0]  ;;  %v5512_v53 = vld [vmem:[#allocation4 + $0xb60] sm:$0xf] }
  0xcb   : > { %3033 = vmatpush.bf16.msra.mxu2 %v5249_v63  ;;  %v5089_v63 = vor.u32 %v6043_v52, %v5088_v49  ;;  %v5081_v19 = vor.u32 %v6041_v62, %v5080_v61  ;;  %v5448_v49 = vld [vmem:[#allocation4 + $0xae0] sm:$0xf]  ;;  %v6133_v52 = vld [vmem:[#allocation4 + $0xae4] sm:$0xf0] }
  0xcc   : > { %3047 = vmatpush.bf16.msra.mxu3 %v5313_v4  ;;  %v6073_v4 = vld [vmem:[#allocation4 + $0x904] sm:$0xf0]  ;;  %v5449_v62 = vor.u32 %v6133_v52, %v5448_v49  ;;  %v5352_v52 = vld [vmem:[#allocation4 + $0xa20] sm:$0xf] }
  0xcd   : > { %3006 = vmatpush.bf16.msra.mxu0 %v5113_v11  ;;  %v5281_v11 = vor.u32 %v6091_v60, %v5280_v59  ;;  %v6165_v59 = vld [vmem:[#allocation4 + $0xbe4] sm:$0xf0]  ;;  %v6875_v60 = vpack.c.bf16 %v440_v34, %v416_v33  ;;  %v6127_v33 = vld [vmem:[#allocation4 + $0xab4] sm:$0xf0]  ;;  %v5488_v34 = vld [vmem:[#allocation4 + $0xb30] sm:$0xf] }
  0xce   : > { %3020 = vmatpush.bf16.msra.mxu1 %v5177_v12  ;;  %v6119_v12 = vld [vmem:[#allocation4 + $0xa74] sm:$0xf0] }
  0xcf   : > { %3034 = vmatpush.bf16.msra.mxu2 %v5241_v13  ;;  %v5456_v13 = vld [vmem:[#allocation4 + $0xaf0] sm:$0xf]  ;;  %v5393_v29 = vor.u32 %v6119_v12, %v5392_v9  ;;  %v6163_v9 = vld [vmem:[#allocation4 + $0xbd4] sm:$0xf0] }
  0xd0   : > { %3048 = vmatpush.bf16.msra.mxu3 %v5305_v18  ;;  %v5584_v18 = vld [vmem:[#allocation4 + $0xbf0] sm:$0xf]  ;;  %v5457_v37 = vor.u32 %v6135_v14, %v5456_v13  ;;  %v5368_v14 = vld [vmem:[#allocation4 + $0xa40] sm:$0xf] }
  0xd1   : > { %3007 = vmatpush.bf16.msra.mxu0 %v5105_v24  ;;  %v5209_v24 = vor.u32 %v6073_v4, %v5208_v3  ;;  %v5440_v3 = vld [vmem:[#allocation4 + $0xad0] sm:$0xf]  ;;  %v5577_v4 = vor.u32 %v6165_v59, %v5576_v57  ;;  %v6125_v59 = vld [vmem:[#allocation4 + $0xaa4] sm:$0xf0] }
  0xd2   : > { %3021 = vmatpush.bf16.msra.mxu1 %v5169_v25  ;;  %v415_v25 = vld [vmem:[%s6763_s14 + $0x90] sm:$0xff] }
  0xd3   : > { %3035 = vmatpush.bf16.msra.mxu2 %v5233_v26  ;;  %v439_v26 = vld [vmem:[%s6763_s14 + $0x150] sm:$0xff] }
  0xd4   : > { %3049 = vmatpush.bf16.msra.mxu3 %v5297_v30  ;;  %v438_v30 = vld [vmem:[%s6763_s14 + $0x148] sm:$0xff] }
  0xd5   : > { %3008 = vmatpush.bf16.msra.mxu0 %v5097_v48  ;;  %v6117_v48 = vld [vmem:[#allocation4 + $0xa64] sm:$0xf0]  ;;  %v6873_v56 = vpack.c.bf16 %v438_v30, %v414_v27  ;;  %v5360_v27 = vld [vmem:[#allocation4 + $0xa30] sm:$0xf] }
  0xd6   : > { %3022 = vmatpush.bf16.msra.mxu1 %v5161_v50  ;;  %v5585_v50 = vor.u32 %v6167_v20, %v5584_v18  ;;  %v5385_v61 = vor.u32 %v6117_v48, %v5384_v45  ;;  %v5569_v18 = vor.u32 %v6163_v9, %v5568_v8  ;;  %v5496_v20 = vld [vmem:[#allocation4 + $0xb40] sm:$0xf]  ;;  %v6159_v45 = vld [vmem:[#allocation4 + $0xbb4] sm:$0xf0] }
  0xd7   : > { %3036 = vmatpush.bf16.msra.mxu2 %v5225_v51  ;;  %v6869_v51 = vpack.c.bf16 %v437_v22, %v413_v21  ;;  %v6145_v21 = vld [vmem:[#allocation4 + $0xb44] sm:$0xf0]  ;;  %v5560_v22 = vld [vmem:[#allocation4 + $0xbc0] sm:$0xf]  ;;  %v6123_v8 = vld [vmem:[#allocation4 + $0xa94] sm:$0xf0] }
  0xd8   : > { %3050 = vmatpush.bf16.msra.mxu3 %v5289_v55  ;;  %v6871_v55 = vpack.c.bf16 %v439_v26, %v415_v25  ;;  %v5497_v26 = vor.u32 %v6145_v21, %v5496_v20  ;;  %v6121_v20 = vld [vmem:[#allocation4 + $0xa84] sm:$0xf0]  ;;  %v5464_v21 = vld [vmem:[#allocation4 + $0xb00] sm:$0xf] }
  0xd9   : > { %3009 = vmatpush.bf16.msra.mxu0 %v5089_v63  ;;  %v5513_v63 = vor.u32 %v6149_v54, %v5512_v53  ;;  %v6109_v53 = vld [vmem:[#allocation4 + $0xa24] sm:$0xf0]  ;;  %v5416_v54 = vld [vmem:[#allocation4 + $0xaa0] sm:$0xf] }
  0xda   : > { %3023 = vmatpush.bf16.msra.mxu1 %v5153_v5  ;;  %v6131_v5 = vld [vmem:[#allocation4 + $0xad4] sm:$0xf0] }
  0xdb   : > { %3037 = vmatpush.bf16.msra.mxu2 %v5217_v6  ;;  %v5504_v6 = vld [vmem:[#allocation4 + $0xb50] sm:$0xf]  ;;  %v5441_v12 = vor.u32 %v6131_v5, %v5440_v3 }
  0xdc   : > { %3051 = vmatpush.bf16.msra.mxu3 %v5281_v11  ;;  %v5377_v11 = vor.u32 %v6115_v2, %v5376_v0  ;;  %v5505_v13 = vor.u32 %v6147_v7, %v5504_v6  ;;  %v6157_v0 = vld [vmem:[#allocation4 + $0xba4] sm:$0xf0]  ;;  %v5353_v2 = vor.u32 %v6109_v53, %v5352_v52  ;;  %v5344_v3 = vld [vmem:[#allocation4 + $0xa10] sm:$0xf]  ;;  %v6107_v6 = vld [vmem:[#allocation4 + $0xa14] sm:$0xf0] }
  0xdd   : > { %3010 = vmatpush.bf16.msra.mxu0 %v5081_v19  ;;  %v6129_v19 = vld [vmem:[#allocation4 + $0xac4] sm:$0xf0]  ;;  %v5408_v7 = vld [vmem:[#allocation4 + $0xa90] sm:$0xf] }
  0xde   : > { %3024 = vmatpush.bf16.msra.mxu1 %v5145_v23  ;;  %v6161_v23 = vld [vmem:[#allocation4 + $0xbc4] sm:$0xf0]  ;;  %v5433_v25 = vor.u32 %v6129_v19, %v5432_v16  ;;  %v5400_v19 = vld [vmem:[#allocation4 + $0xa80] sm:$0xf] }
  0xdf   : > { %3038 = vmatpush.bf16.msra.mxu2 %v5209_v24  ;;  %v5369_v24 = vor.u32 %v6113_v15, %v5368_v14  ;;  %v5561_v30 = vor.u32 %v6161_v23, %v5560_v22  ;;  %v6155_v14 = vld [vmem:[#allocation4 + $0xb94] sm:$0xf0]  ;;  %v5336_v15 = vld [vmem:[#allocation4 + $0xa00] sm:$0xf]  ;;  %v6105_v16 = vld [vmem:[#allocation4 + $0xa04] sm:$0xf0]  ;;  %v5409_v23 = vor.u32 %v6123_v8, %v5408_v7  ;;  %v5401_v52 = vor.u32 %v6121_v20, %v5400_v19 }
  0xe0   : > { %3052 = vmatpush.bf16.msra.mxu3 %v5273_v28  ;;  %3011 = vmatmul.bf16.vlgmr.msra.gmra.mxu0 %v6869_v51  ;;  %v6111_v28 = vld [vmem:[#allocation4 + $0xa34] sm:$0xf0]  ;;  %v6137_v22 = vld [vmem:[#allocation4 + $0xb04] sm:$0xf0]  ;;  %v5812_v7 = vld [vmem:[#allocation4 + $0xe4] sm:$0xf] }
  0xe1   : > { %3059 = vmatpush.bf16.msrb.mxu0 %v5393_v29  ;;  %3025 = vmatmul.bf16.vlgmr.msra.gmra.mxu1 %v6873_v56  ;;  %v5424_v29 = vld [vmem:[#allocation4 + $0xab0] sm:$0xf]  ;;  %v5361_v48 = vor.u32 %v6111_v28, %v5360_v27  ;;  %v5798_v27 = vld [vmem:[#allocation4 + $0x74] sm:$0xf]  ;;  %v5465_v53 = vor.u32 %v6137_v22, %v5464_v21 }
  0xe2   : > { %3073 = vmatpush.bf16.msrb.mxu1 %v5457_v37  ;;  %3039 = vmatmul.bf16.vlgmr.msra.gmra.mxu2 %v6871_v55  ;;  %v6143_v37 = vld [vmem:[#allocation4 + $0xb34] sm:$0xf0]  ;;  %v5425_v49 = vor.u32 %v6127_v33, %v5424_v29  ;;  %v4114_v29 = vld [vmem:[#allocation4 + $0x78] sm:$0xf0] }
  0xe3   : > { %3087 = vmatpush.bf16.msrb.mxu2 %v5521_v42  ;;  %3053 = vmatmul.bf16.vlgmr.msra.gmra.mxu3 %v6875_v60  ;;  %v5552_v42 = vld [vmem:[#allocation4 + $0xbb0] sm:$0xf]  ;;  %v4178_v33 = vld [vmem:[#allocation4 + $0xf8] sm:$0xf0] }
  0xe4   : > { %3101 = vmatpush.bf16.msrb.mxu3 %v5585_v50  ;;  %v5489_v50 = vor.u32 %v6143_v37, %v5488_v34  ;;  %v5553_v57 = vor.u32 %v6159_v45, %v5552_v42  ;;  %v5830_v34 = vld [vmem:[#allocation4 + $0x174] sm:$0xf]  ;;  %v4242_v37 = vld [vmem:[#allocation4 + $0x178] sm:$0xf0]  ;;  %v5337_v45 = vor.u32 %v6105_v16, %v5336_v15  ;;  %v5844_v16 = vld [vmem:[#allocation4 + $0x1e4] sm:$0xf] }
  0xe5   : > { %3060 = vmatpush.bf16.msrb.mxu0 %v5385_v61  ;;  %v5480_v61 = vld [vmem:[#allocation4 + $0xb20] sm:$0xf]  ;;  %v5846_v42 = vld [vmem:[#allocation4 + $0x1f4] sm:$0xf] }
  0xe6   : > { %3074 = vmatpush.bf16.msrb.mxu1 %v5449_v62  ;;  %v6141_v62 = vld [vmem:[#allocation4 + $0xb24] sm:$0xf0] }
  0xe7   : > { %3088 = vmatpush.bf16.msrb.mxu2 %v5513_v63  ;;  %v5544_v63 = vld [vmem:[#allocation4 + $0xba0] sm:$0xf]  ;;  %v5481_v5 = vor.u32 %v6141_v62, %v5480_v61  ;;  %v4117_v62 = vor.u32 %v5798_v27, %v4114_v29  ;;  %v4162_v27 = vld [vmem:[#allocation4 + $0xd8] sm:$0xf0] }
  0xe8   : > { %3102 = vmatpush.bf16.msrb.mxu3 %v5577_v4  ;;  %v5417_v4 = vor.u32 %v6125_v59, %v5416_v54  ;;  %v5545_v9 = vor.u32 %v6157_v0, %v5544_v63  ;;  %v419_v54 = vld [vmem:[%s6763_s14 + $0xb0] sm:$0xff]  ;;  %v418_v59 = vld [vmem:[%s6763_s14 + $0xa8] sm:$0xff]  ;;  %v420_v0 = vld [vmem:[%s6763_s14 + $0xb8] sm:$0xff] }
  0xe9   : > { %3061 = vmatpush.bf16.msrb.mxu0 %v5377_v11  ;;  %v5472_v11 = vld [vmem:[#allocation4 + $0xb10] sm:$0xf]  ;;  %v442_v63 = vld [vmem:[%s6763_s14 + $0x168] sm:$0xff]  ;;  %v4226_v29 = vld [vmem:[#allocation4 + $0x158] sm:$0xf0] }
  0xea   : > { %3075 = vmatpush.bf16.msrb.mxu1 %v5441_v12  ;;  %v6139_v12 = vld [vmem:[#allocation4 + $0xb14] sm:$0xf0]  ;;  %v6893_v15 = vpack.c.bf16 %v442_v63, %v418_v59  ;;  %v4282_v59 = vld [vmem:[#allocation4 + $0x1c8] sm:$0xf0] }
  0xeb   : > { %3089 = vmatpush.bf16.msrb.mxu2 %v5505_v13  ;;  %v5536_v13 = vld [vmem:[#allocation4 + $0xb90] sm:$0xf] }
  0xec   : > { %3103 = vmatpush.bf16.msrb.mxu3 %v5569_v18  ;;  %v5345_v18 = vor.u32 %v6107_v6, %v5344_v3  ;;  %v5537_v28 = vor.u32 %v6155_v14, %v5536_v13  ;;  %v4106_v6 = vld [vmem:[#allocation4 + $0x68] sm:$0xf0] }
  0xed   : > { %3062 = vmatpush.bf16.msrb.mxu0 %v5369_v24  ;;  %v5473_v24 = vor.u32 %v6139_v12, %v5472_v11  ;;  %v4170_v11 = vld [vmem:[#allocation4 + $0xe8] sm:$0xf0]  ;;  %v5828_v12 = vld [vmem:[#allocation4 + $0x164] sm:$0xf] }
  0xee   : > { %3076 = vmatpush.bf16.msrb.mxu1 %v5433_v25  ;;  %v5528_v25 = vld [vmem:[#allocation4 + $0xb80] sm:$0xf]  ;;  %v4234_v13 = vld [vmem:[#allocation4 + $0x168] sm:$0xf0]  ;;  %v4173_v21 = vor.u32 %v5812_v7, %v4170_v11  ;;  %v4210_v7 = vld [vmem:[#allocation4 + $0x138] sm:$0xf0] }
  0xef   : > { %3090 = vmatpush.bf16.msrb.mxu2 %v5497_v26  ;;  %v6153_v26 = vld [vmem:[#allocation4 + $0xb84] sm:$0xf0]  ;;  %v4237_v22 = vor.u32 %v5828_v12, %v4234_v13  ;;  %v4274_v11 = vld [vmem:[#allocation4 + $0x1b8] sm:$0xf0] }
  0xf0   : > { %3104 = vmatpush.bf16.msrb.mxu3 %v5561_v30  ;;  %v5814_v30 = vld [vmem:[#allocation4 + $0xf4] sm:$0xf]  ;;  %v5529_v61 = vor.u32 %v6153_v26, %v5528_v25 }
  0xf1   : > { %3063 = vmatpush.bf16.msrb.mxu0 %v5361_v48  ;;  %v4306_v48 = vld [vmem:[#allocation4 + $0x1f8] sm:$0xf0]  ;;  %v4181_v3 = vor.u32 %v5814_v30, %v4178_v33  ;;  %v5810_v25 = vld [vmem:[#allocation4 + $0xd4] sm:$0xf] }
  0xf2   : > { %3077 = vmatpush.bf16.msrb.mxu1 %v5425_v49  ;;  %v417_v49 = vld [vmem:[%s6763_s14 + $0xa0] sm:$0xff]  ;;  %v4309_v8 = vor.u32 %v5846_v42, %v4306_v48  ;;  %v5842_v30 = vld [vmem:[#allocation4 + $0x1d4] sm:$0xf]  ;;  %v4290_v33 = vld [vmem:[#allocation4 + $0x1d8] sm:$0xf0] }
  0xf3   : > { %3091 = vmatpush.bf16.msrb.mxu2 %v5489_v50  ;;  %v441_v50 = vld [vmem:[%s6763_s14 + $0x160] sm:$0xff]  ;;  %v4090_v48 = vld [vmem:[#allocation4 + $0x48] sm:$0xf0] }
  0xf4   : > { %3105 = vmatpush.bf16.msrb.mxu3 %v5553_v57  ;;  %v443_v57 = vld [vmem:[%s6763_s14 + $0x170] sm:$0xff] }
  0xf5   : > { %3064 = vmatpush.bf16.msrb.mxu0 %v5353_v2  ;;  %v444_v2 = vld [vmem:[%s6763_s14 + $0x178] sm:$0xff]  ;;  %v6891_v14 = vpack.c.bf16 %v443_v57, %v419_v54  ;;  %v4218_v54 = vld [vmem:[#allocation4 + $0x148] sm:$0xf0]  ;;  %v5840_v57 = vld [vmem:[#allocation4 + $0x1c4] sm:$0xf] }
  0xf6   : > { %3078 = vmatpush.bf16.msrb.mxu1 %v5417_v4  ;;  %v4245_v4 = vor.u32 %v5830_v34, %v4242_v37  ;;  %v6895_v19 = vpack.c.bf16 %v444_v2, %v420_v0  ;;  %v4165_v37 = vor.u32 %v5810_v25, %v4162_v27  ;;  %v5790_v0 = vld [vmem:[#allocation4 + $0x34] sm:$0xf]  ;;  %v4082_v2 = vld [vmem:[#allocation4 + $0x38] sm:$0xf0]  ;;  %v4202_v25 = vld [vmem:[#allocation4 + $0x128] sm:$0xf0] }
  0xf7   : > { %3092 = vmatpush.bf16.msrb.mxu2 %v5481_v5  ;;  %v5796_v5 = vld [vmem:[#allocation4 + $0x64] sm:$0xf]  ;;  %v4085_v12 = vor.u32 %v5790_v0, %v4082_v2  ;;  %v4266_v27 = vld [vmem:[#allocation4 + $0x1a8] sm:$0xf0] }
  0xf8   : > { %3106 = vmatpush.bf16.msrb.mxu3 %v5545_v9  ;;  %v6889_v9 = vpack.c.bf16 %v441_v50, %v417_v49  ;;  %v4109_v20 = vor.u32 %v5796_v5, %v4106_v6  ;;  %v5808_v49 = vld [vmem:[#allocation4 + $0xc4] sm:$0xf]  ;;  %v4293_v50 = vor.u32 %v5842_v30, %v4290_v33  ;;  %v4146_v5 = vld [vmem:[#allocation4 + $0xb8] sm:$0xf0]  ;;  %v5822_v6 = vld [vmem:[#allocation4 + $0x134] sm:$0xf] }
  0xf9   : > { %3065 = vmatpush.bf16.msrb.mxu0 %v5345_v18  ;;  %v4298_v18 = vld [vmem:[#allocation4 + $0x1e8] sm:$0xf0]  ;;  %v5786_v33 = vld [vmem:[#allocation4 + $0x14] sm:$0xf]  ;;  %v5816_v0 = vld [vmem:[#allocation4 + $0x104] sm:$0xf] }
  0xfa   : > { %3079 = vmatpush.bf16.msrb.mxu1 %v5409_v23  ;;  %v5794_v23 = vld [vmem:[#allocation4 + $0x54] sm:$0xf]  ;;  %v4301_v26 = vor.u32 %v5844_v16, %v4298_v18  ;;  %v4213_v16 = vor.u32 %v5822_v6, %v4210_v7  ;;  %v5788_v18 = vld [vmem:[#allocation4 + $0x24] sm:$0xf]  ;;  %v4370_v7 = vld [vmem:[#allocation4 + $0x278] sm:$0xf0] }
  0xfb   : > { %3093 = vmatpush.bf16.msrb.mxu2 %v5473_v24  ;;  %v4098_v24 = vld [vmem:[#allocation4 + $0x58] sm:$0xf0]  ;;  %v5862_v6 = vld [vmem:[#allocation4 + $0x274] sm:$0xf] }
  0xfc   : > { %3107 = vmatpush.bf16.msrb.mxu3 %v5537_v28  ;;  %v5826_v28 = vld [vmem:[#allocation4 + $0x154] sm:$0xf]  ;;  %v4101_v34 = vor.u32 %v5794_v23, %v4098_v24  ;;  %v4138_v23 = vld [vmem:[#allocation4 + $0xa8] sm:$0xf0]  ;;  %v5820_v24 = vld [vmem:[#allocation4 + $0x124] sm:$0xf] }
  0xfd   : > { %3066 = vmatpush.bf16.msrb.mxu0 %v5337_v45  ;;  %v4229_v42 = vor.u32 %v5826_v28, %v4226_v29  ;;  %v5792_v45 = vld [vmem:[#allocation4 + $0x44] sm:$0xf]  ;;  %v4205_v30 = vor.u32 %v5820_v24, %v4202_v25  ;;  %v4373_v24 = vor.u32 %v5862_v6, %v4370_v7  ;;  %v4346_v6 = vld [vmem:[#allocation4 + $0x248] sm:$0xf0] }
  0xfe   : > { %3080 = vmatpush.bf16.msrb.mxu1 %v5401_v52  ;;  %v4154_v52 = vld [vmem:[#allocation4 + $0xc8] sm:$0xf0]  ;;  %v5872_v7 = vld [vmem:[#allocation4 + $0x2c4] sm:$0xf] }
  0xff   : > { %3094 = vmatpush.bf16.msrb.mxu2 %v5465_v53  ;;  %v5824_v53 = vld [vmem:[#allocation4 + $0x144] sm:$0xf] }
 0x100   : > { %3108 = vmatpush.bf16.msrb.mxu3 %v5529_v61  ;;  %3067 = vmatmul.bf16.vlgmr.msrb.gmra.mxu0 %v6889_v9  ;;  %v4093_v61 = vor.u32 %v5792_v45, %v4090_v48  ;;  %v4221_v63 = vor.u32 %v5824_v53, %v4218_v54  ;;  %v4130_v45 = vld [vmem:[#allocation4 + $0x98] sm:$0xf0]  ;;  %v5818_v48 = vld [vmem:[#allocation4 + $0x114] sm:$0xf]  ;;  %v5784_v54 = vld [vmem:[#allocation4 + $0x4] sm:$0xf] }
 0x101   : > { %3115 = vmatpush.bf16.msra.mxu0 %v4117_v62  ;;  %3081 = vmatmul.bf16.vlgmr.msrb.gmra.mxu1 %v6893_v15  ;;  %v4157_v62 = vor.u32 %v5808_v49, %v4154_v52  ;;  %v4194_v49 = vld [vmem:[#allocation4 + $0x118] sm:$0xf0] }
 0x102   : > { %3129 = vmatpush.bf16.msra.mxu1 %v4181_v3  ;;  %3095 = vmatmul.bf16.vlgmr.msrb.gmra.mxu2 %v6891_v14  ;;  %v5806_v3 = vld [vmem:[#allocation4 + $0xb4] sm:$0xf]  ;;  %v4258_v52 = vld [vmem:[#allocation4 + $0x198] sm:$0xf0] }
 0x103   : > { %3143 = vmatpush.bf16.msra.mxu2 %v4245_v4  ;;  %3109 = vmatmul.bf16.vlgmr.msrb.gmra.mxu3 %v6895_v19  ;;  %v4285_v4 = vor.u32 %v5840_v57, %v4282_v59  ;;  %v4149_v13 = vor.u32 %v5806_v3, %v4146_v5  ;;  %v4058_v57 = vld [vmem:[#allocation4 + $0x8] sm:$0xf0] }
 0x104   : > { %3157 = vmatpush.bf16.msra.mxu3 %v4309_v8  ;;  %v5838_v8 = vld [vmem:[#allocation4 + $0x1b4] sm:$0xf]  ;;  %v4186_v3 = vld [vmem:[#allocation4 + $0x108] sm:$0xf0] }
 0x105   : > { %3116 = vmatpush.bf16.msra.mxu0 %v4109_v20  ;;  %v4074_v20 = vld [vmem:[#allocation4 + $0x28] sm:$0xf0] }
 0x106   : > { %3130 = vmatpush.bf16.msra.mxu1 %v4173_v21  ;;  %v5804_v21 = vld [vmem:[#allocation4 + $0xa4] sm:$0xf]  ;;  %v4077_v28 = vor.u32 %v5788_v18, %v4074_v20  ;;  %v4250_v5 = vld [vmem:[#allocation4 + $0x188] sm:$0xf0]  ;;  %v4189_v20 = vor.u32 %v5816_v0, %v4186_v3  ;;  %v4546_v0 = vld [vmem:[#allocation4 + $0x3d8] sm:$0xf0] }
 0x107   : > { %3144 = vmatpush.bf16.msra.mxu2 %v4237_v22  ;;  %v4277_v22 = vor.u32 %v5838_v8, %v4274_v11  ;;  %v4141_v29 = vor.u32 %v5804_v21, %v4138_v23  ;;  %v5878_v8 = vld [vmem:[#allocation4 + $0x2f4] sm:$0xf]  ;;  %v4061_v11 = vor.u32 %v5784_v54, %v4058_v57 }
 0x108   : > { %3158 = vmatpush.bf16.msra.mxu3 %v4301_v26  ;;  %v5836_v26 = vld [vmem:[#allocation4 + $0x1a4] sm:$0xf]  ;;  %v5910_v21 = vld [vmem:[#allocation4 + $0x3f4] sm:$0xf] }
 0x109   : > { %3117 = vmatpush.bf16.msra.mxu0 %v4101_v34  ;;  %v4066_v34 = vld [vmem:[#allocation4 + $0x18] sm:$0xf0]  ;;  %v5874_v54 = vld [vmem:[#allocation4 + $0x2d4] sm:$0xf] }
 0x10a   : > { %3131 = vmatpush.bf16.msra.mxu1 %v4165_v37  ;;  %v5802_v37 = vld [vmem:[#allocation4 + $0x94] sm:$0xf]  ;;  %v4069_v53 = vor.u32 %v5786_v33, %v4066_v34  ;;  %v4426_v33 = vld [vmem:[#allocation4 + $0x2e8] sm:$0xf0]  ;;  %v5892_v34 = vld [vmem:[#allocation4 + $0x364] sm:$0xf] }
 0x10b   : > { %3145 = vmatpush.bf16.msra.mxu2 %v4229_v42  ;;  %v4269_v42 = vor.u32 %v5836_v26, %v4266_v27  ;;  %v4133_v59 = vor.u32 %v5802_v37, %v4130_v45  ;;  %v5860_v27 = vld [vmem:[#allocation4 + $0x264] sm:$0xf]  ;;  %v4490_v37 = vld [vmem:[#allocation4 + $0x368] sm:$0xf0] }
 0x10c   : > { %3159 = vmatpush.bf16.msra.mxu3 %v4293_v50  ;;  %v5834_v50 = vld [vmem:[#allocation4 + $0x194] sm:$0xf]  ;;  %v4554_v45 = vld [vmem:[#allocation4 + $0x3e8] sm:$0xf0] }
 0x10d   : > { %3118 = vmatpush.bf16.msra.mxu0 %v4093_v61  ;;  %v4197_v61 = vor.u32 %v5818_v48, %v4194_v49  ;;  %v4261_v2 = vor.u32 %v5834_v50, %v4258_v52  ;;  %v4493_v50 = vor.u32 %v5892_v34, %v4490_v37  ;;  %v5858_v52 = vld [vmem:[#allocation4 + $0x254] sm:$0xf]  ;;  %v4330_v34 = vld [vmem:[#allocation4 + $0x228] sm:$0xf0]  ;;  %v5868_v37 = vld [vmem:[#allocation4 + $0x2a4] sm:$0xf] }
 0x10e   : > { %3132 = vmatpush.bf16.msra.mxu1 %v4157_v62  ;;  %v5800_v62 = vld [vmem:[#allocation4 + $0x84] sm:$0xf] }
 0x10f   : > { %3146 = vmatpush.bf16.msra.mxu2 %v4221_v63  ;;  %v4122_v63 = vld [vmem:[#allocation4 + $0x88] sm:$0xf0] }
 0x110   : > { %3160 = vmatpush.bf16.msra.mxu3 %v4285_v4  ;;  %v5832_v4 = vld [vmem:[#allocation4 + $0x184] sm:$0xf]  ;;  %v4125_v18 = vor.u32 %v5800_v62, %v4122_v63  ;;  %v4482_v62 = vld [vmem:[#allocation4 + $0x358] sm:$0xf0]  ;;  %v5906_v63 = vld [vmem:[#allocation4 + $0x3d4] sm:$0xf] }
 0x111   : > { %3119 = vmatpush.bf16.msra.mxu0 %v4085_v12  ;;  %v4434_v12 = vld [vmem:[#allocation4 + $0x2f8] sm:$0xf0]  ;;  %v4253_v23 = vor.u32 %v5832_v4, %v4250_v5  ;;  %v5856_v5 = vld [vmem:[#allocation4 + $0x244] sm:$0xf] }
 0x112   : > { %3133 = vmatpush.bf16.msra.mxu1 %v4149_v13  ;;  %v5894_v13 = vld [vmem:[#allocation4 + $0x374] sm:$0xf]  ;;  %v4437_v25 = vor.u32 %v5878_v8, %v4434_v12  ;;  %v4549_v8 = vor.u32 %v5906_v63, %v4546_v0  ;;  %v4474_v12 = vld [vmem:[#allocation4 + $0x348] sm:$0xf0]  ;;  %v4386_v0 = vld [vmem:[#allocation4 + $0x298] sm:$0xf0] }
 0x113   : > { %3147 = vmatpush.bf16.msra.mxu2 %v4213_v16  ;;  %v4498_v16 = vld [vmem:[#allocation4 + $0x378] sm:$0xf0] }
 0x114   : > { %3161 = vmatpush.bf16.msra.mxu3 %v4277_v22  ;;  %v4562_v22 = vld [vmem:[#allocation4 + $0x3f8] sm:$0xf0]  ;;  %v4501_v26 = vor.u32 %v5894_v13, %v4498_v16  ;;  %v5904_v13 = vld [vmem:[#allocation4 + $0x3c4] sm:$0xf] }
 0x115   : > { %3120 = vmatpush.bf16.msra.mxu0 %v4077_v28  ;;  %v4362_v28 = vld [vmem:[#allocation4 + $0x268] sm:$0xf0] }
 0x116   : > { %3134 = vmatpush.bf16.msra.mxu1 %v4141_v29  ;;  %v5876_v29 = vld [vmem:[#allocation4 + $0x2e4] sm:$0xf]  ;;  %v4365_v48 = vor.u32 %v5860_v27, %v4362_v28  ;;  %v4530_v27 = vld [vmem:[#allocation4 + $0x3b8] sm:$0xf0] }
 0x117   : > { %3148 = vmatpush.bf16.msra.mxu2 %v4205_v30  ;;  %v4565_v30 = vor.u32 %v5910_v21, %v4562_v22  ;;  %v4429_v49 = vor.u32 %v5876_v29, %v4426_v33  ;;  %v5870_v21 = vld [vmem:[#allocation4 + $0x2b4] sm:$0xf]  ;;  %v5852_v33 = vld [vmem:[#allocation4 + $0x224] sm:$0xf] }
 0x118   : > { %3162 = vmatpush.bf16.msra.mxu3 %v4269_v42  ;;  %v5908_v42 = vld [vmem:[#allocation4 + $0x3e4] sm:$0xf] }
 0x119   : > { %3121 = vmatpush.bf16.msra.mxu0 %v4069_v53  ;;  %v4354_v53 = vld [vmem:[#allocation4 + $0x258] sm:$0xf0]  ;;  %v4557_v57 = vor.u32 %v5908_v42, %v4554_v45  ;;  %v4394_v45 = vld [vmem:[#allocation4 + $0x2a8] sm:$0xf0] }
 0x11a   : > { %3135 = vmatpush.bf16.msra.mxu1 %v4133_v59  ;;  %v4418_v59 = vld [vmem:[#allocation4 + $0x2d8] sm:$0xf0] }
 0x11b   : > { %3149 = vmatpush.bf16.msra.mxu2 %v4197_v61  ;;  %v5890_v61 = vld [vmem:[#allocation4 + $0x354] sm:$0xf]  ;;  %v4421_v3 = vor.u32 %v5874_v54, %v4418_v59  ;;  %v4397_v54 = vor.u32 %v5868_v37, %v4394_v45  ;;  %v5924_v45 = vld [vmem:[#allocation4 + $0x464] sm:$0xf] }
 0x11c   : > { %3163 = vmatpush.bf16.msra.mxu3 %v4261_v2  ;;  %v4357_v2 = vor.u32 %v5858_v52, %v4354_v53  ;;  %v4485_v4 = vor.u32 %v5890_v61, %v4482_v62  ;;  %v4522_v52 = vld [vmem:[#allocation4 + $0x3a8] sm:$0xf0]  ;;  %v4333_v53 = vor.u32 %v5852_v33, %v4330_v34  ;;  %v5850_v59 = vld [vmem:[#allocation4 + $0x214] sm:$0xf]  ;;  %v4322_v61 = vld [vmem:[#allocation4 + $0x218] sm:$0xf0] }
 0x11d   : > { %3122 = vmatpush.bf16.msra.mxu0 %v4061_v11  ;;  %v5888_v11 = vld [vmem:[#allocation4 + $0x344] sm:$0xf]  ;;  %v5866_v62 = vld [vmem:[#allocation4 + $0x294] sm:$0xf] }
 0x11e   : > { %3136 = vmatpush.bf16.msra.mxu1 %v4125_v18  ;;  %v5854_v18 = vld [vmem:[#allocation4 + $0x234] sm:$0xf] }
 0x11f   : > { %3150 = vmatpush.bf16.msra.mxu2 %v4189_v20  ;;  %v4338_v20 = vld [vmem:[#allocation4 + $0x238] sm:$0xf0] }
 0x120   : > { %3164 = vmatpush.bf16.msra.mxu3 %v4253_v23  ;;  %3123 = vmatmul.bf16.vlgmr.msra.gmra.mxu0 %v6784_v58  ;;  %v4410_v58 = vld [vmem:[#allocation4 + $0x2c8] sm:$0xf0]  ;;  %v4402_v23 = vld [vmem:[#allocation4 + $0x2b8] sm:$0xf0]  ;;  %v4341_v28 = vor.u32 %v5854_v18, %v4338_v20  ;;  %v5926_v20 = vld [vmem:[#allocation4 + $0x474] sm:$0xf] }
 0x121   : > { %3171 = vmatpush.bf16.msrb.mxu0 %v4373_v24  ;;  %3137 = vmatmul.bf16.vlgmr.msra.gmra.mxu1 %v6794_v10  ;;  %v4349_v10 = vor.u32 %v5856_v5, %v4346_v6  ;;  %v4413_v16 = vor.u32 %v5872_v7, %v4410_v58  ;;  %v5886_v24 = vld [vmem:[#allocation4 + $0x334] sm:$0xf]  ;;  %v4405_v29 = vor.u32 %v5870_v21, %v4402_v23  ;;  %v4514_v5 = vld [vmem:[#allocation4 + $0x398] sm:$0xf0]  ;;  %v5848_v7 = vld [vmem:[#allocation4 + $0x204] sm:$0xf] }
 0x122   : > { %3185 = vmatpush.bf16.msrb.mxu1 %v4437_v25  ;;  %3151 = vmatmul.bf16.vlgmr.msra.gmra.mxu2 %v6787_v1  ;;  %v4538_v1 = vld [vmem:[#allocation4 + $0x3c8] sm:$0xf0]  ;;  %v4466_v25 = vld [vmem:[#allocation4 + $0x338] sm:$0xf0]  ;;  %v4325_v6 = vor.u32 %v5850_v59, %v4322_v61  ;;  %v4389_v58 = vor.u32 %v5866_v62, %v4386_v0  ;;  %v5922_v0 = vld [vmem:[#allocation4 + $0x454] sm:$0xf] }
 0x123   : > { %3199 = vmatpush.bf16.msrb.mxu2 %v4501_v26  ;;  %3165 = vmatmul.bf16.vlgmr.msra.gmra.mxu3 %v6797_v17  ;;  %v4477_v17 = vor.u32 %v5888_v11, %v4474_v12  ;;  %v4541_v22 = vor.u32 %v5904_v13, %v4538_v1  ;;  %v5902_v26 = vld [vmem:[#allocation4 + $0x3b4] sm:$0xf]  ;;  %v5864_v12 = vld [vmem:[#allocation4 + $0x284] sm:$0xf]  ;;  %v4378_v13 = vld [vmem:[#allocation4 + $0x288] sm:$0xf0] }
 0x124   : > { %3213 = vmatpush.bf16.msrb.mxu3 %v4565_v30  ;;  %v4469_v30 = vor.u32 %v5886_v24, %v4466_v25  ;;  %v4533_v42 = vor.u32 %v5902_v26, %v4530_v27  ;;  %v5880_v1 = vld [vmem:[#allocation4 + $0x304] sm:$0xf]  ;;  %v4506_v18 = vld [vmem:[#allocation4 + $0x388] sm:$0xf0]  ;;  %v4626_v21 = vld [vmem:[#allocation4 + $0x478] sm:$0xf0]  ;;  %v4381_v27 = vor.u32 %v5864_v12, %v4378_v13 }
 0x125   : > { %3172 = vmatpush.bf16.msrb.mxu0 %v4365_v48  ;;  %v5884_v48 = vld [vmem:[#allocation4 + $0x324] sm:$0xf]  ;;  %v4690_v24 = vld [vmem:[#allocation4 + $0x4f8] sm:$0xf0]  ;;  %v5958_v25 = vld [vmem:[#allocation4 + $0x574] sm:$0xf]  ;;  %v4629_v34 = vor.u32 %v5926_v20, %v4626_v21 }
 0x126   : > { %3186 = vmatpush.bf16.msrb.mxu1 %v4429_v49  ;;  %v4458_v49 = vld [vmem:[#allocation4 + $0x328] sm:$0xf0]  ;;  %v4754_v26 = vld [vmem:[#allocation4 + $0x578] sm:$0xf0]  ;;  %v5968_v20 = vld [vmem:[#allocation4 + $0x5c4] sm:$0xf] }
 0x127   : > { %3200 = vmatpush.bf16.msrb.mxu2 %v4493_v50  ;;  %v5900_v50 = vld [vmem:[#allocation4 + $0x3a4] sm:$0xf]  ;;  %v4810_v59 = vld [vmem:[#allocation4 + $0x5e8] sm:$0xf0] }
 0x128   : > { %3214 = vmatpush.bf16.msrb.mxu3 %v4557_v57  ;;  %v4461_v57 = vor.u32 %v5884_v48, %v4458_v49  ;;  %v4525_v63 = vor.u32 %v5900_v50, %v4522_v52  ;;  %v4618_v48 = vld [vmem:[#allocation4 + $0x468] sm:$0xf0]  ;;  %v5940_v49 = vld [vmem:[#allocation4 + $0x4e4] sm:$0xf] }
 0x129   : > { %3173 = vmatpush.bf16.msrb.mxu0 %v4357_v2  ;;  %v5882_v2 = vld [vmem:[#allocation4 + $0x314] sm:$0xf]  ;;  %v4682_v52 = vld [vmem:[#allocation4 + $0x4e8] sm:$0xf0]  ;;  %v4621_v61 = vor.u32 %v5924_v45, %v4618_v48  ;;  %v5916_v45 = vld [vmem:[#allocation4 + $0x424] sm:$0xf] }
 0x12a   : > { %3187 = vmatpush.bf16.msrb.mxu1 %v4421_v3  ;;  %v4450_v3 = vld [vmem:[#allocation4 + $0x318] sm:$0xf0]  ;;  %v4685_v62 = vor.u32 %v5940_v49, %v4682_v52  ;;  %v4586_v48 = vld [vmem:[#allocation4 + $0x428] sm:$0xf0]  ;;  %v5932_v49 = vld [vmem:[#allocation4 + $0x4a4] sm:$0xf] }
 0x12b   : > { %3201 = vmatpush.bf16.msrb.mxu2 %v4485_v4  ;;  %v5898_v4 = vld [vmem:[#allocation4 + $0x394] sm:$0xf]  ;;  %v4453_v11 = vor.u32 %v5882_v2, %v4450_v3  ;;  %v4610_v2 = vld [vmem:[#allocation4 + $0x458] sm:$0xf0]  ;;  %v4650_v52 = vld [vmem:[#allocation4 + $0x4a8] sm:$0xf0] }
 0x12c   : > { %3215 = vmatpush.bf16.msrb.mxu3 %v4549_v8  ;;  %v4314_v8 = vld [vmem:[#allocation4 + $0x208] sm:$0xf0]  ;;  %v5938_v3 = vld [vmem:[#allocation4 + $0x4d4] sm:$0xf] }
 0x12d   : > { %3174 = vmatpush.bf16.msrb.mxu0 %v4349_v10  ;;  %v4517_v10 = vor.u32 %v5898_v4, %v4514_v5  ;;  %v4317_v23 = vor.u32 %v5848_v7, %v4314_v8  ;;  %v4674_v5 = vld [vmem:[#allocation4 + $0x4d8] sm:$0xf0]  ;;  %v5970_v8 = vld [vmem:[#allocation4 + $0x5d4] sm:$0xf] }
 0x12e   : > { %3188 = vmatpush.bf16.msrb.mxu1 %v4413_v16  ;;  %v4442_v16 = vld [vmem:[#allocation4 + $0x308] sm:$0xf0]  ;;  %v4738_v7 = vld [vmem:[#allocation4 + $0x558] sm:$0xf0]  ;;  %v4677_v12 = vor.u32 %v5938_v3, %v4674_v5  ;;  %v5930_v3 = vld [vmem:[#allocation4 + $0x494] sm:$0xf] }
 0x12f   : > { %3202 = vmatpush.bf16.msrb.mxu2 %v4477_v17  ;;  %v5896_v17 = vld [vmem:[#allocation4 + $0x384] sm:$0xf]  ;;  %v4642_v5 = vld [vmem:[#allocation4 + $0x498] sm:$0xf0] }
 0x130   : > { %3216 = vmatpush.bf16.msrb.mxu3 %v4541_v22  ;;  %v5942_v22 = vld [vmem:[#allocation4 + $0x4f4] sm:$0xf]  ;;  %v4509_v33 = vor.u32 %v5896_v17, %v4506_v18  ;;  %v4666_v17 = vld [vmem:[#allocation4 + $0x4c8] sm:$0xf0]  ;;  %v5952_v18 = vld [vmem:[#allocation4 + $0x544] sm:$0xf] }
 0x131   : > { %3175 = vmatpush.bf16.msrb.mxu0 %v4341_v28  ;;  %v4445_v28 = vor.u32 %v5880_v1, %v4442_v16  ;;  %v4693_v37 = vor.u32 %v5942_v22, %v4690_v24  ;;  %v5920_v1 = vld [vmem:[#allocation4 + $0x444] sm:$0xf]  ;;  %v4594_v24 = vld [vmem:[#allocation4 + $0x438] sm:$0xf0] }
 0x132   : > { %3189 = vmatpush.bf16.msrb.mxu1 %v4405_v29  ;;  %v5974_v29 = vld [vmem:[#allocation4 + $0x5f4] sm:$0xf] }
 0x133   : > { %3203 = vmatpush.bf16.msrb.mxu2 %v4469_v30  ;;  %v4818_v30 = vld [vmem:[#allocation4 + $0x5f8] sm:$0xf0] }
 0x134   : > { %3217 = vmatpush.bf16.msrb.mxu3 %v4533_v42  ;;  %v4757_v42 = vor.u32 %v5958_v25, %v4754_v26  ;;  %v4821_v50 = vor.u32 %v5974_v29, %v4818_v30  ;;  %v5934_v25 = vld [vmem:[#allocation4 + $0x4b4] sm:$0xf]  ;;  %v4722_v29 = vld [vmem:[#allocation4 + $0x538] sm:$0xf0] }
 0x135   : > { %3176 = vmatpush.bf16.msrb.mxu0 %v4333_v53  ;;  %v5956_v53 = vld [vmem:[#allocation4 + $0x564] sm:$0xf]  ;;  %v5966_v30 = vld [vmem:[#allocation4 + $0x5b4] sm:$0xf] }
 0x136   : > { %3190 = vmatpush.bf16.msrb.mxu1 %v4397_v54  ;;  %v4746_v54 = vld [vmem:[#allocation4 + $0x568] sm:$0xf0] }
 0x137   : > { %3204 = vmatpush.bf16.msrb.mxu2 %v4461_v57  ;;  %v5972_v57 = vld [vmem:[#allocation4 + $0x5e4] sm:$0xf] }
 0x138   : > { %3218 = vmatpush.bf16.msrb.mxu3 %v4525_v63  ;;  %v4749_v63 = vor.u32 %v5956_v53, %v4746_v54  ;;  %v4813_v4 = vor.u32 %v5972_v57, %v4810_v59  ;;  %v5948_v53 = vld [vmem:[#allocation4 + $0x524] sm:$0xf]  ;;  %v4714_v54 = vld [vmem:[#allocation4 + $0x528] sm:$0xf0] }
 0x139   : > { %3177 = vmatpush.bf16.msrb.mxu0 %v4325_v6  ;;  %v5954_v6 = vld [vmem:[#allocation4 + $0x554] sm:$0xf]  ;;  %v5964_v57 = vld [vmem:[#allocation4 + $0x5a4] sm:$0xf]  ;;  %v4778_v59 = vld [vmem:[#allocation4 + $0x5a8] sm:$0xf0] }
 0x13a   : > { %3191 = vmatpush.bf16.msrb.mxu1 %v4389_v58  ;;  %v4802_v58 = vld [vmem:[#allocation4 + $0x5d8] sm:$0xf0]  ;;  %v4741_v13 = vor.u32 %v5954_v6, %v4738_v7  ;;  %v5946_v6 = vld [vmem:[#allocation4 + $0x514] sm:$0xf] }
 0x13b   : > { %3205 = vmatpush.bf16.msrb.mxu2 %v4453_v11  ;;  %v4613_v11 = vor.u32 %v5922_v0, %v4610_v2  ;;  %v4805_v16 = vor.u32 %v5970_v8, %v4802_v58  ;;  %v5914_v0 = vld [vmem:[#allocation4 + $0x414] sm:$0xf]  ;;  %v4578_v2 = vld [vmem:[#allocation4 + $0x418] sm:$0xf0] }
 0x13c   : > { %3219 = vmatpush.bf16.msrb.mxu3 %v4517_v10  ;;  %v5936_v10 = vld [vmem:[#allocation4 + $0x4c4] sm:$0xf]  ;;  %v4706_v7 = vld [vmem:[#allocation4 + $0x518] sm:$0xf0]  ;;  %v5962_v8 = vld [vmem:[#allocation4 + $0x594] sm:$0xf] }
 0x13d   : > { %3178 = vmatpush.bf16.msrb.mxu0 %v4317_v23  ;;  %v5918_v23 = vld [vmem:[#allocation4 + $0x434] sm:$0xf]  ;;  %v4770_v58 = vld [vmem:[#allocation4 + $0x598] sm:$0xf0] }
 0x13e   : > { %3192 = vmatpush.bf16.msrb.mxu1 %v4381_v27  ;;  %v4658_v27 = vld [vmem:[#allocation4 + $0x4b8] sm:$0xf0] }
 0x13f   : > { %3206 = vmatpush.bf16.msrb.mxu2 %v4445_v28  ;;  %v5950_v28 = vld [vmem:[#allocation4 + $0x534] sm:$0xf] }
 0x140   : > { %3220 = vmatpush.bf16.msrb.mxu3 %v4509_v33  ;;  %3179 = vmatmul.bf16.vlgmr.msrb.gmra.mxu0 %v6809_v39  ;;  %v4602_v39 = vld [vmem:[#allocation4 + $0x448] sm:$0xf0]  ;;  %v4786_v33 = vld [vmem:[#allocation4 + $0x5b8] sm:$0xf0] }
 0x141   : > { %3227 = vmatpush.bf16.msra.mxu0 %v4629_v34  ;;  %3193 = vmatmul.bf16.vlgmr.msrb.gmra.mxu1 %v6813_v44  ;;  %v4794_v44 = vld [vmem:[#allocation4 + $0x5c8] sm:$0xf0]  ;;  %v4605_v21 = vor.u32 %v5920_v1, %v4602_v39  ;;  %v4597_v34 = vor.u32 %v5918_v23, %v4594_v24  ;;  %v4645_v1 = vor.u32 %v5930_v3, %v4642_v5  ;;  %v4946_v24 = vld [vmem:[#allocation4 + $0x6f8] sm:$0xf0]  ;;  %v5986_v3 = vld [vmem:[#allocation4 + $0x654] sm:$0xf] }
 0x142   : > { %3241 = vmatpush.bf16.msra.mxu1 %v4693_v37  ;;  %3207 = vmatmul.bf16.vlgmr.msrb.gmra.mxu2 %v6811_v43  ;;  %v4730_v43 = vld [vmem:[#allocation4 + $0x548] sm:$0xf0]  ;;  %v4797_v26 = vor.u32 %v5968_v20, %v4794_v44  ;;  %v4661_v37 = vor.u32 %v5934_v25, %v4658_v27  ;;  %v4709_v39 = vor.u32 %v5946_v6, %v4706_v7  ;;  %v5960_v20 = vld [vmem:[#allocation4 + $0x584] sm:$0xf]  ;;  %v6022_v25 = vld [vmem:[#allocation4 + $0x774] sm:$0xf]  ;;  %v6913_v6 = vpop.f32.mrf.mxu2 }
 0x143   : > { %3255 = vmatpush.bf16.msra.mxu2 %v4757_v42  ;;  %3221 = vmatmul.bf16.vlgmr.msrb.gmra.mxu3 %v6815_v47  ;;  %v4669_v47 = vor.u32 %v5936_v10, %v4666_v17  ;;  %v4733_v22 = vor.u32 %v5952_v18, %v4730_v43  ;;  %v4725_v42 = vor.u32 %v5950_v28, %v4722_v29  ;;  %v5928_v10 = vld [vmem:[#allocation4 + $0x484] sm:$0xf]  ;;  %v4698_v43 = vld [vmem:[#allocation4 + $0x508] sm:$0xf0]  ;;  %v6038_v29 = vld [vmem:[#allocation4 + $0x7f4] sm:$0xf] }
 0x144   : > { %3269 = vmatpush.bf16.msra.mxu3 %v4821_v50  ;;  %v4789_v50 = vor.u32 %v5966_v30, %v4786_v33  ;;  %v5944_v17 = vld [vmem:[#allocation4 + $0x504] sm:$0xf]  ;;  %v4773_v18 = vor.u32 %v5962_v8, %v4770_v58  ;;  %v4762_v44 = vld [vmem:[#allocation4 + $0x588] sm:$0xf0]  ;;  %v5074_v30 = vld [vmem:[#allocation4 + $0x7f8] sm:$0xf0]  ;;  %v6909_v33 = vpop.f32.mrf.mxu0 }
 0x145   : > { %3228 = vmatpush.bf16.msra.mxu0 %v4621_v61  ;;  %v4589_v61 = vor.u32 %v5916_v45, %v4586_v48  ;;  %v4701_v28 = vor.u32 %v5944_v17, %v4698_v43  ;;  %v5988_v48 = vld [vmem:[#allocation4 + $0x664] sm:$0xf]  ;;  %v6002_v5 = vld [vmem:[#allocation4 + $0x6d4] sm:$0xf]  ;;  %v4930_v8 = vld [vmem:[#allocation4 + $0x6d8] sm:$0xf0]  ;;  %v6921_v43 = vpop.f32.mrf.mxu3 }
 0x146   : > { %3242 = vmatpush.bf16.msra.mxu1 %v4685_v62  ;;  %v4653_v62 = vor.u32 %v5932_v49, %v4650_v52  ;;  %v4874_v49 = vld [vmem:[#allocation4 + $0x668] sm:$0xf0]  ;;  %v5077_v52 = vor.u32 %v6038_v29, %v5074_v30  ;;  %v6018_v58 = vld [vmem:[#allocation4 + $0x754] sm:$0xf]  ;;  %v6000_v17 = vld [vmem:[#allocation4 + $0x6c4] sm:$0xf] }
 0x147   : > { %3256 = vmatpush.bf16.msra.mxu2 %v4749_v63  ;;  %v4717_v63 = vor.u32 %v5948_v53, %v4714_v54  ;;  %v4938_v53 = vld [vmem:[#allocation4 + $0x6e8] sm:$0xf0]  ;;  %v6020_v54 = vld [vmem:[#allocation4 + $0x764] sm:$0xf]  ;;  %v4914_v29 = vld [vmem:[#allocation4 + $0x6b8] sm:$0xf0] }
 0x148   : > { %3270 = vmatpush.bf16.msra.mxu3 %v4813_v4  ;;  %v4781_v4 = vor.u32 %v5964_v57, %v4778_v59  ;;  %v5002_v57 = vld [vmem:[#allocation4 + $0x768] sm:$0xf0]  ;;  %v6036_v59 = vld [vmem:[#allocation4 + $0x7e4] sm:$0xf]  ;;  %v6014_v30 = vld [vmem:[#allocation4 + $0x734] sm:$0xf] }
 0x149   : > { %3229 = vmatpush.bf16.msra.mxu0 %v4613_v11  ;;  %v4581_v11 = vor.u32 %v5914_v0, %v4578_v2  ;;  %v5005_v2 = vor.u32 %v6020_v54, %v5002_v57  ;;  %v5996_v54 = vld [vmem:[#allocation4 + $0x6a4] sm:$0xf] }
 0x14a   : > { %3243 = vmatpush.bf16.msra.mxu1 %v4677_v12  ;;  %v5912_v12 = vld [vmem:[#allocation4 + $0x404] sm:$0xf] }
 0x14b   : > { %3257 = vmatpush.bf16.msra.mxu2 %v4741_v13  ;;  %v4570_v13 = vld [vmem:[#allocation4 + $0x408] sm:$0xf0] }
 0x14c   : > { %3271 = vmatpush.bf16.msra.mxu3 %v4805_v16  ;;  %v4634_v16 = vld [vmem:[#allocation4 + $0x488] sm:$0xf0]  ;;  %v4573_v23 = vor.u32 %v5912_v12, %v4570_v13  ;;  %v6034_v12 = vld [vmem:[#allocation4 + $0x7d4] sm:$0xf]  ;;  %v5058_v13 = vld [vmem:[#allocation4 + $0x7d8] sm:$0xf0] }
 0x14d   : > { %3230 = vmatpush.bf16.msra.mxu0 %v4605_v21  ;;  %v5990_v21 = vld [vmem:[#allocation4 + $0x674] sm:$0xf]  ;;  %v4637_v27 = vor.u32 %v5928_v10, %v4634_v16  ;;  %v5984_v16 = vld [vmem:[#allocation4 + $0x644] sm:$0xf] }
 0x14e   : > { %3244 = vmatpush.bf16.msra.mxu1 %v4669_v47  ;;  %v4882_v47 = vld [vmem:[#allocation4 + $0x678] sm:$0xf0] }
 0x14f   : > { %3258 = vmatpush.bf16.msra.mxu2 %v4733_v22  ;;  %v6006_v22 = vld [vmem:[#allocation4 + $0x6f4] sm:$0xf] }
 0x150   : > { %3272 = vmatpush.bf16.msra.mxu3 %v4797_v26  ;;  %v5010_v26 = vld [vmem:[#allocation4 + $0x778] sm:$0xf0] }
 0x151   : > { %3231 = vmatpush.bf16.msra.mxu0 %v4597_v34  ;;  %v4765_v34 = vor.u32 %v5960_v20, %v4762_v44  ;;  %v5013_v45 = vor.u32 %v6022_v25, %v5010_v26  ;;  %v6016_v20 = vld [vmem:[#allocation4 + $0x744] sm:$0xf]  ;;  %v4986_v44 = vld [vmem:[#allocation4 + $0x748] sm:$0xf0]  ;;  %v4850_v25 = vld [vmem:[#allocation4 + $0x638] sm:$0xf0] }
 0x152   : > { %3245 = vmatpush.bf16.msra.mxu1 %v4661_v37  ;;  %v4885_v37 = vor.u32 %v5990_v21, %v4882_v47  ;;  %v6032_v21 = vld [vmem:[#allocation4 + $0x7c4] sm:$0xf]  ;;  %v5998_v26 = vld [vmem:[#allocation4 + $0x6b4] sm:$0xf] }
 0x153   : > { %3259 = vmatpush.bf16.msra.mxu2 %v4725_v42  ;;  %v4949_v42 = vor.u32 %v6006_v22, %v4946_v24  ;;  %v5982_v24 = vld [vmem:[#allocation4 + $0x634] sm:$0xf] }
 0x154   : > { %3273 = vmatpush.bf16.msra.mxu3 %v4789_v50  ;;  %v6004_v50 = vld [vmem:[#allocation4 + $0x6e4] sm:$0xf] }
 0x155   : > { %3232 = vmatpush.bf16.msra.mxu0 %v4589_v61  ;;  %v5066_v61 = vld [vmem:[#allocation4 + $0x7e8] sm:$0xf0]  ;;  %v4941_v0 = vor.u32 %v6004_v50, %v4938_v53 }
 0x156   : > { %3246 = vmatpush.bf16.msra.mxu1 %v4653_v62  ;;  %v6911_v62 = vpop.f32.mrf.mxu1  ;;  %v5069_v7 = vor.u32 %v6036_v59, %v5066_v61  ;;  %v4842_v53 = vld [vmem:[#allocation4 + $0x628] sm:$0xf0]  ;;  %v6012_v61 = vld [vmem:[#allocation4 + $0x724] sm:$0xf] }
 0x157   : > { %3260 = vmatpush.bf16.msra.mxu2 %v4717_v63  ;;  %v4877_v63 = vor.u32 %v5988_v48, %v4874_v49  ;;  %v4853_v48 = vor.u32 %v5982_v24, %v4850_v25  ;;  %v4917_v49 = vor.u32 %v5998_v26, %v4914_v29  ;;  %v4906_v59 = vld [vmem:[#allocation4 + $0x6a8] sm:$0xf0]  ;;  %v6024_v26 = vld [vmem:[#allocation4 + $0x784] sm:$0xf]  ;;  %v6054_v29 = vld [vmem:[#allocation4 + $0x874] sm:$0xf] }
 0x158   : > { %3274 = vmatpush.bf16.msra.mxu3 %v4781_v4  ;;  %v4866_v4 = vld [vmem:[#allocation4 + $0x658] sm:$0xf0]  ;;  %v4954_v25 = vld [vmem:[#allocation4 + $0x708] sm:$0xf0] }
 0x159   : > { %3233 = vmatpush.bf16.msra.mxu0 %v4581_v11  ;;  %v4994_v11 = vld [vmem:[#allocation4 + $0x758] sm:$0xf0] }
 0x15a   : > { %3247 = vmatpush.bf16.msra.mxu1 %v4645_v1  ;;  %v4869_v1 = vor.u32 %v5986_v3, %v4866_v4  ;;  %v4997_v10 = vor.u32 %v6018_v58, %v4994_v11  ;;  %v6927_v3 = vpop.f32.mrf.mxu3  ;;  %v5978_v58 = vld [vmem:[#allocation4 + $0x614] sm:$0xf]  ;;  %v4834_v11 = vld [vmem:[#allocation4 + $0x618] sm:$0xf0] }
 0x15b   : > { %3261 = vmatpush.bf16.msra.mxu2 %v4709_v39  ;;  %v4933_v39 = vor.u32 %v6002_v5, %v4930_v8 }
 0x15c   : > { %3275 = vmatpush.bf16.msra.mxu3 %v4773_v18  ;;  %v6919_v18 = vpop.f32.mrf.mxu0 }
 0x15d   : > { %3234 = vmatpush.bf16.msra.mxu0 %v4573_v23  ;;  %v4989_v23 = vor.u32 %v6016_v20, %v4986_v44  ;;  %v4826_v20 = vld [vmem:[#allocation4 + $0x608] sm:$0xf0] }
 0x15e   : > { %3248 = vmatpush.bf16.msra.mxu1 %v4637_v27  ;;  %v6923_v27 = vpop.f32.mrf.mxu1 }
 0x15f   : > { %3262 = vmatpush.bf16.msra.mxu2 %v4701_v28 }
 0x160   : > { %3276 = vmatpush.bf16.msra.mxu3 %v4765_v34  ;;  %3235 = vmatmul.bf16.vlgmr.msra.gmra.mxu0 %v6829_v31  ;;  %v4858_v31 = vld [vmem:[#allocation4 + $0x648] sm:$0xf0]  ;;  %v4978_v34 = vld [vmem:[#allocation4 + $0x738] sm:$0xf0] }
 0x161   : > { %3283 = vmatpush.bf16.msrb.mxu0 %v4885_v37  ;;  %3249 = vmatmul.bf16.vlgmr.msra.gmra.mxu1 %v6833_v36  ;;  %v4922_v36 = vld [vmem:[#allocation4 + $0x6c8] sm:$0xf0]  ;;  %v4861_v47 = vor.u32 %v5984_v16, %v4858_v31  ;;  %v6030_v37 = vld [vmem:[#allocation4 + $0x7b4] sm:$0xf]  ;;  %v4981_v50 = vor.u32 %v6014_v30, %v4978_v34  ;;  %v5026_v31 = vld [vmem:[#allocation4 + $0x798] sm:$0xf0] }
 0x162   : > { %3297 = vmatpush.bf16.msrb.mxu1 %v4949_v42  ;;  %3263 = vmatmul.bf16.vlgmr.msra.gmra.mxu2 %v6831_v35  ;;  %v5061_v35 = vor.u32 %v6034_v12, %v5058_v13  ;;  %v4925_v22 = vor.u32 %v6000_v17, %v4922_v36  ;;  %v5042_v42 = vld [vmem:[#allocation4 + $0x7b8] sm:$0xf0]  ;;  %v5994_v12 = vld [vmem:[#allocation4 + $0x694] sm:$0xf]  ;;  %v5976_v36 = vld [vmem:[#allocation4 + $0x604] sm:$0xf] }
 0x163   : > { %3311 = vmatpush.bf16.msrb.mxu2 %v5013_v45  ;;  %3277 = vmatmul.bf16.vlgmr.msra.gmra.mxu3 %v6835_v40  ;;  %v5050_v40 = vld [vmem:[#allocation4 + $0x7c8] sm:$0xf0]  ;;  %v6925_v45 = vpop.f32.mrf.mxu2  ;;  %v5045_v57 = vor.u32 %v6030_v37, %v5042_v42  ;;  %v6026_v16 = vld [vmem:[#allocation4 + $0x794] sm:$0xf]  ;;  %v5138_v30 = vld [vmem:[#allocation4 + $0x878] sm:$0xf0]  ;;  %v4829_v37 = vor.u32 %v5976_v36, %v4826_v20 }
 0x164   : > { %3325 = vmatpush.bf16.msrb.mxu3 %v5077_v52  ;;  %v5053_v28 = vor.u32 %v6032_v21, %v5050_v40  ;;  %v5980_v52 = vld [vmem:[#allocation4 + $0x624] sm:$0xf]  ;;  %v6929_v4 = vpop.f32.mrf.mxu0  ;;  %v5029_v24 = vor.u32 %v6026_v16, %v5026_v31  ;;  %v6070_v34 = vld [vmem:[#allocation4 + $0x8f4] sm:$0xf]  ;;  %v5202_v42 = vld [vmem:[#allocation4 + $0x8f8] sm:$0xf0] }
 0x165   : > { %3284 = vmatpush.bf16.msrb.mxu0 %v4877_v63  ;;  %v4970_v63 = vld [vmem:[#allocation4 + $0x728] sm:$0xf0]  ;;  %v4845_v5 = vor.u32 %v5980_v52, %v4842_v53  ;;  %v5992_v40 = vld [vmem:[#allocation4 + $0x684] sm:$0xf]  ;;  %v6102_v53 = vld [vmem:[#allocation4 + $0x9f4] sm:$0xf] }
 0x166   : > { %3298 = vmatpush.bf16.msrb.mxu1 %v4941_v0  ;;  %v6028_v0 = vld [vmem:[#allocation4 + $0x7a4] sm:$0xf]  ;;  %v4973_v8 = vor.u32 %v6012_v61, %v4970_v63  ;;  %v6931_v17 = vpop.f32.mrf.mxu1  ;;  %v6939_v61 = vpop.f32.mrf.mxu3 }
 0x167   : > { %3312 = vmatpush.bf16.msrb.mxu2 %v5005_v2  ;;  %v5034_v2 = vld [vmem:[#allocation4 + $0x7a8] sm:$0xf0] }
 0x168   : > { %3326 = vmatpush.bf16.msrb.mxu3 %v5069_v7  ;;  %v4909_v7 = vor.u32 %v5996_v54, %v4906_v59  ;;  %v5037_v13 = vor.u32 %v6028_v0, %v5034_v2  ;;  %v5330_v54 = vld [vmem:[#allocation4 + $0x9f8] sm:$0xf0]  ;;  %v5141_v0 = vor.u32 %v6054_v29, %v5138_v30  ;;  %v5205_v2 = vor.u32 %v6070_v34, %v5202_v42  ;;  %v6048_v42 = vld [vmem:[#allocation4 + $0x844] sm:$0xf] }
 0x169   : > { %3285 = vmatpush.bf16.msrb.mxu0 %v4869_v1  ;;  %v4898_v1 = vld [vmem:[#allocation4 + $0x698] sm:$0xf0] }
 0x16a   : > { %3299 = vmatpush.bf16.msrb.mxu1 %v4933_v39  ;;  %v6010_v39 = vld [vmem:[#allocation4 + $0x714] sm:$0xf]  ;;  %v4901_v44 = vor.u32 %v5994_v12, %v4898_v1  ;;  %v5194_v12 = vld [vmem:[#allocation4 + $0x8e8] sm:$0xf0]  ;;  %v5314_v29 = vld [vmem:[#allocation4 + $0x9d8] sm:$0xf0] }
 0x16b   : > { %3313 = vmatpush.bf16.msrb.mxu2 %v4997_v10  ;;  %v4962_v10 = vld [vmem:[#allocation4 + $0x718] sm:$0xf0]  ;;  %v5258_v1 = vld [vmem:[#allocation4 + $0x968] sm:$0xf0] }
 0x16c   : > { %3327 = vmatpush.bf16.msrb.mxu3 %v5061_v35  ;;  %v4837_v35 = vor.u32 %v5978_v58, %v4834_v11  ;;  %v4965_v21 = vor.u32 %v6010_v39, %v4962_v10  ;;  %v6937_v59 = vpop.f32.mrf.mxu0  ;;  %v6068_v58 = vld [vmem:[#allocation4 + $0x8e4] sm:$0xf]  ;;  %v5333_v11 = vor.u32 %v6102_v53, %v5330_v54  ;;  %v5322_v10 = vld [vmem:[#allocation4 + $0x9e8] sm:$0xf0] }
 0x16d   : > { %3286 = vmatpush.bf16.msrb.mxu0 %v4861_v47  ;;  %v4890_v47 = vld [vmem:[#allocation4 + $0x688] sm:$0xf0]  ;;  %v6100_v39 = vld [vmem:[#allocation4 + $0x9e4] sm:$0xf]  ;;  %v5197_v36 = vor.u32 %v6068_v58, %v5194_v12  ;;  %v5106_v58 = vld [vmem:[#allocation4 + $0x838] sm:$0xf0] }
 0x16e   : > { %3300 = vmatpush.bf16.msrb.mxu1 %v4925_v22  ;;  %v6008_v22 = vld [vmem:[#allocation4 + $0x704] sm:$0xf]  ;;  %v6942_v31 = vpop.f32.mrf.mxu1  ;;  %v5242_v54 = vld [vmem:[#allocation4 + $0x948] sm:$0xf0] }
 0x16f   : > { %3314 = vmatpush.bf16.msrb.mxu2 %v4989_v23  ;;  %v6933_v23 = vpop.f32.mrf.mxu2  ;;  %v4957_v52 = vor.u32 %v6008_v22, %v4954_v25  ;;  %v5325_v22 = vor.u32 %v6100_v39, %v5322_v10  ;;  %v6082_v25 = vld [vmem:[#allocation4 + $0x954] sm:$0xf]  ;;  %v6080_v53 = vld [vmem:[#allocation4 + $0x944] sm:$0xf]  ;;  %v5234_v10 = vld [vmem:[#allocation4 + $0x938] sm:$0xf0] }
 0x170   : > { %3328 = vmatpush.bf16.msrb.mxu3 %v5053_v28  ;;  %v5018_v28 = vld [vmem:[#allocation4 + $0x788] sm:$0xf0]  ;;  %v6078_v39 = vld [vmem:[#allocation4 + $0x934] sm:$0xf] }
 0x171   : > { %3287 = vmatpush.bf16.msrb.mxu0 %v4853_v48  ;;  %v6086_v48 = vld [vmem:[#allocation4 + $0x974] sm:$0xf]  ;;  %v5021_v63 = vor.u32 %v6024_v26, %v5018_v28  ;;  %v5250_v26 = vld [vmem:[#allocation4 + $0x958] sm:$0xf0] }
 0x172   : > { %3301 = vmatpush.bf16.msrb.mxu1 %v4917_v49  ;;  %v5266_v49 = vld [vmem:[#allocation4 + $0x978] sm:$0xf0]  ;;  %v6098_v28 = vld [vmem:[#allocation4 + $0x9d4] sm:$0xf] }
 0x173   : > { %3315 = vmatpush.bf16.msrb.mxu2 %v4981_v50  ;;  %v4893_v50 = vor.u32 %v5992_v40, %v4890_v47  ;;  %v6066_v40 = vld [vmem:[#allocation4 + $0x8d4] sm:$0xf] }
 0x174   : > { %3329 = vmatpush.bf16.msrb.mxu3 %v5045_v57  ;;  %v6935_v57 = vld [vmem:[#allocation6] sm:$0x3]  ;;  %v6949_v30 = vpop.f32.mrf.mxu0 }
 0x175   : > { %3288 = vmatpush.bf16.msrb.mxu0 %v4845_v5  ;;  %v5269_v5 = vor.u32 %v6086_v48, %v5266_v49  ;;  %v855_v16 = vperm.slane %v6935_v57, 0  ;;  %v5114_v48 = vld [vmem:[#allocation4 + $0x848] sm:$0xf0]  ;;  %v6064_v49 = vld [vmem:[#allocation4 + $0x8c4] sm:$0xf] }
 0x176   : > { %3302 = vmatpush.bf16.msrb.mxu1 %v4909_v7  ;;  %v6052_v7 = vld [vmem:[#allocation4 + $0x864] sm:$0xf] }
 0x177   : > { %3316 = vmatpush.bf16.msrb.mxu2 %v4973_v8  ;;  %v5130_v8 = vld [vmem:[#allocation4 + $0x868] sm:$0xf0]  ;;  %v6944_v47 = vpop.f32.mrf.mxu2 }
 0x178   : > { %3330 = vmatpush.bf16.msrb.mxu3 %v5037_v13  ;;  %v6084_v13 = vld [vmem:[#allocation4 + $0x964] sm:$0xf] }
 0x179   : > { %3289 = vmatpush.bf16.msrb.mxu0 %v4837_v35  ;;  %v5133_v35 = vor.u32 %v6052_v7, %v5130_v8  ;;  %v5261_v20 = vor.u32 %v6084_v13, %v5258_v1  ;;  %v5245_v8 = vor.u32 %v6080_v53, %v5242_v54 }
 0x17a   : > { %3303 = vmatpush.bf16.msrb.mxu1 %v4901_v44  ;;  %v6050_v44 = vld [vmem:[#allocation4 + $0x854] sm:$0xf] }
 0x17b   : > { %3317 = vmatpush.bf16.msrb.mxu2 %v4965_v21  ;;  %v5122_v21 = vld [vmem:[#allocation4 + $0x858] sm:$0xf0] }
 0x17c   : > { %3331 = vmatpush.bf16.msrb.mxu3 %v5029_v24  ;;  %v5186_v24 = vld [vmem:[#allocation4 + $0x8d8] sm:$0xf0]  ;;  %v5125_v34 = vor.u32 %v6050_v44, %v5122_v21  ;;  %v5237_v21 = vor.u32 %v6078_v39, %v5234_v10  ;;  %v5146_v39 = vld [vmem:[#allocation4 + $0x888] sm:$0xf0]  ;;  %v6072_v10 = vld [vmem:[#allocation4 + $0x904] sm:$0xf] }
 0x17d   : > { %3290 = vmatpush.bf16.msrb.mxu0 %v4829_v37  ;;  %v5189_v37 = vor.u32 %v6066_v40, %v5186_v24  ;;  %v6044_v40 = vld [vmem:[#allocation4 + $0x824] sm:$0xf] }
 0x17e   : > { %3304 = vmatpush.bf16.msrb.mxu1 %v4893_v50  ;;  %v2789_v50 = vadd.f32 %v6909_v33, %v855_v16  ;;  %v6046_v33 = vld [vmem:[#allocation4 + $0x834] sm:$0xf] }
 0x17f   : > { %3318 = vmatpush.bf16.msrb.mxu2 %v4957_v52  ;;  %v5178_v52 = vld [vmem:[#allocation4 + $0x8c8] sm:$0xf0]  ;;  %v6959_v13 = vpop.f32.mrf.mxu2 }
 0x180   : > { %3332 = vmatpush.bf16.msrb.mxu3 %v5021_v63  ;;  %3291 = vmatmul.bf16.vlgmr.msrb.gmra.mxu0 %v6849_v32  ;;  %v5253_v32 = vor.u32 %v6082_v25, %v5250_v26  ;;  %v6096_v63 = vld [vmem:[#allocation4 + $0x9c4] sm:$0xf]  ;;  %v5181_v7 = vor.u32 %v6064_v49, %v5178_v52  ;;  %v2803_v12 = vadd.f32 %v6911_v62, %v2789_v50  ;;  %v6963_v25 = vpop.f32.mrf.mxu0  ;;  %v6058_v52 = vld [vmem:[#allocation4 + $0x894] sm:$0xf] }
 0x181   : > { %3339 = vmatpush.bf16.msra.mxu0 %v5141_v0  ;;  %3305 = vmatmul.bf16.vlgmr.msrb.gmra.mxu1 %v6853_v41  ;;  %v5317_v41 = vor.u32 %v6098_v28, %v5314_v29  ;;  %v5306_v0 = vld [vmem:[#allocation4 + $0x9c8] sm:$0xf0]  ;;  %v6060_v62 = vld [vmem:[#allocation4 + $0x8a4] sm:$0xf] }
 0x182   : > { %3353 = vmatpush.bf16.msra.mxu1 %v5205_v2  ;;  %3319 = vmatmul.bf16.vlgmr.msrb.gmra.mxu2 %v6851_v38  ;;  %v6953_v38 = vpop.f32.mrf.mxu3  ;;  %v6956_v2 = vpop.f32.mrf.mxu1  ;;  %v5309_v1 = vor.u32 %v6096_v63, %v5306_v0  ;;  %v2817_v24 = vadd.f32 %v6913_v6, %v2803_v12  ;;  %v6076_v29 = vld [vmem:[#allocation4 + $0x924] sm:$0xf]  ;;  %v6042_v6 = vld [vmem:[#allocation4 + $0x814] sm:$0xf]  ;;  %v5154_v63 = vld [vmem:[#allocation4 + $0x898] sm:$0xf0] }
 0x183   : > { %3367 = vmatpush.bf16.msra.mxu2 %v5269_v5  ;;  %3333 = vmatmul.bf16.vlgmr.msrb.gmra.mxu3 %v6855_v46  ;;  %v2791_v46 = vadd.f32 %v6919_v18, %v855_v16  ;;  %v5117_v5 = vor.u32 %v6048_v42, %v5114_v48  ;;  %v5170_v18 = vld [vmem:[#allocation4 + $0x8b8] sm:$0xf0]  ;;  %v5290_v42 = vld [vmem:[#allocation4 + $0x9a8] sm:$0xf0]  ;;  %v6074_v0 = vld [vmem:[#allocation4 + $0x914] sm:$0xf] }
 0x184   : > { %3381 = vmatpush.bf16.msra.mxu3 %v5333_v11  ;;  %v6062_v11 = vld [vmem:[#allocation4 + $0x8b4] sm:$0xf]  ;;  %v2831_v53 = vadd.f32 %v6921_v43, %v2817_v24  ;;  %v5082_v12 = vld [vmem:[#allocation4 + $0x808] sm:$0xf0]  ;;  %v5157_v43 = vor.u32 %v6058_v52, %v5154_v63  ;;  %v6132_v63 = vld [vmem:[#allocation4 + $0xae4] sm:$0xf] }
 0x185   : > { %3340 = vmatpush.bf16.msra.mxu0 %v5133_v35  ;;  %v2805_v16 = vadd.f32 %v6923_v27, %v2791_v46  ;;  %v6094_v35 = vld [vmem:[#allocation4 + $0x9b4] sm:$0xf]  ;;  %v5173_v44 = vor.u32 %v6062_v11, %v5170_v18  ;;  %v5162_v27 = vld [vmem:[#allocation4 + $0x8a8] sm:$0xf0]  ;;  %v6040_v11 = vld [vmem:[#allocation4 + $0x804] sm:$0xf] }
 0x186   : > { %3354 = vmatpush.bf16.msra.mxu1 %v5197_v36  ;;  %v5298_v36 = vld [vmem:[#allocation4 + $0x9b8] sm:$0xf0]  ;;  %v5165_v49 = vor.u32 %v6060_v62, %v5162_v27  ;;  %v6056_v18 = vld [vmem:[#allocation4 + $0x884] sm:$0xf]  ;;  %v6134_v62 = vld [vmem:[#allocation4 + $0xaf4] sm:$0xf] }
 0x187   : > { %3368 = vmatpush.bf16.msra.mxu2 %v5261_v20  ;;  %v5109_v20 = vor.u32 %v6046_v33, %v5106_v58  ;;  %v5301_v28 = vor.u32 %v6094_v35, %v5298_v36  ;;  %v6972_v33 = vpop.f32.mrf.mxu2  ;;  %v5210_v36 = vld [vmem:[#allocation4 + $0x908] sm:$0xf0]  ;;  %v5458_v27 = vld [vmem:[#allocation4 + $0xaf8] sm:$0xf0] }
 0x188   : > { %3382 = vmatpush.bf16.msra.mxu3 %v5325_v22  ;;  %v5098_v22 = vld [vmem:[#allocation4 + $0x828] sm:$0xf0]  ;;  %v6975_v35 = vpop.f32.mrf.mxu0 }
 0x189   : > { %3341 = vmatpush.bf16.msra.mxu0 %v5125_v34  ;;  %v5226_v34 = vld [vmem:[#allocation4 + $0x928] sm:$0xf0]  ;;  %v5101_v48 = vor.u32 %v6044_v40, %v5098_v22  ;;  %v6118_v40 = vld [vmem:[#allocation4 + $0xa74] sm:$0xf]  ;;  %v5394_v22 = vld [vmem:[#allocation4 + $0xa78] sm:$0xf0] }
 0x18a   : > { %3355 = vmatpush.bf16.msra.mxu1 %v5189_v37  ;;  %v6965_v26 = vpop.f32.mrf.mxu3  ;;  %v2819_v37 = vadd.f32 %v6925_v45, %v2805_v16  ;;  %v5229_v50 = vor.u32 %v6076_v29, %v5226_v34  ;;  %v6969_v54 = vpop.f32.mrf.mxu1  ;;  %v5218_v45 = vld [vmem:[#allocation4 + $0x918] sm:$0xf0]  ;;  %v2845_v16 = vadd.f32 %v6929_v4, %v2831_v53  ;;  %v6150_v29 = vld [vmem:[#allocation4 + $0xb74] sm:$0xf]  ;;  %v5149_v4 = vor.u32 %v6056_v18, %v5146_v39  ;;  %v6116_v53 = vld [vmem:[#allocation4 + $0xa64] sm:$0xf] }
 0x18b   : > { %3369 = vmatpush.bf16.msra.mxu2 %v5253_v32  ;;  %v6092_v32 = vld [vmem:[#allocation4 + $0x9a4] sm:$0xf]  ;;  %v5522_v34 = vld [vmem:[#allocation4 + $0xb78] sm:$0xf0]  ;;  %v6114_v18 = vld [vmem:[#allocation4 + $0xa54] sm:$0xf] }
 0x18c   : > { %3383 = vmatpush.bf16.msra.mxu3 %v5317_v41  ;;  %v5090_v41 = vld [vmem:[#allocation4 + $0x818] sm:$0xf0]  ;;  %v5293_v46 = vor.u32 %v6092_v32, %v5290_v42  ;;  %v6166_v32 = vld [vmem:[#allocation4 + $0xbf4] sm:$0xf]  ;;  %v5525_v52 = vor.u32 %v6150_v29, %v5522_v34  ;;  %v6112_v29 = vld [vmem:[#allocation4 + $0xa44] sm:$0xf] }
 0x18d   : > { %3342 = vmatpush.bf16.msra.mxu0 %v5117_v5  ;;  %v2833_v5 = vadd.f32 %v6927_v3, %v2819_v37  ;;  %v5093_v58 = vor.u32 %v6042_v6, %v5090_v41  ;;  %v5213_v37 = vor.u32 %v6072_v10, %v5210_v36  ;;  %v5586_v42 = vld [vmem:[#allocation4 + $0xbf8] sm:$0xf0]  ;;  %v5461_v41 = vor.u32 %v6134_v62, %v5458_v27  ;;  %v6130_v10 = vld [vmem:[#allocation4 + $0xad4] sm:$0xf]  ;;  %v6128_v34 = vld [vmem:[#allocation4 + $0xac4] sm:$0xf] }
 0x18e   : > { %3356 = vmatpush.bf16.msra.mxu1 %v5181_v7  ;;  %v6090_v7 = vld [vmem:[#allocation4 + $0x994] sm:$0xf]  ;;  %v5378_v39 = vld [vmem:[#allocation4 + $0xa58] sm:$0xf0] }
 0x18f   : > { %3370 = vmatpush.bf16.msra.mxu2 %v5245_v8  ;;  %v5282_v8 = vld [vmem:[#allocation4 + $0x998] sm:$0xf0]  ;;  %v5381_v62 = vor.u32 %v6114_v18, %v5378_v39  ;;  %v6124_v18 = vld [vmem:[#allocation4 + $0xaa4] sm:$0xf] }
 0x190   : > { %3384 = vmatpush.bf16.msra.mxu3 %v5309_v1  ;;  %v5221_v1 = vor.u32 %v6074_v0, %v5218_v45  ;;  %v5285_v3 = vor.u32 %v6090_v7, %v5282_v8  ;;  %v6984_v0 = vpop.f32.mrf.mxu2  ;;  %v5589_v45 = vor.u32 %v6166_v32, %v5586_v42  ;;  %v6148_v7 = vld [vmem:[#allocation4 + $0xb64] sm:$0xf]  ;;  %v5514_v8 = vld [vmem:[#allocation4 + $0xb68] sm:$0xf0]  ;;  %v5442_v36 = vld [vmem:[#allocation4 + $0xad8] sm:$0xf0] }
 0x191   : > { %3343 = vmatpush.bf16.msra.mxu0 %v5109_v20  ;;  %v6088_v20 = vld [vmem:[#allocation4 + $0x984] sm:$0xf]  ;;  %v5562_v42 = vld [vmem:[#allocation4 + $0xbc8] sm:$0xf0] }
 0x192   : > { %3357 = vmatpush.bf16.msra.mxu1 %v5173_v44  ;;  %v5274_v44 = vld [vmem:[#allocation4 + $0x988] sm:$0xf0]  ;;  %v6978_v24 = vpop.f32.mrf.mxu3  ;;  %v6160_v32 = vld [vmem:[#allocation4 + $0xbc4] sm:$0xf] }
 0x193   : > { %3371 = vmatpush.bf16.msra.mxu2 %v5237_v21  ;;  %v2847_v21 = vadd.f32 %v6937_v59, %v2833_v5  ;;  %v5277_v59 = vor.u32 %v6088_v20, %v5274_v44  ;;  %v5450_v5 = vld [vmem:[#allocation4 + $0xae8] sm:$0xf0]  ;;  %v5506_v20 = vld [vmem:[#allocation4 + $0xb58] sm:$0xf0] }
 0x194   : > { %3385 = vmatpush.bf16.msra.mxu3 %v5301_v28  ;;  %v5085_v28 = vor.u32 %v6040_v11, %v5082_v12  ;;  %v5578_v11 = vld [vmem:[#allocation4 + $0xbe8] sm:$0xf0] }
 0x195   : > { %3344 = vmatpush.bf16.msra.mxu0 %v5101_v48  ;;  %v2859_v48 = vadd.f32 %v6931_v17, %v2845_v16  ;;  %v2861_v6 = vadd.f32 %v6942_v31, %v2847_v21  ;;  %v6988_v16 = vpop.f32.mrf.mxu0  ;;  %v6162_v21 = vld [vmem:[#allocation4 + $0xbd4] sm:$0xf] }
 0x196   : > { %3358 = vmatpush.bf16.msra.mxu1 %v5165_v49  ;;  %v6981_v49 = vpop.f32.mrf.mxu1 }
 0x197   : > { %3372 = vmatpush.bf16.msra.mxu2 %v5229_v50  ;;  %v5397_v50 = vor.u32 %v6118_v40, %v5394_v22  ;;  %v2875_v17 = vadd.f32 %v6944_v47, %v2861_v6  ;;  %v2873_v31 = vadd.f32 %v6933_v23, %v2859_v48  ;;  %v6146_v23 = vld [vmem:[#allocation4 + $0xb54] sm:$0xf]  ;;  %v5570_v40 = vld [vmem:[#allocation4 + $0xbd8] sm:$0xf0] }
 0x198   : > { %3386 = vmatpush.bf16.msra.mxu3 %v5293_v46  ;;  %v5386_v46 = vld [vmem:[#allocation4 + $0xa68] sm:$0xf0]  ;;  %v5509_v27 = vor.u32 %v6146_v23, %v5506_v20  ;;  %v7002_v48 = vpop.f32.mrf.mxu2  ;;  %v6156_v23 = vld [vmem:[#allocation4 + $0xba4] sm:$0xf] }
 0x199   : > { %3345 = vmatpush.bf16.msra.mxu0 %v5093_v58  ;;  %v6164_v58 = vld [vmem:[#allocation4 + $0xbe4] sm:$0xf]  ;;  %v5389_v12 = vor.u32 %v6116_v53, %v5386_v46  ;;  %v2889_v44 = vadd.f32 %v6953_v38, %v2875_v17  ;;  %v2887_v22 = vadd.f32 %v6939_v61, %v2873_v31  ;;  %v5370_v38 = vld [vmem:[#allocation4 + $0xa48] sm:$0xf0]  ;;  %v6158_v17 = vld [vmem:[#allocation4 + $0xbb4] sm:$0xf] }
 0x19a   : > { %3359 = vmatpush.bf16.msra.mxu1 %v5157_v43  ;;  %v5453_v43 = vor.u32 %v6132_v63, %v5450_v5  ;;  %v5581_v47 = vor.u32 %v6164_v58, %v5578_v11  ;;  %v5434_v61 = vld [vmem:[#allocation4 + $0xac8] sm:$0xf0]  ;;  %v5565_v63 = vor.u32 %v6160_v32, %v5562_v42  ;;  %v6142_v5 = vld [vmem:[#allocation4 + $0xb34] sm:$0xf]  ;;  %v6104_v32 = vld [vmem:[#allocation4 + $0xa04] sm:$0xf] }
 0x19b   : > { %3373 = vmatpush.bf16.msra.mxu2 %v5221_v1  ;;  %v5517_v1 = vor.u32 %v6148_v7, %v5514_v8  ;;  %v5490_v7 = vld [vmem:[#allocation4 + $0xb38] sm:$0xf0]  ;;  %v5546_v20 = vld [vmem:[#allocation4 + $0xba8] sm:$0xf0] }
 0x19c   : > { %3387 = vmatpush.bf16.msra.mxu3 %v5285_v3  ;;  %v6990_v3 = vpop.f32.mrf.mxu3 }
 0x19d   : > { %3346 = vmatpush.bf16.msra.mxu0 %v5085_v28  ;;  %v5445_v28 = vor.u32 %v6130_v10, %v5442_v36  ;;  %v7006_v46 = vpop.f32.mrf.mxu0  ;;  %v5482_v36 = vld [vmem:[#allocation4 + $0xb28] sm:$0xf0] }
 0x19e   : > { %3360 = vmatpush.bf16.msra.mxu1 %v5149_v4  ;;  %v5573_v4 = vor.u32 %v6162_v21, %v5570_v40 }
 0x19f   : > { %3374 = vmatpush.bf16.msra.mxu2 %v5213_v37  ;;  %v6144_v37 = vld [vmem:[#allocation4 + $0xb44] sm:$0xf] }
 0x1a0   : > { %3388 = vmatpush.bf16.msra.mxu3 %v5277_v59  ;;  %3347 = vmatmul.bf16.vlgmr.msra.gmra.mxu0 %v6869_v51  ;;  %v2903_v51 = vadd.f32 %v6963_v25, %v2889_v44  ;;  %v5373_v25 = vor.u32 %v6112_v29, %v5370_v38  ;;  %v7016_v21 = vpop.f32.mrf.mxu2  ;;  %v6122_v29 = vld [vmem:[#allocation4 + $0xa94] sm:$0xf]  ;;  %v5549_v38 = vor.u32 %v6156_v23, %v5546_v20 }
 0x1a1   : > { %3395 = vmatpush.bf16.msrb.mxu0 %v5397_v50  ;;  %3361 = vmatmul.bf16.vlgmr.msra.gmra.mxu1 %v6873_v56  ;;  %v7000_v56 = vpop.f32.mrf.mxu1  ;;  %v5437_v50 = vor.u32 %v6128_v34, %v5434_v61  ;;  %v6138_v34 = vld [vmem:[#allocation4 + $0xb14] sm:$0xf]  ;;  %v5538_v61 = vld [vmem:[#allocation4 + $0xb98] sm:$0xf0] }
 0x1a2   : > { %3409 = vmatpush.bf16.msrb.mxu1 %v5461_v41  ;;  %3375 = vmatmul.bf16.vlgmr.msra.gmra.mxu2 %v6871_v55  ;;  %v2901_v55 = vadd.f32 %v6949_v30, %v2887_v22  ;;  %v2917_v59 = vadd.f32 %v6969_v54, %v2903_v51  ;;  %v6110_v30 = vld [vmem:[#allocation4 + $0xa34] sm:$0xf]  ;;  %v5362_v41 = vld [vmem:[#allocation4 + $0xa38] sm:$0xf0] }
 0x1a3   : > { %3423 = vmatpush.bf16.msrb.mxu2 %v5525_v52  ;;  %3389 = vmatmul.bf16.vlgmr.msra.gmra.mxu3 %v6875_v60  ;;  %v5498_v60 = vld [vmem:[#allocation4 + $0xb48] sm:$0xf0]  ;;  %v6126_v52 = vld [vmem:[#allocation4 + $0xab4] sm:$0xf]  ;;  %v5554_v54 = vld [vmem:[#allocation4 + $0xbb8] sm:$0xf0]  ;;  %v5365_v31 = vor.u32 %v6110_v30, %v5362_v41 }
 0x1a4   : > { %3437 = vmatpush.bf16.msrb.mxu3 %v5589_v45  ;;  %v5501_v6 = vor.u32 %v6144_v37, %v5498_v60  ;;  %v2915_v53 = vadd.f32 %v6956_v2, %v2901_v55  ;;  %v5426_v45 = vld [vmem:[#allocation4 + $0xab8] sm:$0xf0]  ;;  %v2931_v8 = vadd.f32 %v6972_v33, %v2917_v59  ;;  %v7010_v11 = vpop.f32.mrf.mxu3  ;;  %v5557_v10 = vor.u32 %v6158_v17, %v5554_v54  ;;  %v5418_v33 = vld [vmem:[#allocation4 + $0xaa8] sm:$0xf0]  ;;  %v6182_v54 = vld [vmem:[#allocation7 + $0x74] sm:$0xf] }
 0x1a5   : > { %3396 = vmatpush.bf16.msrb.mxu0 %v5389_v12  ;;  %v5429_v2 = vor.u32 %v6126_v52, %v5426_v45  ;;  %v5493_v12 = vor.u32 %v6142_v5, %v5490_v7  ;;  %v5474_v55 = vld [vmem:[#allocation4 + $0xb18] sm:$0xf0]  ;;  %v3014_v37 = vpop.f32.mrf.mxu0  ;;  %v5402_v30 = vld [vmem:[#allocation4 + $0xa88] sm:$0xf0]  ;;  %v5648_v7 = vld [vmem:[#allocation7 + $0x70] sm:$0xf] }
 0x1a6   : > { %3410 = vmatpush.bf16.msrb.mxu1 %v5453_v43  ;;  %v2929_v58 = vadd.f32 %v6959_v13, %v2915_v53  ;;  %v6108_v43 = vld [vmem:[#allocation4 + $0xa24] sm:$0xf]  ;;  %v2945_v13 = vadd.f32 %v6978_v24, %v2931_v8  ;;  %v5410_v24 = vld [vmem:[#allocation4 + $0xa98] sm:$0xf0]  ;;  %v5477_v59 = vor.u32 %v6138_v34, %v5474_v55  ;;  %v5466_v52 = vld [vmem:[#allocation4 + $0xb08] sm:$0xf0] }
 0x1a7   : > { %3424 = vmatpush.bf16.msrb.mxu2 %v5517_v1  ;;  %v5354_v1 = vld [vmem:[#allocation4 + $0xa28] sm:$0xf0]  ;;  %v6152_v53 = vld [vmem:[#allocation4 + $0xb84] sm:$0xf]  ;;  %v6183_v8 = vld [vmem:[#allocation7 + $0x74] sm:$0xf0] }
 0x1a8   : > { %3438 = vmatpush.bf16.msrb.mxu3 %v5581_v47  ;;  %v6140_v47 = vld [vmem:[#allocation4 + $0xb24] sm:$0xf]  ;;  %v2943_v44 = vadd.f32 %v6965_v26, %v2929_v58  ;;  %v5357_v40 = vor.u32 %v6108_v43, %v5354_v1  ;;  %v2959_v22 = vadd.f32 %v6988_v16, %v2945_v13  ;;  %v5530_v5 = vld [vmem:[#allocation4 + $0xb88] sm:$0xf0]  ;;  %v5650_v58 = vld [vmem:[#allocation7 + $0x78] sm:$0xf0]  ;;  %v3042_v43 = vpop.f32.mrf.mxu2 }
 0x1a9   : > { %3397 = vmatpush.bf16.msrb.mxu0 %v5381_v62  ;;  %v7012_v39 = vpop.f32.mrf.mxu1  ;;  %v5421_v62 = vor.u32 %v6124_v18, %v5418_v33  ;;  %v5485_v51 = vor.u32 %v6140_v47, %v5482_v36  ;;  %v5533_v1 = vor.u32 %v6152_v53, %v5530_v5  ;;  %v5653_v18 = vor.u32 %v6182_v54, %v5650_v58  ;;  %v6181_v33 = vld [vmem:[#allocation7 + $0x64] sm:$0xf0]  ;;  %v6180_v36 = vld [vmem:[#allocation7 + $0x64] sm:$0xf]  ;;  %v5642_v13 = vld [vmem:[#allocation7 + $0x68] sm:$0xf0] }
 0x1aa   : > { %3411 = vmatpush.bf16.msrb.mxu1 %v5445_v28  ;;  %v6106_v28 = vld [vmem:[#allocation4 + $0xa14] sm:$0xf]  ;;  %v2957_v26 = vadd.f32 %v6975_v35, %v2943_v44  ;;  %v2973_v42 = vadd.f32 %v7000_v56, %v2959_v22  ;;  %v6136_v35 = vld [vmem:[#allocation4 + $0xb04] sm:$0xf]  ;;  %v6177_v55 = vld [vmem:[#allocation7 + $0x44] sm:$0xf0] }
 0x1ab   : > { %3425 = vmatpush.bf16.msrb.mxu2 %v5509_v27  ;;  %v5346_v27 = vld [vmem:[#allocation4 + $0xa18] sm:$0xf0]  ;;  %v5632_v22 = vld [vmem:[#allocation7 + $0x50] sm:$0xf]  ;;  %v5624_v34 = vld [vmem:[#allocation7 + $0x40] sm:$0xf] }
 0x1ac   : > { %3439 = vmatpush.bf16.msrb.mxu3 %v5573_v4  ;;  %v6154_v4 = vld [vmem:[#allocation4 + $0xb94] sm:$0xf]  ;;  %v7020_v60 = vpop.f32.mrf.mxu3  ;;  %v5349_v16 = vor.u32 %v6106_v28, %v5346_v27  ;;  %v2987_v45 = vadd.f32 %v7002_v48, %v2973_v42  ;;  %v5634_v28 = vld [vmem:[#allocation7 + $0x58] sm:$0xf0]  ;;  %v6175_v42 = vld [vmem:[#allocation7 + $0x34] sm:$0xf0] }
 0x1ad   : > { %3398 = vmatpush.bf16.msrb.mxu0 %v5373_v25  ;;  %v5413_v25 = vor.u32 %v6122_v29, %v5410_v24  ;;  %v5541_v41 = vor.u32 %v6154_v4, %v5538_v61  ;;  %v3068_v47 = vpop.f32.mrf.mxu0  ;;  %v5626_v4 = vld [vmem:[#allocation7 + $0x48] sm:$0xf0]  ;;  %v6171_v54 = vld [vmem:[#allocation7 + $0x14] sm:$0xf0] }
 0x1ae   : > { %3412 = vmatpush.bf16.msrb.mxu1 %v5437_v50  ;;  %v5338_v50 = vld [vmem:[#allocation4 + $0xa08] sm:$0xf0]  ;;  %v3001_v48 = vadd.f32 %v7010_v11, %v2987_v45  ;;  %v5645_v11 = vor.u32 %v6180_v36, %v5642_v13 }
 0x1af   : > { %3426 = vmatpush.bf16.msrb.mxu2 %v5501_v6  ;;  %v6120_v6 = vld [vmem:[#allocation4 + $0xa84] sm:$0xf]  ;;  %v5341_v17 = vor.u32 %v6104_v32, %v5338_v50  ;;  %v5616_v32 = vld [vmem:[#allocation7 + $0x30] sm:$0xf]  ;;  %v5610_v45 = vld [vmem:[#allocation7 + $0x28] sm:$0xf0] }
 0x1b0   : > { %3440 = vmatpush.bf16.msrb.mxu3 %v5565_v63  ;;  %v2971_v63 = vadd.f32 %v6981_v49, %v2957_v26  ;;  %v5649_v49 = vor.u32 %v6183_v8, %v5648_v7  ;;  %v3096_v29 = vpop.f32.mrf.mxu2  ;;  %v6176_v26 = vld [vmem:[#allocation7 + $0x44] sm:$0xf] }
 0x1b1   : > { %3399 = vmatpush.bf16.msrb.mxu0 %v5365_v31  ;;  %v3028_v56 = vpop.f32.mrf.mxu1 }
 0x1b2   : > { %3413 = vmatpush.bf16.msrb.mxu1 %v5429_v2  ;;  %v2985_v31 = vadd.f32 %v6984_v0, %v2971_v63  ;;  %v5405_v2 = vor.u32 %v6120_v6, %v5402_v30  ;;  %v3015_v0 = vadd.f32 %v3014_v37, %v3001_v48  ;;  %v5625_v37 = vor.u32 %v6177_v55, %v5624_v34  ;;  %v6172_v63 = vld [vmem:[#allocation7 + $0x24] sm:$0xf]  ;;  %v5592_v48 = vld [vmem:[#allocation7] sm:$0xf] }
 0x1b3   : > { %3427 = vmatpush.bf16.msrb.mxu2 %v5493_v12  ;;  %v5469_v12 = vor.u32 %v6136_v35, %v5466_v52  ;;  %v5617_v30 = vor.u32 %v6175_v42, %v5616_v32  ;;  %v5608_v35 = vld [vmem:[#allocation7 + $0x20] sm:$0xf]  ;;  %v6173_v52 = vld [vmem:[#allocation7 + $0x24] sm:$0xf0] }
 0x1b4   : > { %3441 = vmatpush.bf16.msrb.mxu3 %v5557_v10  ;;  %v5640_v10 = vld [vmem:[#allocation7 + $0x60] sm:$0xf]  ;;  %v2999_v23 = vadd.f32 %v6990_v3, %v2985_v31  ;;  %v3056_v20 = vpop.f32.mrf.mxu3  ;;  %v6178_v3 = vld [vmem:[#allocation7 + $0x54] sm:$0xf]  ;;  %v3029_v27 = vadd.f32 %v3028_v56, %v3015_v0  ;;  %v5609_v7 = vor.u32 %v6173_v52, %v5608_v35  ;;  %v5714_v35 = vld [vmem:[#allocation7 + $0xf8] sm:$0xf0] }
 0x1b5   : > { %3400 = vmatpush.bf16.msrb.mxu0 %v5357_v40  ;;  %v5641_v44 = vor.u32 %v6181_v33, %v5640_v10  ;;  %v6170_v31 = vld [vmem:[#allocation7 + $0x14] sm:$0xf]  ;;  %v6168_v10 = vld [vmem:[#allocation7 + $0x4] sm:$0xf]  ;;  %v5594_v33 = vld [vmem:[#allocation7 + $0x8] sm:$0xf0] }
 0x1b6   : > { %3414 = vmatpush.bf16.msrb.mxu1 %v5421_v62  ;;  %v3013_v40 = vadd.f32 %v7006_v46, %v2999_v23  ;;  %v6179_v62 = vld [vmem:[#allocation7 + $0x54] sm:$0xf0]  ;;  %v3043_v24 = vadd.f32 %v3042_v43, %v3029_v27  ;;  %v5597_v23 = vor.u32 %v6168_v10, %v5594_v33  ;;  %v5704_v52 = vld [vmem:[#allocation7 + $0xe0] sm:$0xf] }
 0x1b7   : > { %3428 = vmatpush.bf16.msrb.mxu2 %v5485_v51 }
 0x1b8   : > { %3442 = vmatpush.bf16.msrb.mxu3 %v5549_v38  ;;  %v5633_v38 = vor.u32 %v6179_v62, %v5632_v22  ;;  %v3027_v46 = vadd.f32 %v7012_v39, %v3013_v40  ;;  %v5618_v39 = vld [vmem:[#allocation7 + $0x38] sm:$0xf0]  ;;  %v3098_v53 = vpop.f32.mrf.mxu2 }
 0x1b9   : > { %3401 = vmatpush.bf16.msrb.mxu0 %v5349_v16  ;;  %v3082_v51 = vpop.f32.mrf.mxu1  ;;  %v3057_v16 = vadd.f32 %v3056_v20, %v3043_v24 }
 0x1ba   : > { %3415 = vmatpush.bf16.msrb.mxu1 %v5413_v25  ;;  %v6174_v25 = vld [vmem:[#allocation7 + $0x34] sm:$0xf] }
 0x1bb   : > { %3429 = vmatpush.bf16.msrb.mxu2 %v5477_v59 }
 0x1bc   : > { %3443 = vmatpush.bf16.msrb.mxu3 %v5541_v41  ;;  %v3110_v61 = vpop.f32.mrf.mxu3 }
 0x1bd   : > { %3402 = vmatpush.bf16.msrb.mxu0 %v5341_v17  ;;  %v5613_v17 = vor.u32 %v6172_v63, %v5610_v45 }
 0x1be   : > { %3416 = vmatpush.bf16.msrb.mxu1 %v5405_v2  ;;  %v5602_v2 = vld [vmem:[#allocation7 + $0x18] sm:$0xf0] }
 0x1bf   : > { %3430 = vmatpush.bf16.msrb.mxu2 %v5469_v12 }
 0x1c0   : > { %3444 = vmatpush.bf16.msrb.mxu3 %v5533_v1  ;;  %3403 = vmatmul.bf16.vlgmr.msrb.gmra.mxu0 %v6889_v9  ;;  %v5637_v9 = vor.u32 %v6178_v3, %v5634_v28 }
 0x1c1   : > { %3655 = vmatpush.bf16.msra.mxu0 %v5649_v49  ;;  %3417 = vmatmul.bf16.vlgmr.msrb.gmra.mxu1 %v6893_v15  ;;  %v3041_v15 = vadd.f32 %v7016_v21, %v3027_v46  ;;  %v3084_v6 = vpop.f32.mrf.mxu1  ;;  %v5621_v21 = vor.u32 %v6174_v25, %v5618_v39  ;;  %v5605_v49 = vor.u32 %v6170_v31, %v5602_v2  ;;  %v856_v46 = vperm.slane %v6935_v57, 1  ;;  %v5712_v57 = vld [vmem:[#allocation7 + $0xf0] sm:$0xf] }
 0x1c2   : > { %3431 = vmatmul.bf16.vlgmr.msrb.gmra.mxu2 %v6891_v14  ;;  %v3070_v14 = vpop.f32.mrf.mxu0 }
 0x1c3   : > { %3683 = vmatpush.bf16.msra.mxu2 %v5653_v18  ;;  %3445 = vmatmul.bf16.vlgmr.msrb.gmra.mxu3 %v6895_v19  ;;  %v5629_v19 = vor.u32 %v6176_v26, %v5626_v4  ;;  %v3055_v59 = vadd.f32 %v7020_v60, %v3041_v15  ;;  %v3071_v50 = vadd.f32 %v3070_v14, %v3057_v16  ;;  %v5600_v60 = vld [vmem:[#allocation7 + $0x10] sm:$0xf]  ;;  %v6169_v18 = vld [vmem:[#allocation7 + $0x4] sm:$0xf0] }
 0x1c4   : > { %v3112_v58 = vpop.f32.mrf.mxu3  ;;  %v5601_v43 = vor.u32 %v6171_v54, %v5600_v60  ;;  %v5593_v36 = vor.u32 %v6169_v18, %v5592_v48  ;;  %v6194_v48 = vld [vmem:[#allocation7 + $0xd4] sm:$0xf] }
 0x1c5   : > { %3656 = vmatpush.bf16.msra.mxu0 %v5641_v44  ;;  %v3069_v41 = vadd.f32 %v3068_v47, %v3055_v59  ;;  %v3085_v5 = vadd.f32 %v3084_v6, %v3071_v50  ;;  %v6199_v6 = vld [vmem:[#allocation7 + $0xf4] sm:$0xf0] }
 0x1c7   : > { %3684 = vmatpush.bf16.msra.mxu2 %v5645_v11  ;;  %v3083_v8 = vadd.f32 %v3082_v51, %v3069_v41  ;;  %v3099_v56 = vadd.f32 %v3098_v53, %v3085_v5  ;;  %v3152_v11 = vpop.f32.mrf.mxu2  ;;  %v6197_v53 = vld [vmem:[#allocation7 + $0xe4] sm:$0xf0]  ;;  %v6196_v5 = vld [vmem:[#allocation7 + $0xe4] sm:$0xf] }
 0x1c9   : > { %3657 = vmatpush.bf16.msra.mxu0 %v5633_v38  ;;  %v3097_v12 = vadd.f32 %v3096_v29, %v3083_v8  ;;  %v3113_v1 = vadd.f32 %v3112_v58, %v3099_v56  ;;  %v3138_v40 = vpop.f32.mrf.mxu1  ;;  %v5705_v56 = vor.u32 %v6197_v53, %v5704_v52  ;;  %v5666_v52 = vld [vmem:[#allocation7 + $0x98] sm:$0xf0] }
 0x1ca   : > { %v3124_v44 = vpop.f32.mrf.mxu0 }
 0x1cb   : > { %3685 = vmatpush.bf16.msra.mxu2 %v5637_v9  ;;  %v3111_v47 = vadd.f32 %v3110_v61, %v3097_v12  ;;  %v3453_v13 = vmax.f32 %v3113_v1, 0.0  ;;  %v3125_v34 = vadd.f32 %v3124_v44, %v856_v46  ;;  %v5696_v1 = vld [vmem:[#allocation7 + $0xd0] sm:$0xf]  ;;  %v6192_v44 = vld [vmem:[#allocation7 + $0xc4] sm:$0xf] }
 0x1cc   : > { %v3166_v22 = vpop.f32.mrf.mxu3 }
 0x1cd   : > { %3658 = vmatpush.bf16.msra.mxu0 %v5625_v37  ;;  %v3451_v0 = vmax.f32 %v3111_v47, 0.0  ;;  %v3139_v26 = vadd.f32 %v3138_v40, %v3125_v34  ;;  %v5698_v47 = vld [vmem:[#allocation7 + $0xd8] sm:$0xf0] }
 0x1ce   : > { %v5682_v34 = vld [vmem:[#allocation7 + $0xb8] sm:$0xf0] }
 0x1cf   : > { %3686 = vmatpush.bf16.msra.mxu2 %v5629_v19  ;;  %v3455_v20 = vpack.c.bf16 %v3453_v13, %v3451_v0  ;;  %v3154_v3 = vpop.f32.mrf.mxu2  ;;  %v3153_v37 = vadd.f32 %v3152_v11, %v3139_v26  ;;  %v5688_v0 = vld [vmem:[#allocation7 + $0xc0] sm:$0xf] }
 0x1d1   : > { %3659 = vmatpush.bf16.msra.mxu0 %v5617_v30  ;;  %v3140_v51 = vpop.f32.mrf.mxu1  ;;  %v3167_v32 = vadd.f32 %v3166_v22, %v3153_v37  ;;  %v6198_v30 = vld [vmem:[#allocation7 + $0xf4] sm:$0xf] }
 0x1d2   : > { %v3126_v62 = vpop.f32.mrf.mxu0  ;;  %v5717_v45 = vor.u32 %v6198_v30, %v5714_v35  ;;  %v6187_v30 = vld [vmem:[#allocation7 + $0x94] sm:$0xf0] }
 0x1d3   : > { %3687 = vmatpush.bf16.msra.mxu2 %v5621_v21  ;;  %v3127_v15 = vadd.f32 %v3126_v62, %v856_v46  ;;  %v5713_v21 = vor.u32 %v6199_v6, %v5712_v57  ;;  %v5690_v62 = vld [vmem:[#allocation7 + $0xc8] sm:$0xf0]  ;;  %v6190_v46 = vld [vmem:[#allocation7 + $0xb4] sm:$0xf]  ;;  %v5664_v6 = vld [vmem:[#allocation7 + $0x90] sm:$0xf] }
 0x1d4   : > { %v3168_v28 = vpop.f32.mrf.mxu3  ;;  %3697 = vmatpush.bf16.msra.mxu3 %v5717_v45  ;;  %v5685_v26 = vor.u32 %v6190_v46, %v5682_v34  ;;  %v5665_v35 = vor.u32 %v6187_v30, %v5664_v6  ;;  %v6211_v6 = vld [vmem:[#allocation10 + $0x58] sm:$0xff]  ;;  %v6201_v30 = vld [vmem:[#allocation10 + $0x8] sm:$0xff] }
 0x1d5   : > { %3660 = vmatpush.bf16.msra.mxu0 %v5609_v7  ;;  %v3141_v19 = vadd.f32 %v3140_v51, %v3127_v15  ;;  %v5706_v7 = vld [vmem:[#allocation7 + $0xe8] sm:$0xf0]  ;;  %3669 = vmatpush.bf16.msra.mxu1 %v5713_v21  ;;  %v5693_v51 = vor.u32 %v6192_v44, %v5690_v62  ;;  %v5672_v15 = vld [vmem:[#allocation7 + $0xa0] sm:$0xf] }
 0x1d7   : > { %3688 = vmatpush.bf16.msra.mxu2 %v5613_v17  ;;  %v3208_v38 = vpop.f32.mrf.mxu2  ;;  %v3155_v25 = vadd.f32 %v3154_v3, %v3141_v19  ;;  %v5709_v17 = vor.u32 %v6196_v5, %v5706_v7  ;;  %v5656_v5 = vld [vmem:[#allocation7 + $0x80] sm:$0xf]  ;;  %v6185_v7 = vld [vmem:[#allocation7 + $0x84] sm:$0xf0] }
 0x1d9   : > { %3661 = vmatpush.bf16.msra.mxu0 %v5601_v43  ;;  %v3194_v29 = vpop.f32.mrf.mxu1  ;;  %v3169_v41 = vadd.f32 %v3168_v28, %v3155_v25  ;;  %3670 = vmatpush.bf16.msra.mxu1 %v5705_v56 }
 0x1da   : > { %v3180_v27 = vpop.f32.mrf.mxu0  ;;  %3698 = vmatpush.bf16.msra.mxu3 %v5709_v17  ;;  %v5657_v17 = vor.u32 %v6185_v7, %v5656_v5 }
 0x1db   : > { %3689 = vmatpush.bf16.msra.mxu2 %v5605_v49  ;;  %v3181_v59 = vadd.f32 %v3180_v27, %v3167_v32  ;;  %v6195_v49 = vld [vmem:[#allocation7 + $0xd4] sm:$0xf0]  ;;  %v5674_v32 = vld [vmem:[#allocation7 + $0xa8] sm:$0xf0] }
 0x1dc   : > { %v3222_v24 = vpop.f32.mrf.mxu3  ;;  %v5697_v33 = vor.u32 %v6195_v49, %v5696_v1 }
 0x1dd   : > { %3662 = vmatpush.bf16.msra.mxu0 %v5593_v36  ;;  %v3195_v8 = vadd.f32 %v3194_v29, %v3181_v59  ;;  %v5701_v36 = vor.u32 %v6194_v48, %v5698_v47  ;;  %v5680_v29 = vld [vmem:[#allocation7 + $0xb0] sm:$0xf] }
 0x1de   : > { %3671 = vmatpush.bf16.msra.mxu1 %v5697_v33 }
 0x1df   : > { %3690 = vmatpush.bf16.msra.mxu2 %v5597_v23  ;;  %v3210_v4 = vpop.f32.mrf.mxu2  ;;  %v3209_v58 = vadd.f32 %v3208_v38, %v3195_v8  ;;  %3699 = vmatpush.bf16.msra.mxu3 %v5701_v36  ;;  %v6191_v38 = vld [vmem:[#allocation7 + $0xb4] sm:$0xf0]  ;;  %v6184_v8 = vld [vmem:[#allocation7 + $0x84] sm:$0xf] }
 0x1e0   : > { %3663 = vmatmul.bf16.vlgmr.msra.gmra.mxu0 %v3455_v20 }
 0x1e1   : > { %v3196_v55 = vpop.f32.mrf.mxu1  ;;  %v3223_v18 = vadd.f32 %v3222_v24, %v3209_v58 }
 0x1e2   : > { %3691 = vmatmul.bf16.vlgmr.msra.gmra.mxu2 %v3455_v20  ;;  %v3182_v9 = vpop.f32.mrf.mxu0  ;;  %v6193_v20 = vld [vmem:[#allocation7 + $0xc4] sm:$0xf0] }
 0x1e3   : > { %v3183_v60 = vadd.f32 %v3182_v9, %v3169_v41  ;;  %v5689_v22 = vor.u32 %v6193_v20, %v5688_v0  ;;  %3700 = vmatpush.bf16.msra.mxu3 %v5693_v51  ;;  %v5681_v9 = vor.u32 %v6191_v38, %v5680_v29  ;;  %v6186_v41 = vld [vmem:[#allocation7 + $0x94] sm:$0xf] }
 0x1e4   : > { %v3224_v14 = vpop.f32.mrf.mxu3 }
 0x1e5   : > { %v3197_v12 = vadd.f32 %v3196_v55, %v3183_v60  ;;  %3672 = vmatpush.bf16.msra.mxu1 %v5689_v22  ;;  %v5658_v60 = vld [vmem:[#allocation7 + $0x88] sm:$0xf0] }
 0x1e6   : > { %v5661_v58 = vor.u32 %v6184_v8, %v5658_v60 }
 0x1e7   : > { %v3264_v42 = vpop.f32.mrf.mxu2  ;;  %v3211_v10 = vadd.f32 %v3210_v4, %v3197_v12  ;;  %3701 = vmatpush.bf16.msra.mxu3 %v5685_v26 }
 0x1e9   : > { %v3250_v16 = vpop.f32.mrf.mxu1  ;;  %v3225_v40 = vadd.f32 %v3224_v14, %v3211_v10  ;;  %3673 = vmatpush.bf16.msra.mxu1 %v5681_v9  ;;  %v6189_v14 = vld [vmem:[#allocation7 + $0xa4] sm:$0xf0]  ;;  %v6215_v9 = vld [vmem:[#allocation10 + $0x78] sm:$0xff] }
 0x1ea   : > { %v3236_v61 = vpop.f32.mrf.mxu0  ;;  %v5673_v19 = vor.u32 %v6189_v14, %v5672_v15  ;;  %v6214_v15 = vld [vmem:[#allocation10 + $0x70] sm:$0xff] }
 0x1eb   : > { %v3237_v13 = vadd.f32 %v3236_v61, %v3223_v18  ;;  %v6188_v61 = vld [vmem:[#allocation7 + $0xa4] sm:$0xf] }
 0x1ec   : > { %v7037_v39 = vpop.f32.mrf.mxu3  ;;  %v5677_v59 = vor.u32 %v6188_v61, %v5674_v32  ;;  %v6213_v32 = vld [vmem:[#allocation10 + $0x68] sm:$0xff] }
 0x1ed   : > { %v3251_v3 = vadd.f32 %v3250_v16, %v3237_v13  ;;  %3674 = vmatpush.bf16.msra.mxu1 %v5673_v19  ;;  %v6205_v19 = vld [vmem:[#allocation10 + $0x28] sm:$0xff] }
 0x1ee   : > { %3702 = vmatpush.bf16.msra.mxu3 %v5677_v59  ;;  %v6204_v59 = vld [vmem:[#allocation10 + $0x20] sm:$0xff] }
 0x1ef   : > { %v3266_v54 = vpop.f32.mrf.mxu2  ;;  %v3265_v24 = vadd.f32 %v3264_v42, %v3251_v3 }
 0x1f1   : > { %v3252_v63 = vpop.f32.mrf.mxu1  ;;  %v3279_v37 = vadd.f32 %v7037_v39, %v3265_v24  ;;  %3675 = vmatpush.bf16.msra.mxu1 %v5665_v35  ;;  %v6207_v24 = vld [vmem:[#allocation10 + $0x38] sm:$0xff]  ;;  %v6209_v35 = vld [vmem:[#allocation10 + $0x48] sm:$0xff] }
 0x1f2   : > { %v3238_v50 = vpop.f32.mrf.mxu0  ;;  %3849 = vmatpush.bf16.msrb.mxu0 %v6207_v24 }
 0x1f3   : > { %v3239_v28 = vadd.f32 %v3238_v50, %v3225_v40 }
 0x1f4   : > { %v3280_v31 = vpop.f32.mrf.mxu3 }
 0x1f5   : > { %v3253_v4 = vadd.f32 %v3252_v63, %v3239_v28  ;;  %v5669_v63 = vor.u32 %v6186_v41, %v5666_v52  ;;  %3676 = vmatpush.bf16.msra.mxu1 %v5657_v17  ;;  %v6210_v41 = vld [vmem:[#allocation10 + $0x50] sm:$0xff]  ;;  %v6208_v52 = vld [vmem:[#allocation10 + $0x40] sm:$0xff] }
 0x1f7   : > { %v3267_v16 = vadd.f32 %v3266_v54, %v3253_v4  ;;  %3703 = vmatpush.bf16.msra.mxu3 %v5669_v63  ;;  %v6206_v4 = vld [vmem:[#allocation10 + $0x30] sm:$0xff]  ;;  %v3489_v63 = vld [vmem:[#allocation9] sm:$0x3] }
 0x1f8   : > { %3850 = vmatpush.bf16.msrb.mxu0 %v6206_v4  ;;  %v3491_v5 = vperm.slane %v3489_v63, 0  ;;  %v3492_v17 = vperm.slane %v3489_v63, 1 }
 0x1f9   : > { %v3281_v21 = vadd.f32 %v3280_v31, %v3267_v16  ;;  %3863 = vmatpush.bf16.msrb.mxu1 %v6215_v9 }
 0x1fb   : > { %3704 = vmatpush.bf16.msra.mxu3 %v5661_v58 }
 0x1fc   : > { %3851 = vmatpush.bf16.msrb.mxu0 %v6205_v19 }
 0x1fd   : > { %v3292_v2 = vpop.f32.mrf.mxu0  ;;  %3864 = vmatpush.bf16.msrb.mxu1 %v6214_v15 }
 0x1fe   : > { %v3306_v43 = vpop.f32.mrf.mxu1  ;;  %v3293_v50 = vadd.f32 %v3292_v2, %v3279_v37 }
 0x200   : > { %v3307_v45 = vadd.f32 %v3306_v43, %v3293_v50  ;;  %3852 = vmatpush.bf16.msrb.mxu0 %v6204_v59  ;;  %v6203_v50 = vld [vmem:[#allocation10 + $0x18] sm:$0xff] }
 0x201   : > { %3865 = vmatpush.bf16.msrb.mxu1 %v6213_v32 }
 0x204   : > { %3853 = vmatpush.bf16.msrb.mxu0 %v6203_v50 }
 0x205   : > { %v3320_v23 = vpop.f32.mrf.mxu2  ;;  %v3294_v27 = vpop.f32.mrf.mxu0 }
 0x206   : > { %v3334_v11 = vpop.f32.mrf.mxu3  ;;  %v3308_v55 = vpop.f32.mrf.mxu1  ;;  %v3295_v39 = vadd.f32 %v3294_v27, %v3281_v21  ;;  %v3321_v56 = vadd.f32 %v3320_v23, %v3307_v45  ;;  %v6200_v21 = vld [vmem:[#allocation10] sm:$0xff] }
 0x208   : > { %v3309_v2 = vadd.f32 %v3308_v55, %v3295_v39  ;;  %v3335_v31 = vadd.f32 %v3334_v11, %v3321_v56 }
 0x20d   : > { %v3322_v25 = vpop.f32.mrf.mxu2 }
 0x20e   : > { %v3336_v57 = vpop.f32.mrf.mxu3  ;;  %v3323_v1 = vadd.f32 %v3322_v25, %v3309_v2 }
 0x210   : > { %v3337_v18 = vadd.f32 %v3336_v57, %v3323_v1  ;;  %v6212_v57 = vld [vmem:[#allocation10 + $0x60] sm:$0xff] }
 0x211   : > { %3866 = vmatpush.bf16.msrb.mxu1 %v6212_v57 }
 0x215   : > { %3867 = vmatpush.bf16.msrb.mxu1 %v6211_v6 }
 0x219   : > { %3868 = vmatpush.bf16.msrb.mxu1 %v6210_v41 }
 0x21d   : > { %v3348_v42 = vpop.f32.mrf.mxu0  ;;  %3869 = vmatpush.bf16.msrb.mxu1 %v6209_v35 }
 0x21e   : > { %v3362_v53 = vpop.f32.mrf.mxu1  ;;  %v3349_v48 = vadd.f32 %v3348_v42, %v3335_v31  ;;  %v6202_v42 = vld [vmem:[#allocation10 + $0x10] sm:$0xff] }
 0x21f   : > { %3854 = vmatpush.bf16.msrb.mxu0 %v6202_v42 }
 0x220   : > { %v3363_v10 = vadd.f32 %v3362_v53, %v3349_v48 }
 0x221   : > { %3870 = vmatpush.bf16.msrb.mxu1 %v6208_v52 }
 0x223   : > { %3855 = vmatpush.bf16.msrb.mxu0 %v6201_v30 }
 0x225   : > { %v3376_v54 = vpop.f32.mrf.mxu2  ;;  %v3350_v49 = vpop.f32.mrf.mxu0 }
 0x226   : > { %v3390_v12 = vpop.f32.mrf.mxu3  ;;  %v3364_v43 = vpop.f32.mrf.mxu1  ;;  %v3351_v33 = vadd.f32 %v3350_v49, %v3337_v18  ;;  %v3377_v36 = vadd.f32 %v3376_v54, %v3363_v10 }
 0x227   : > { %3856 = vmatpush.bf16.msrb.mxu0 %v6200_v21 }
 0x228   : > { %v3365_v0 = vadd.f32 %v3364_v43, %v3351_v33  ;;  %v3391_v44 = vadd.f32 %v3390_v12, %v3377_v36 }
 0x22d   : > { %v3378_v47 = vpop.f32.mrf.mxu2 }
 0x22e   : > { %v3392_v13 = vpop.f32.mrf.mxu3  ;;  %v3379_v40 = vadd.f32 %v3378_v47, %v3365_v0  ;;  %v3879_v0 = vlaneseq }
 0x230   : > { %v3393_v51 = vadd.f32 %v3392_v13, %v3379_v40 }
 0x23d   : > { %v3404_v23 = vpop.f32.mrf.mxu0 }
 0x23e   : > { %v3418_v20 = vpop.f32.mrf.mxu1  ;;  %v3405_v22 = vadd.f32 %v3404_v23, %v3391_v44  ;;  %v3880_v44 = vand.u32 127, %v3879_v0 }
 0x240   : > { %v3419_v28 = vadd.f32 %v3418_v20, %v3405_v22  ;;  %v6330_v20 = vld [vmem:[#allocation12] ss:$0 sm:$0xff]  ;;  %vm3881_vm0 = vcmp.lt.s32.totalorder %v3880_v44, 10 }
 0x245   : > { %v3432_v62 = vpop.f32.mrf.mxu2  ;;  %v3406_v11 = vpop.f32.mrf.mxu0 }
 0x246   : > { %v3446_v3 = vpop.f32.mrf.mxu3  ;;  %v3407_v27 = vadd.f32 %v3406_v11, %v3393_v51  ;;  %v3433_v29 = vadd.f32 %v3432_v62, %v3419_v28  ;;  %v3420_v38 = vpop.f32.mrf.mxu1 }
 0x248   : > { %v3421_v46 = vadd.f32 %v3420_v38, %v3407_v27  ;;  %v3447_v55 = vadd.f32 %v3446_v3, %v3433_v29 }
 0x24a   : > { %v3452_v37 = vmax.f32 %v3447_v55, 0.0 }
 0x24d   : > { %v3434_v34 = vpop.f32.mrf.mxu2 }
 0x24e   : > { %v3435_v26 = vadd.f32 %v3434_v34, %v3421_v46  ;;  %v3448_v14 = vpop.f32.mrf.mxu3 }
 0x250   : > { %v3449_v61 = vadd.f32 %v3448_v14, %v3435_v26 }
 0x252   : > { %v3454_v16 = vmax.f32 %v3449_v61, 0.0 }
 0x254   : > { %v3456_v25 = vpack.c.bf16 %v3454_v16, %v3452_v37 }
 0x256   : > { %3677 = vmatmul.bf16.vlgmr.msra.gmra.mxu1 %v3456_v25  ;;  %3705 = vmatmul.bf16.vlgmr.msra.gmra.mxu3 %v3456_v25 }
 0x25d   : > { %v3664_v53 = vpop.f32.mrf.mxu0 }
 0x25e   : > { %v3665_v8 = vadd.f32 %v3664_v53, %v3491_v5 }
 0x265   : > { %v3692_v45 = vpop.f32.mrf.mxu2  ;;  %v3666_v7 = vpop.f32.mrf.mxu0 }
 0x266   : > { %v3667_v60 = vadd.f32 %v3666_v7, %v3491_v5  ;;  %v3693_v31 = vadd.f32 %v3692_v45, %v3492_v17 }
 0x26d   : > { %v3694_v12 = vpop.f32.mrf.mxu2 }
 0x26e   : > { %v3695_v48 = vadd.f32 %v3694_v12, %v3492_v17 }
 0x2d3   : > { %v3678_v39 = vpop.f32.mrf.mxu1 }
 0x2d4   : > { %v3679_v54 = vadd.f32 %v3678_v39, %v3665_v8 }
 0x2d6   : > { %v3711_v1 = vmax.f32 %v3679_v54, 0.0 }
 0x2d9   : > { %v3706_v56 = vpop.f32.mrf.mxu3 }
 0x2da   : > { %v3707_v43 = vadd.f32 %v3706_v56, %v3693_v31 }
 0x2db   : > { %v3680_v58 = vpop.f32.mrf.mxu1 }
 0x2dc   : > { %v3681_v2 = vadd.f32 %v3680_v58, %v3667_v60  ;;  %v3712_v47 = vmax.f32 %v3707_v43, 0.0 }
 0x2de   : > { %v3713_v49 = vmax.f32 %v3681_v2, 0.0 }
 0x2e0   : > { %v3715_v18 = vpack.c.bf16 %v3713_v49, %v3711_v1 }
 0x2e1   : > { %v3708_v10 = vpop.f32.mrf.mxu3 }
 0x2e2   : > { %v3709_v33 = vadd.f32 %v3708_v10, %v3695_v48  ;;  %3857 = vmatmul.bf16.vlgmr.msrb.gmra.mxu0 %v3715_v18 }
 0x2e4   : > { %v3714_v36 = vmax.f32 %v3709_v33, 0.0 }
 0x2e6   : > { %v3716_v13 = vpack.c.bf16 %v3714_v36, %v3712_v47 }
 0x2e8   : > { %3871 = vmatmul.bf16.vlgmr.msrb.gmra.mxu1 %v3716_v13 }
 0x35f   : > { %v3858_v23 = vpop.f32.mrf.mxu0 }
 0x360   : > { %v3859_v40 = vadd.f32 %v6330_v20, %v3858_v23 }
 0x365   : > { %v3872_v22 = vpop.f32.mrf.mxu1 }
 0x366   : > { %v3873_v62 = vadd.f32 %v3872_v22, %v3859_v40 }
 0x367   : > { %v3860_v3 = vpop.f32.mrf.mxu0 }
 0x368   : > { %v3877_v51 = vmax.f32 %v3873_v62, 0.0  ;;  %v3861_v28 = vadd.f32 %v6330_v20, %v3860_v3 }
 0x36a   : > { %v3882_v11 = vsel %vm3881_vm0, %v3877_v51, -inf }
 0x36b   : > { %3884 = vmax.xlane.f32.xlu0 %v3882_v11 }
 0x36d   : > { %v3874_v27 = vpop.f32.mrf.mxu1 }
 0x36e   : > { %v3875_v29 = vadd.f32 %v3874_v27, %v3861_v28 }
 0x370   : > { %v3878_v38 = vmax.f32 %v3875_v29, 0.0 }
 0x372   : > { %v3883_v46 = vsel %vm3881_vm0, %v3878_v38, -inf }
 0x373   : > { %3886 = vmax.xlane.f32.xlu0 %v3883_v46 }
 0x3de   : > { %v3885_v24 = vpop.xlane.xlu0 %3884 }
 0x3df   : > { %v3888_v9 = vsub.f32 %v3882_v11, %v3885_v24 }
 0x3e1   : > { %v3890_v34 = vmul.f32 1.442695, %v3888_v9 }
 0x3e3   : > { %6331 = vpow2.f32 %v3890_v34 }
 0x3e6   : > { %v3887_v55 = vpop.xlane.xlu0 %3886 }
 0x3e7   : > { %v3889_v26 = vsub.f32 %v3883_v46, %v3887_v55 }
 0x3e9   : > { %v6332_v4 = vpop.eup %6331  ;;  %v3892_v15 = vmul.f32 1.442695, %v3889_v26 }
 0x3ea   : > { %3894 = vadd.xlane.f32.xlu1 %v6332_v4 }
 0x3eb   : > { %6333 = vpow2.f32 %v3892_v15 }
 0x3f1   : > { %v6334_v14 = vpop.eup %6333 }
 0x3f2   : > { %3896 = vadd.xlane.f32.xlu1 %v6334_v14 }
 0x45d   : > { %v3895_v61 = vpop.xlane.xlu1 %3894 }
 0x45e   : > { %6335 = vlog2.f32 %v3895_v61 }
 0x464   : > { %v6336_v16 = vpop.eup %6335 }
 0x465   : > { %v3897_v37 = vpop.xlane.xlu1 %3896  ;;  %v3899_v19 = vmul.f32 0.6931472, %v6336_v16 }
 0x466   : > { %6337 = vlog2.f32 %v3897_v37 }
 0x467   : > { %v3902_v59 = vsub.f32 %v3888_v9, %v3899_v19 }
 0x46c   : > { %v6338_v32 = vpop.eup %6337 }
 0x46d   : > { %v3901_v25 = vmul.f32 0.6931472, %v6338_v32 }
 0x46f   : > { %v3903_v50 = vsub.f32 %v3889_v26, %v3901_v25 }
 0x471   : > { %v6219_v57 = vpack.c.bf16 %v3903_v50, %v3902_v59 }
 0x473   : > { %6220 = vst [vmem:[%s395_s23] sm:$0xff] %v6219_v57  }
 0x474 PF: > { %p20_p3 = scmp.ge.s32.totalorder %s6721_s11, 4   ;;  %s7073_s24 = smov %s6587_s25 }
 0x475   : > { %s7074_s25 = smov %s6591_s26  ;;  %s7075_s26 = smov %s6733_s17 }
 0x476   : > { %s7076_s27 = smov %s6721_s11  ;;  %22 = sbr.rel (!%p20_p3) target bundleno = 6 (0x6), region = 112 }
 0x47b   :  { %3930 = vsyncpa [#allocation3], 1 }
 0x47c   :  { %3932 = vsyncpa [#allocation3 + $0x1], 1 }
 0x47d   :  { %3933 = vsyncpa [#allocation5], 1 }
 0x47e   :  { %3934 = vsyncpa [#allocation8], 1 }
 0x47f   :  { %3935 = vsyncpa [#allocation11], 1 }

</bundles_post_ra>
